<compile_context>
chip_gen: v5e
topology: v5e:2x2
jax: 0.10.0
libtpu: 0.0.40
codegen_flags: <defaults>
</compile_context>

<pallas_src>
import jax
import jax.numpy as jnp
from jax import lax
from jax.experimental import pallas as pl
from jax.experimental.pallas import tpu as pltpu


# ------------------------------- Pallas kernel -------------------------------


def _reflect_rows(z):
    """1-pixel reflect padding along axis 0 (PyTorch 'reflect' semantics)."""
    n = z.shape[0]
    return jnp.concatenate([z[1:2], z, z[n - 2:n - 1]], axis=0)


def _dis_block_kernel(x_ref, w3_ref, w4_ref, w1_ref, o_ref):
    """Fused DisBlock forward for one batch element.

    x_ref : (1, H, Wo, 2*Cin)  NHWC x with W split into (Wo, parity) packed on channels.
    w3_ref: (9*Cin, Cout)      3x3 conv weight, im2col-folded, (kh, kw, ci) order.
    w4_ref: (16*Cout, Cout)    4x4 conv weight, im2col-folded, (kh, kw, ci) order.
    w1_ref: (Cin, Cout)        1x1 conv weight.
    o_ref : (1, Ho, Wo, Cout)  output block (NHWC).
    """
    _, H, Wo, two_cin = x_ref.shape
    cin = two_cin // 2
    _, Ho, _, cout = o_ref.shape

    xw = x_ref[0]                                   # (H, Wo, 2*Cin)
    # W-parity planes of x: x_par[b][h, j, :] == x[h, 2*j + b, :]
    x_par = (xw[:, :, :cin], xw[:, :, cin:])

    # ---- reflect-padded x as W-parity planes: xp_par[c][u, m] == xpad[u, 2m + c] ----
    x0p = _reflect_rows(x_par[0])                   # (H+2, Wo, Cin)
    x1p = _reflect_rows(x_par[1])
    xp_par = (
        jnp.concatenate([x1p[:, :1], x1p], axis=1),          # even columns of xpad
        jnp.concatenate([x0p, x0p[:, Wo - 1:Wo]], axis=1),   # odd  columns of xpad
    )                                                # each (H+2, Wo+1, Cin)

    w3 = w3_ref[...]

    # ---- residual = ReLU(conv3x3(xpad)), one im2col dot per output-column parity ----
    def conv3_parity(b):
        taps = []
        for kh in range(3):
            for kw in range(3):
                c, q = (b + kw) % 2, (b + kw) // 2
                taps.append(xp_par[c][kh:kh + H, q:q + Wo, :])
        patches = jnp.concatenate(taps, axis=-1)             # (H, Wo, 9*Cin)
        r = jnp.dot(patches.reshape(H * Wo, 9 * cin), w3,
                    preferred_element_type=jnp.float32)
        r = jnp.maximum(r, 0.0)                              # ReLU (f32)
        return r.reshape(H, Wo, cout).astype(xw.dtype)

    r0 = conv3_parity(0)                            # residual[:, 0::2, :]
    r1 = conv3_parity(1)                            # residual[:, 1::2, :]

    # ---- reflect-padded residual, W-parity planes split by row parity ----
    #      rp_par[c][i, a, m, :] == rpad[2*i + a, 2*m + c, :]
    rp0 = _reflect_rows(jnp.concatenate([r1[:, :1], r1], axis=1))
    rp1 = _reflect_rows(jnp.concatenate([r0, r0[:, Wo - 1:Wo]], axis=1))
    rp_par = (rp0.reshape(Ho + 1, 2, Wo + 1, cout),
              rp1.reshape(Ho + 1, 2, Wo + 1, cout))

    # ---- down = LeakyReLU0.2(conv4x4 stride-2 of rpad): one dot with K = 16*Cout ----
    taps = []
    for kh in range(4):
        a, p = kh % 2, kh // 2
        for kw in range(4):
            c, q = kw % 2, kw // 2
            taps.append(rp_par[c][p:p + Ho, a, q:q + Wo, :])
    patches4 = jnp.concatenate(taps, axis=-1)                # (Ho, Wo, 16*Cout)
    down = jnp.dot(patches4.reshape(Ho * Wo, 16 * cout), w4_ref[...],
                   preferred_element_type=jnp.float32)
    down = jnp.maximum(down, 0.2 * down)                     # LeakyReLU(0.2), f32

    # ---- skip = maxpool2x2(conv1x1(x)); conv1x1 is pointwise, so pool over the four
    #      spatial parities of conv(x). Fold the 4 planes along M into a single dot. ----
    planes = [x_par[b].reshape(Ho, 2, Wo, cin)[:, a]         # (Ho, Wo, Cin)
              for a in (0, 1) for b in (0, 1)]
    xstack = jnp.concatenate(planes, axis=0)                 # (4*Ho, Wo, Cin)
    y = jnp.dot(xstack.reshape(4 * Ho * Wo, cin), w1_ref[...],
                preferred_element_type=jnp.float32)
    y4 = y.reshape(4, Ho * Wo, cout)
    pooled = jnp.maximum(jnp.maximum(y4[0], y4[1]), jnp.maximum(y4[2], y4[3]))

    o_ref[0] = (down + pooled).reshape(Ho, Wo, cout).astype(o_ref.dtype)


# -------------------------------- JAX wrapper ---------------------------------


def dis_block_forward(x_nchw, w3_oihw, w4_oihw, w1_oihw, *,
                      compute_dtype=jnp.bfloat16):
    """DisBlock.forward: down(residual(x)) + maxpool(conv1x1(x)); bias=False."""
    B, Cin, H, W = x_nchw.shape
    Cout = w3_oihw.shape[0]
    assert H % 2 == 0 and W % 2 == 0, "spatial dims must be even"
    Ho, Wo = H // 2, W // 2
    cd = compute_dtype

    # NHWC + pack the W-parity pair onto the channel axis (free row-major reshape,
    # no extra HBM pass beyond the unavoidable NCHW->NHWC transpose).
    x = jnp.transpose(x_nchw, (0, 2, 3, 1)).astype(cd).reshape(B, H, Wo, 2 * Cin)

    # Fold conv taps for the in-kernel im2col dots (HWIO, flattened (kh, kw, ci)).
    w3 = jnp.transpose(w3_oihw, (2, 3, 1, 0)).astype(cd).reshape(9 * Cin, Cout)
    w4 = jnp.transpose(w4_oihw, (2, 3, 1, 0)).astype(cd).reshape(16 * Cout, Cout)
    w1 = jnp.transpose(w1_oihw, (2, 3, 1, 0)).astype(cd).reshape(Cin, Cout)

    out_nhwc = pl.pallas_call(
        _dis_block_kernel,
        out_shape=jax.ShapeDtypeStruct((B, Ho, Wo, Cout), jnp.float32),
        grid=(B,),
        in_specs=[
            pl.BlockSpec((1, H, Wo, 2 * Cin), lambda b: (b, 0, 0, 0)),
            pl.BlockSpec((9 * Cin, Cout), lambda b: (0, 0)),
            pl.BlockSpec((16 * Cout, Cout), lambda b: (0, 0)),
            pl.BlockSpec((Cin, Cout), lambda b: (0, 0)),
        ],
        out_specs=pl.BlockSpec((1, Ho, Wo, Cout), lambda b: (b, 0, 0, 0)),
        compiler_params=pltpu.CompilerParams(
            dimension_semantics=("parallel",),       # v7x: shard batch over 2 TCs
            vmem_limit_bytes=32 * 1024 * 1024,
        ),
    )(x, w3, w4, w1)

    return jnp.transpose(out_nhwc, (0, 3, 1, 2))     # back to NCHW


# ------------------------ parameter setup / reference -------------------------


def _spectral_normalize(w_oihw, key):
    """PyTorch nn.utils.spectral_norm semantics: W / sigma from one power iteration
    (deterministic u init here; this is synthetic test scaffolding)."""
    o = w_oihw.shape[0]
    wm = w_oihw.reshape(o, -1)
    u = jax.random.normal(key, (o,), dtype=jnp.float32)
    u = u / (jnp.linalg.norm(u) + 1e-12)
    v = wm.T @ u
    v = v / (jnp.linalg.norm(v) + 1e-12)
    u = wm @ v
    u = u / (jnp.linalg.norm(u) + 1e-12)
    sigma = u @ (wm @ v)
    return w_oihw / sigma


def _reference_forward(x, w3, w4, w1, compute_dtype=jnp.float32):
    """Pure-JAX (XLA conv) reference; optional bf16 casts placed to match the kernel."""
    cd = compute_dtype
    dn = ('NCHW', 'OIHW', 'NCHW')
    xc, w3c, w4c, w1c = (t.astype(cd) for t in (x, w3, w4, w1))
    xr = jnp.pad(xc, ((0, 0), (0, 0), (1, 1), (1, 1)), mode='reflect')
    r = lax.conv_general_dilated(xr, w3c, (1, 1), 'VALID', dimension_numbers=dn,
                                 preferred_element_type=jnp.float32)
    r = jnp.maximum(r, 0.0).astype(cd)
    rp = jnp.pad(r, ((0, 0), (0, 0), (1, 1), (1, 1)), mode='reflect')
    d = lax.conv_general_dilated(rp, w4c, (2, 2), 'VALID', dimension_numbers=dn,
                                 preferred_element_type=jnp.float32)
    d = jnp.where(d > 0, d, 0.2 * d)
    y = lax.conv_general_dilated(xc, w1c, (1, 1), 'VALID', dimension_numbers=dn,
                                 preferred_element_type=jnp.float32)
    p = lax.reduce_window(y, -jnp.inf, lax.max, (1, 1, 2, 2), (1, 1, 2, 2), 'VALID')
    return d + p


if __name__ == "__main__":
    key = jax.random.PRNGKey(0)
    kx, k3, k4, k1, ku3, ku4, ku1 = jax.random.split(key, 7)

    B, Cin, Cout, H, W = 2, 4, 8, 16, 16
    x = jax.random.normal(kx, (B, Cin, H, W), dtype=jnp.float32)

    # Conv weights in PyTorch OIHW layout; bias=False as in DisBlock(use_sn=True).
    w3 = 0.1 * jax.random.normal(k3, (Cout, Cin, 3, 3), dtype=jnp.float32)
    w4 = 0.1 * jax.random.normal(k4, (Cout, Cout, 4, 4), dtype=jnp.float32)
    w1 = 0.1 * jax.random.normal(k1, (Cout, Cin, 1, 1), dtype=jnp.float32)
    w3 = _spectral_normalize(w3, ku3)
    w4 = _spectral_normalize(w4, ku4)
    w1 = _spectral_normalize(w1, ku1)

    # main path: bf16 inputs / f32 accumulation, vs bf16-matched reference
    fwd_bf16 = jax.jit(lambda *a: dis_block_forward(*a, compute_dtype=jnp.bfloat16))
    out = jax.block_until_ready(fwd_bf16(x, w3, w4, w1))
    assert out.shape == (B, Cout, H // 2, W // 2), out.shape
    ref_bf16 = _reference_forward(x, w3, w4, w1, compute_dtype=jnp.bfloat16)
    err = float(jnp.max(jnp.abs(out - ref_bf16)))
    assert err < 2e-2, f"bf16 kernel vs bf16 reference mismatch: {err}"

    # full-precision mode vs f32 reference
    fwd_f32 = jax.jit(lambda *a: dis_block_forward(*a, compute_dtype=jnp.float32))
    out32 = jax.block_until_ready(fwd_f32(x, w3, w4, w1))
    ref32 = _reference_forward(x, w3, w4, w1, compute_dtype=jnp.float32)
    err32 = float(jnp.max(jnp.abs(out32 - ref32)))
    assert err32 < 5e-3, f"f32 kernel vs f32 reference mismatch: {err32}"

    print("KERNEL_OK")
</pallas_src>

<mosaic_0001>
module attributes {stable_mosaic.version = 11 : i64} {
  func.func @_dis_block_kernel(%arg0: i32, %arg1: memref<1x16x8x8xbf16, #tpu.memory_space<vmem>>, %arg2: memref<36x8xbf16, #tpu.memory_space<vmem>>, %arg3: memref<128x8xbf16, #tpu.memory_space<vmem>>, %arg4: memref<4x8xbf16, #tpu.memory_space<vmem>>, %arg5: memref<1x8x8x8xf32, #tpu.memory_space<vmem>>) attributes {dimension_semantics = [#tpu.dimension_semantics<parallel>], iteration_bounds = array<i64: 2>, scalar_prefetch = 0 : i64, scratch_operands = 0 : i64, tpu.core_type = #tpu.core_type<tc>, window_params = [{transform_indices = @transform_0, window_bounds = array<i64: 1, 16, 8, 8>}, {pipeline_mode = #tpu.pipeline_mode<synchronous>, transform_indices = @transform_1, window_bounds = array<i64: 36, 8>}, {pipeline_mode = #tpu.pipeline_mode<synchronous>, transform_indices = @transform_2, window_bounds = array<i64: 128, 8>}, {pipeline_mode = #tpu.pipeline_mode<synchronous>, transform_indices = @transform_3, window_bounds = array<i64: 4, 8>}, {transform_indices = @transform_4, window_bounds = array<i64: 1, 8, 8, 8>}]} {
    %c0 = arith.constant 0 : index
    %c0_0 = arith.constant 0 : index
    %c0_1 = arith.constant 0 : index
    %c0_2 = arith.constant 0 : index
    %0 = vector.load %arg1[%c0, %c0_0, %c0_1, %c0_2] : memref<1x16x8x8xbf16, #tpu.memory_space<vmem>>, vector<1x16x8x8xbf16>
    %1 = vector.shape_cast %0 : vector<1x16x8x8xbf16> to vector<16x8x8xbf16>
    %2 = vector.extract_strided_slice %1 {offsets = [0, 0, 0], sizes = [16, 8, 4], strides = [1, 1, 1]} : vector<16x8x8xbf16> to vector<16x8x4xbf16>
    %3 = vector.extract_strided_slice %1 {offsets = [0, 0, 4], sizes = [16, 8, 4], strides = [1, 1, 1]} : vector<16x8x8xbf16> to vector<16x8x4xbf16>
    %4 = vector.extract_strided_slice %2 {offsets = [1, 0, 0], sizes = [1, 8, 4], strides = [1, 1, 1]} : vector<16x8x4xbf16> to vector<1x8x4xbf16>
    %5 = vector.extract_strided_slice %2 {offsets = [14, 0, 0], sizes = [1, 8, 4], strides = [1, 1, 1]} : vector<16x8x4xbf16> to vector<1x8x4xbf16>
    %6 = tpu.concatenate %4, %2, %5 in 0 : vector<1x8x4xbf16>, vector<16x8x4xbf16>, vector<1x8x4xbf16> -> vector<18x8x4xbf16>
    %7 = vector.extract_strided_slice %3 {offsets = [1, 0, 0], sizes = [1, 8, 4], strides = [1, 1, 1]} : vector<16x8x4xbf16> to vector<1x8x4xbf16>
    %8 = vector.extract_strided_slice %3 {offsets = [14, 0, 0], sizes = [1, 8, 4], strides = [1, 1, 1]} : vector<16x8x4xbf16> to vector<1x8x4xbf16>
    %9 = tpu.concatenate %7, %3, %8 in 0 : vector<1x8x4xbf16>, vector<16x8x4xbf16>, vector<1x8x4xbf16> -> vector<18x8x4xbf16>
    %10 = vector.extract_strided_slice %9 {offsets = [0, 0, 0], sizes = [18, 1, 4], strides = [1, 1, 1]} : vector<18x8x4xbf16> to vector<18x1x4xbf16>
    %11 = tpu.concatenate %10, %9 in 1 : vector<18x1x4xbf16>, vector<18x8x4xbf16> -> vector<18x9x4xbf16>
    %12 = vector.extract_strided_slice %6 {offsets = [0, 7, 0], sizes = [18, 1, 4], strides = [1, 1, 1]} : vector<18x8x4xbf16> to vector<18x1x4xbf16>
    %13 = tpu.concatenate %6, %12 in 1 : vector<18x8x4xbf16>, vector<18x1x4xbf16> -> vector<18x9x4xbf16>
    %c0_3 = arith.constant 0 : index
    %c0_4 = arith.constant 0 : index
    %14 = vector.load %arg2[%c0_3, %c0_4] : memref<36x8xbf16, #tpu.memory_space<vmem>>, vector<36x8xbf16>
    %15 = vector.extract_strided_slice %11 {offsets = [0, 0, 0], sizes = [16, 8, 4], strides = [1, 1, 1]} : vector<18x9x4xbf16> to vector<16x8x4xbf16>
    %16 = vector.extract_strided_slice %13 {offsets = [0, 0, 0], sizes = [16, 8, 4], strides = [1, 1, 1]} : vector<18x9x4xbf16> to vector<16x8x4xbf16>
    %17 = vector.extract_strided_slice %11 {offsets = [0, 1, 0], sizes = [16, 8, 4], strides = [1, 1, 1]} : vector<18x9x4xbf16> to vector<16x8x4xbf16>
    %18 = vector.extract_strided_slice %11 {offsets = [1, 0, 0], sizes = [16, 8, 4], strides = [1, 1, 1]} : vector<18x9x4xbf16> to vector<16x8x4xbf16>
    %19 = vector.extract_strided_slice %13 {offsets = [1, 0, 0], sizes = [16, 8, 4], strides = [1, 1, 1]} : vector<18x9x4xbf16> to vector<16x8x4xbf16>
    %20 = vector.extract_strided_slice %11 {offsets = [1, 1, 0], sizes = [16, 8, 4], strides = [1, 1, 1]} : vector<18x9x4xbf16> to vector<16x8x4xbf16>
    %21 = vector.extract_strided_slice %11 {offsets = [2, 0, 0], sizes = [16, 8, 4], strides = [1, 1, 1]} : vector<18x9x4xbf16> to vector<16x8x4xbf16>
    %22 = vector.extract_strided_slice %13 {offsets = [2, 0, 0], sizes = [16, 8, 4], strides = [1, 1, 1]} : vector<18x9x4xbf16> to vector<16x8x4xbf16>
    %23 = vector.extract_strided_slice %11 {offsets = [2, 1, 0], sizes = [16, 8, 4], strides = [1, 1, 1]} : vector<18x9x4xbf16> to vector<16x8x4xbf16>
    %24 = tpu.concatenate %15, %16, %17, %18, %19, %20, %21, %22, %23 in 2 : vector<16x8x4xbf16>, vector<16x8x4xbf16>, vector<16x8x4xbf16>, vector<16x8x4xbf16>, vector<16x8x4xbf16>, vector<16x8x4xbf16>, vector<16x8x4xbf16>, vector<16x8x4xbf16>, vector<16x8x4xbf16> -> vector<16x8x36xbf16>
    %25 = vector.shape_cast %24 : vector<16x8x36xbf16> to vector<128x36xbf16>
    %cst = arith.constant dense<0.000000e+00> : vector<128x8xf32>
    %26 = tpu.matmul %25, %14, %cst {dimension_numbers = #tpu.dot_dimension_numbers<[1], [0], [0], [1], [0, 0, 1, 1], [], []>} : vector<128x36xbf16>, vector<36x8xbf16>, vector<128x8xf32> -> vector<128x8xf32>
    %cst_5 = arith.constant 0.000000e+00 : f32
    %27 = vector.broadcast %cst_5 : f32 to vector<128x8xf32>
    %28 = arith.maximumf %26, %27 : vector<128x8xf32>
    %29 = vector.shape_cast %28 : vector<128x8xf32> to vector<16x8x8xf32>
    %30 = arith.truncf %29 : vector<16x8x8xf32> to vector<16x8x8xbf16>
    %31 = vector.extract_strided_slice %13 {offsets = [0, 0, 0], sizes = [16, 8, 4], strides = [1, 1, 1]} : vector<18x9x4xbf16> to vector<16x8x4xbf16>
    %32 = vector.extract_strided_slice %11 {offsets = [0, 1, 0], sizes = [16, 8, 4], strides = [1, 1, 1]} : vector<18x9x4xbf16> to vector<16x8x4xbf16>
    %33 = vector.extract_strided_slice %13 {offsets = [0, 1, 0], sizes = [16, 8, 4], strides = [1, 1, 1]} : vector<18x9x4xbf16> to vector<16x8x4xbf16>
    %34 = vector.extract_strided_slice %13 {offsets = [1, 0, 0], sizes = [16, 8, 4], strides = [1, 1, 1]} : vector<18x9x4xbf16> to vector<16x8x4xbf16>
    %35 = vector.extract_strided_slice %11 {offsets = [1, 1, 0], sizes = [16, 8, 4], strides = [1, 1, 1]} : vector<18x9x4xbf16> to vector<16x8x4xbf16>
    %36 = vector.extract_strided_slice %13 {offsets = [1, 1, 0], sizes = [16, 8, 4], strides = [1, 1, 1]} : vector<18x9x4xbf16> to vector<16x8x4xbf16>
    %37 = vector.extract_strided_slice %13 {offsets = [2, 0, 0], sizes = [16, 8, 4], strides = [1, 1, 1]} : vector<18x9x4xbf16> to vector<16x8x4xbf16>
    %38 = vector.extract_strided_slice %11 {offsets = [2, 1, 0], sizes = [16, 8, 4], strides = [1, 1, 1]} : vector<18x9x4xbf16> to vector<16x8x4xbf16>
    %39 = vector.extract_strided_slice %13 {offsets = [2, 1, 0], sizes = [16, 8, 4], strides = [1, 1, 1]} : vector<18x9x4xbf16> to vector<16x8x4xbf16>
    %40 = tpu.concatenate %31, %32, %33, %34, %35, %36, %37, %38, %39 in 2 : vector<16x8x4xbf16>, vector<16x8x4xbf16>, vector<16x8x4xbf16>, vector<16x8x4xbf16>, vector<16x8x4xbf16>, vector<16x8x4xbf16>, vector<16x8x4xbf16>, vector<16x8x4xbf16>, vector<16x8x4xbf16> -> vector<16x8x36xbf16>
    %41 = vector.shape_cast %40 : vector<16x8x36xbf16> to vector<128x36xbf16>
    %cst_6 = arith.constant dense<0.000000e+00> : vector<128x8xf32>
    %42 = tpu.matmul %41, %14, %cst_6 {dimension_numbers = #tpu.dot_dimension_numbers<[1], [0], [0], [1], [0, 0, 1, 1], [], []>} : vector<128x36xbf16>, vector<36x8xbf16>, vector<128x8xf32> -> vector<128x8xf32>
    %cst_7 = arith.constant 0.000000e+00 : f32
    %43 = vector.broadcast %cst_7 : f32 to vector<128x8xf32>
    %44 = arith.maximumf %42, %43 : vector<128x8xf32>
    %45 = vector.shape_cast %44 : vector<128x8xf32> to vector<16x8x8xf32>
    %46 = arith.truncf %45 : vector<16x8x8xf32> to vector<16x8x8xbf16>
    %47 = vector.extract_strided_slice %46 {offsets = [0, 0, 0], sizes = [16, 1, 8], strides = [1, 1, 1]} : vector<16x8x8xbf16> to vector<16x1x8xbf16>
    %48 = tpu.concatenate %47, %46 in 1 : vector<16x1x8xbf16>, vector<16x8x8xbf16> -> vector<16x9x8xbf16>
    %49 = vector.extract_strided_slice %48 {offsets = [1, 0, 0], sizes = [1, 9, 8], strides = [1, 1, 1]} : vector<16x9x8xbf16> to vector<1x9x8xbf16>
    %50 = vector.extract_strided_slice %48 {offsets = [14, 0, 0], sizes = [1, 9, 8], strides = [1, 1, 1]} : vector<16x9x8xbf16> to vector<1x9x8xbf16>
    %51 = tpu.concatenate %49, %48, %50 in 0 : vector<1x9x8xbf16>, vector<16x9x8xbf16>, vector<1x9x8xbf16> -> vector<18x9x8xbf16>
    %52 = vector.extract_strided_slice %30 {offsets = [0, 7, 0], sizes = [16, 1, 8], strides = [1, 1, 1]} : vector<16x8x8xbf16> to vector<16x1x8xbf16>
    %53 = tpu.concatenate %30, %52 in 1 : vector<16x8x8xbf16>, vector<16x1x8xbf16> -> vector<16x9x8xbf16>
    %54 = vector.extract_strided_slice %53 {offsets = [1, 0, 0], sizes = [1, 9, 8], strides = [1, 1, 1]} : vector<16x9x8xbf16> to vector<1x9x8xbf16>
    %55 = vector.extract_strided_slice %53 {offsets = [14, 0, 0], sizes = [1, 9, 8], strides = [1, 1, 1]} : vector<16x9x8xbf16> to vector<1x9x8xbf16>
    %56 = tpu.concatenate %54, %53, %55 in 0 : vector<1x9x8xbf16>, vector<16x9x8xbf16>, vector<1x9x8xbf16> -> vector<18x9x8xbf16>
    %57 = vector.shape_cast %51 : vector<18x9x8xbf16> to vector<9x2x9x8xbf16>
    %58 = vector.shape_cast %56 : vector<18x9x8xbf16> to vector<9x2x9x8xbf16>
    %59 = vector.extract_strided_slice %57 {offsets = [0, 0, 0, 0], sizes = [8, 1, 8, 8], strides = [1, 1, 1, 1]} : vector<9x2x9x8xbf16> to vector<8x1x8x8xbf16>
    %60 = vector.shape_cast %59 : vector<8x1x8x8xbf16> to vector<8x8x8xbf16>
    %61 = vector.extract_strided_slice %58 {offsets = [0, 0, 0, 0], sizes = [8, 1, 8, 8], strides = [1, 1, 1, 1]} : vector<9x2x9x8xbf16> to vector<8x1x8x8xbf16>
    %62 = vector.shape_cast %61 : vector<8x1x8x8xbf16> to vector<8x8x8xbf16>
    %63 = vector.extract_strided_slice %57 {offsets = [0, 0, 1, 0], sizes = [8, 1, 8, 8], strides = [1, 1, 1, 1]} : vector<9x2x9x8xbf16> to vector<8x1x8x8xbf16>
    %64 = vector.shape_cast %63 : vector<8x1x8x8xbf16> to vector<8x8x8xbf16>
    %65 = vector.extract_strided_slice %58 {offsets = [0, 0, 1, 0], sizes = [8, 1, 8, 8], strides = [1, 1, 1, 1]} : vector<9x2x9x8xbf16> to vector<8x1x8x8xbf16>
    %66 = vector.shape_cast %65 : vector<8x1x8x8xbf16> to vector<8x8x8xbf16>
    %67 = vector.extract_strided_slice %57 {offsets = [0, 1, 0, 0], sizes = [8, 1, 8, 8], strides = [1, 1, 1, 1]} : vector<9x2x9x8xbf16> to vector<8x1x8x8xbf16>
    %68 = vector.shape_cast %67 : vector<8x1x8x8xbf16> to vector<8x8x8xbf16>
    %69 = vector.extract_strided_slice %58 {offsets = [0, 1, 0, 0], sizes = [8, 1, 8, 8], strides = [1, 1, 1, 1]} : vector<9x2x9x8xbf16> to vector<8x1x8x8xbf16>
    %70 = vector.shape_cast %69 : vector<8x1x8x8xbf16> to vector<8x8x8xbf16>
    %71 = vector.extract_strided_slice %57 {offsets = [0, 1, 1, 0], sizes = [8, 1, 8, 8], strides = [1, 1, 1, 1]} : vector<9x2x9x8xbf16> to vector<8x1x8x8xbf16>
    %72 = vector.shape_cast %71 : vector<8x1x8x8xbf16> to vector<8x8x8xbf16>
    %73 = vector.extract_strided_slice %58 {offsets = [0, 1, 1, 0], sizes = [8, 1, 8, 8], strides = [1, 1, 1, 1]} : vector<9x2x9x8xbf16> to vector<8x1x8x8xbf16>
    %74 = vector.shape_cast %73 : vector<8x1x8x8xbf16> to vector<8x8x8xbf16>
    %75 = vector.extract_strided_slice %57 {offsets = [1, 0, 0, 0], sizes = [8, 1, 8, 8], strides = [1, 1, 1, 1]} : vector<9x2x9x8xbf16> to vector<8x1x8x8xbf16>
    %76 = vector.shape_cast %75 : vector<8x1x8x8xbf16> to vector<8x8x8xbf16>
    %77 = vector.extract_strided_slice %58 {offsets = [1, 0, 0, 0], sizes = [8, 1, 8, 8], strides = [1, 1, 1, 1]} : vector<9x2x9x8xbf16> to vector<8x1x8x8xbf16>
    %78 = vector.shape_cast %77 : vector<8x1x8x8xbf16> to vector<8x8x8xbf16>
    %79 = vector.extract_strided_slice %57 {offsets = [1, 0, 1, 0], sizes = [8, 1, 8, 8], strides = [1, 1, 1, 1]} : vector<9x2x9x8xbf16> to vector<8x1x8x8xbf16>
    %80 = vector.shape_cast %79 : vector<8x1x8x8xbf16> to vector<8x8x8xbf16>
    %81 = vector.extract_strided_slice %58 {offsets = [1, 0, 1, 0], sizes = [8, 1, 8, 8], strides = [1, 1, 1, 1]} : vector<9x2x9x8xbf16> to vector<8x1x8x8xbf16>
    %82 = vector.shape_cast %81 : vector<8x1x8x8xbf16> to vector<8x8x8xbf16>
    %83 = vector.extract_strided_slice %57 {offsets = [1, 1, 0, 0], sizes = [8, 1, 8, 8], strides = [1, 1, 1, 1]} : vector<9x2x9x8xbf16> to vector<8x1x8x8xbf16>
    %84 = vector.shape_cast %83 : vector<8x1x8x8xbf16> to vector<8x8x8xbf16>
    %85 = vector.extract_strided_slice %58 {offsets = [1, 1, 0, 0], sizes = [8, 1, 8, 8], strides = [1, 1, 1, 1]} : vector<9x2x9x8xbf16> to vector<8x1x8x8xbf16>
    %86 = vector.shape_cast %85 : vector<8x1x8x8xbf16> to vector<8x8x8xbf16>
    %87 = vector.extract_strided_slice %57 {offsets = [1, 1, 1, 0], sizes = [8, 1, 8, 8], strides = [1, 1, 1, 1]} : vector<9x2x9x8xbf16> to vector<8x1x8x8xbf16>
    %88 = vector.shape_cast %87 : vector<8x1x8x8xbf16> to vector<8x8x8xbf16>
    %89 = vector.extract_strided_slice %58 {offsets = [1, 1, 1, 0], sizes = [8, 1, 8, 8], strides = [1, 1, 1, 1]} : vector<9x2x9x8xbf16> to vector<8x1x8x8xbf16>
    %90 = vector.shape_cast %89 : vector<8x1x8x8xbf16> to vector<8x8x8xbf16>
    %91 = tpu.concatenate %60, %62, %64, %66, %68, %70, %72, %74, %76, %78, %80, %82, %84, %86, %88, %90 in 2 : vector<8x8x8xbf16>, vector<8x8x8xbf16>, vector<8x8x8xbf16>, vector<8x8x8xbf16>, vector<8x8x8xbf16>, vector<8x8x8xbf16>, vector<8x8x8xbf16>, vector<8x8x8xbf16>, vector<8x8x8xbf16>, vector<8x8x8xbf16>, vector<8x8x8xbf16>, vector<8x8x8xbf16>, vector<8x8x8xbf16>, vector<8x8x8xbf16>, vector<8x8x8xbf16>, vector<8x8x8xbf16> -> vector<8x8x128xbf16>
    %92 = vector.shape_cast %91 : vector<8x8x128xbf16> to vector<64x128xbf16>
    %c0_8 = arith.constant 0 : index
    %c0_9 = arith.constant 0 : index
    %93 = vector.load %arg3[%c0_8, %c0_9] : memref<128x8xbf16, #tpu.memory_space<vmem>>, vector<128x8xbf16>
    %cst_10 = arith.constant dense<0.000000e+00> : vector<64x8xf32>
    %94 = tpu.matmul %92, %93, %cst_10 {dimension_numbers = #tpu.dot_dimension_numbers<[1], [0], [0], [1], [0, 0, 1, 1], [], []>} : vector<64x128xbf16>, vector<128x8xbf16>, vector<64x8xf32> -> vector<64x8xf32>
    %cst_11 = arith.constant 2.000000e-01 : f32
    %95 = vector.broadcast %cst_11 : f32 to vector<64x8xf32>
    %96 = arith.mulf %95, %94 : vector<64x8xf32>
    %97 = arith.maximumf %94, %96 : vector<64x8xf32>
    %98 = vector.shape_cast %2 : vector<16x8x4xbf16> to vector<8x2x8x4xbf16>
    %99 = vector.extract_strided_slice %98 {offsets = [0, 0, 0, 0], sizes = [8, 1, 8, 4], strides = [1, 1, 1, 1]} : vector<8x2x8x4xbf16> to vector<8x1x8x4xbf16>
    %100 = vector.shape_cast %99 : vector<8x1x8x4xbf16> to vector<8x8x4xbf16>
    %101 = vector.shape_cast %3 : vector<16x8x4xbf16> to vector<8x2x8x4xbf16>
    %102 = vector.extract_strided_slice %101 {offsets = [0, 0, 0, 0], sizes = [8, 1, 8, 4], strides = [1, 1, 1, 1]} : vector<8x2x8x4xbf16> to vector<8x1x8x4xbf16>
    %103 = vector.shape_cast %102 : vector<8x1x8x4xbf16> to vector<8x8x4xbf16>
    %104 = vector.shape_cast %2 : vector<16x8x4xbf16> to vector<8x2x8x4xbf16>
    %105 = vector.extract_strided_slice %104 {offsets = [0, 1, 0, 0], sizes = [8, 1, 8, 4], strides = [1, 1, 1, 1]} : vector<8x2x8x4xbf16> to vector<8x1x8x4xbf16>
    %106 = vector.shape_cast %105 : vector<8x1x8x4xbf16> to vector<8x8x4xbf16>
    %107 = vector.shape_cast %3 : vector<16x8x4xbf16> to vector<8x2x8x4xbf16>
    %108 = vector.extract_strided_slice %107 {offsets = [0, 1, 0, 0], sizes = [8, 1, 8, 4], strides = [1, 1, 1, 1]} : vector<8x2x8x4xbf16> to vector<8x1x8x4xbf16>
    %109 = vector.shape_cast %108 : vector<8x1x8x4xbf16> to vector<8x8x4xbf16>
    %110 = tpu.concatenate %100, %103, %106, %109 in 0 : vector<8x8x4xbf16>, vector<8x8x4xbf16>, vector<8x8x4xbf16>, vector<8x8x4xbf16> -> vector<32x8x4xbf16>
    %111 = vector.shape_cast %110 : vector<32x8x4xbf16> to vector<256x4xbf16>
    %c0_12 = arith.constant 0 : index
    %c0_13 = arith.constant 0 : index
    %112 = vector.load %arg4[%c0_12, %c0_13] : memref<4x8xbf16, #tpu.memory_space<vmem>>, vector<4x8xbf16>
    %cst_14 = arith.constant dense<0.000000e+00> : vector<256x8xf32>
    %113 = tpu.matmul %111, %112, %cst_14 {dimension_numbers = #tpu.dot_dimension_numbers<[1], [0], [0], [1], [0, 0, 1, 1], [], []>} : vector<256x4xbf16>, vector<4x8xbf16>, vector<256x8xf32> -> vector<256x8xf32>
    %114 = vector.shape_cast %113 : vector<256x8xf32> to vector<4x64x8xf32>
    %115 = vector.extract_strided_slice %114 {offsets = [0, 0, 0], sizes = [1, 64, 8], strides = [1, 1, 1]} : vector<4x64x8xf32> to vector<1x64x8xf32>
    %116 = vector.shape_cast %115 : vector<1x64x8xf32> to vector<64x8xf32>
    %117 = vector.extract_strided_slice %114 {offsets = [1, 0, 0], sizes = [1, 64, 8], strides = [1, 1, 1]} : vector<4x64x8xf32> to vector<1x64x8xf32>
    %118 = vector.shape_cast %117 : vector<1x64x8xf32> to vector<64x8xf32>
    %119 = arith.maximumf %116, %118 : vector<64x8xf32>
    %120 = vector.extract_strided_slice %114 {offsets = [2, 0, 0], sizes = [1, 64, 8], strides = [1, 1, 1]} : vector<4x64x8xf32> to vector<1x64x8xf32>
    %121 = vector.shape_cast %120 : vector<1x64x8xf32> to vector<64x8xf32>
    %122 = vector.extract_strided_slice %114 {offsets = [3, 0, 0], sizes = [1, 64, 8], strides = [1, 1, 1]} : vector<4x64x8xf32> to vector<1x64x8xf32>
    %123 = vector.shape_cast %122 : vector<1x64x8xf32> to vector<64x8xf32>
    %124 = arith.maximumf %121, %123 : vector<64x8xf32>
    %125 = arith.maximumf %119, %124 : vector<64x8xf32>
    %126 = arith.addf %97, %125 : vector<64x8xf32>
    %127 = vector.shape_cast %126 : vector<64x8xf32> to vector<8x8x8xf32>
    %c0_15 = arith.constant 0 : index
    %c0_16 = arith.constant 0 : index
    %c0_17 = arith.constant 0 : index
    %c0_18 = arith.constant 0 : index
    %128 = vector.load %arg5[%c0_15, %c0_16, %c0_17, %c0_18] : memref<1x8x8x8xf32, #tpu.memory_space<vmem>>, vector<1x8x8x8xf32>
    %129 = vector.shape_cast %128 : vector<1x8x8x8xf32> to vector<8x8x8xf32>
    %130 = vector.shape_cast %127 : vector<8x8x8xf32> to vector<1x8x8x8xf32>
    tpu.vector_store %arg5[%c0_15, %c0_16, %c0_17, %c0_18], %130 {strides = array<i32>} : memref<1x8x8x8xf32, #tpu.memory_space<vmem>>, vector<1x8x8x8xf32>,
    return
  }
  func.func @transform_0(%arg0: i32) -> (i32, i32, i32, i32) {
    %c0_i32 = arith.constant 0 : i32
    %c0_i32_0 = arith.constant 0 : i32
    %c0_i32_1 = arith.constant 0 : i32
    %c0_i32_2 = arith.constant 0 : i32
    return %arg0, %c0_i32, %c0_i32_0, %c0_i32_1 : i32, i32, i32, i32
  }
  func.func @transform_1(%arg0: i32) -> (i32, i32) {
    %c0_i32 = arith.constant 0 : i32
    %c0_i32_0 = arith.constant 0 : i32
    %c0_i32_1 = arith.constant 0 : i32
    return %c0_i32, %c0_i32_0 : i32, i32
  }
  func.func @transform_2(%arg0: i32) -> (i32, i32) {
    %c0_i32 = arith.constant 0 : i32
    %c0_i32_0 = arith.constant 0 : i32
    %c0_i32_1 = arith.constant 0 : i32
    return %c0_i32, %c0_i32_0 : i32, i32
  }
  func.func @transform_3(%arg0: i32) -> (i32, i32) {
    %c0_i32 = arith.constant 0 : i32
    %c0_i32_0 = arith.constant 0 : i32
    %c0_i32_1 = arith.constant 0 : i32
    return %c0_i32, %c0_i32_0 : i32, i32
  }
  func.func @transform_4(%arg0: i32) -> (i32, i32, i32, i32) {
    %c0_i32 = arith.constant 0 : i32
    %c0_i32_0 = arith.constant 0 : i32
    %c0_i32_1 = arith.constant 0 : i32
    %c0_i32_2 = arith.constant 0 : i32
    return %arg0, %c0_i32, %c0_i32_0, %c0_i32_1 : i32, i32, i32, i32
  }
}

</mosaic_0001>

<bundles_post_ra>
// kernel: _lambda_.1
= control target key start
LH: loop header
LB: loop body
LE: loop exit
PB: predicated region body
PF: predicated region fallthrough
CT: control target
= control target key end

     0   :  { %s3728_s15 = smov 0   ;;  %s6436_s0 = inlined_call_operand.vmem [shape: bf16[2,16,8,8], index: 0, kind: input, shape index: {}]   ;;  %s6437_s1 = inlined_call_operand.vmem [shape: bf16[36,8], index: 1, kind: input, shape index: {}]   ;;  %s6438_s2 = inlined_call_operand.vmem [shape: bf16[128,8], index: 2, kind: input, shape index: {}]   ;;  %s6439_s3 = inlined_call_operand.vmem [shape: bf16[4,8], index: 3, kind: input, shape index: {}]   ;;  %s6440_s4 = inlined_call_operand.vmem [shape: f32[2,8,8,8], index: 4, kind: output, shape index: {}]  }
   0x1 LB: > { %s3519_s16 = sadd.s32 4294967295, %s3681_s15   ;;  %p3523_p0 = scmp.ge.s32.totalorder %s3681_s15, 1  ;;  %s3681_s15 = sphi %s3728_s15, %s14_s15  }
   0x2   : > { %p162_p1 = scmp.lt.s32.totalorder %s3681_s15, 3 }
   0x4   : > { %p163_p2 = pnand %p3523_p0, %p162_p1 }
   0x6   : > { %166 = sbr.rel (%p163_p2) target bundleno = 1501 (0x5dd), region = 36 }
   0xb   : > { %p188_p3 = scmp.lt.s32.totalorder %s3519_s16, 1  ;;  %vm391_vm0 = vcmask 1040384   ;;  %vm392_vm1 = vsmask.f32 256  ;;  %v6533_v28 = vmov 0  ;;  %s3683_s21 = smov 124  }
   0xc   : > { %vm3799_vm2 = vmand %vm391_vm0, %vm392_vm1  ;;  %vm410_vm3 = vcmask 1043456   ;;  %s3684_s22 = smov 4   ;;  %s3685_s23 = smov 8   ;;  %vm1236_vm4 = vcmask 1041408   ;;  %vm884_vm5 = vcmask 31744   ;;  %vm930_vm6 = vcmask 64512  }
   0xd   : > { %s6835_s16 = smov (!%p188_p3, %s3519_s16), 1  ;;  %v6534_v28 = vsel %vm3799_vm2, 4294967295, %v6533_v28  ;;  %s3686_s24 = smov 16   ;;  %vm994_vm7 = vcmask 130048   ;;  %vm961_vm8 = vcmask 97280   ;;  %vm1027_vm9 = vcmask 162816  }
   0xe   : > { %s3602_s17 = sshll.u32 %s6835_s16, 6  ;;  %6535 = vst [vmem:[#allocation8_spill] sm:$0xff] %v6534_v28  ;;  %s3687_s25 = smov 20   ;;  %vm1060_vm10 = vcmask 195584   ;;  %vm1092_vm11 = vcmask 228352   ;;  %vm1124_vm12 = vcmask 261120  }
   0xf   : > { %s3744_s20 = scalar_lea.vmem %s6436_s0, %s3602_s17  ;;  %s3688_s26 = smov 28   ;;  %vm1211_vm13 = vcmask 293888   ;;  %vm2903_vm14 = vcmask 326656   ;;  %vm2920_vm15 = vcmask 392192   ;;  %vm2937_vm0 = vcmask 457728  }
  0x10   : > { %v3747_v0 = vld [vmem:[%s3744_s20 + $0x10] sm:$0xf]  ;;  %v3750_v1 = vld [vmem:[%s3744_s20 + $0x8] sm:$0xf]  ;;  %v3753_v2 = vld [vmem:[%s3744_s20 + $0x4] sm:$0xf] }
  0x11   : > { %v3756_v3 = vunpack.c.l.b16 %v3747_v0  ;;  %v3759_v4 = vunpack.c.l.b16 %v3750_v1  ;;  %v3762_v5 = vunpack.c.l.b16 %v3753_v2  ;;  %v3765_v6 = vld [vmem:[%s3744_s20 + $0x14] sm:$0xf]  ;;  %v3768_v7 = vld [vmem:[%s3744_s20 + $0xc] sm:$0xf]  ;;  %v3771_v8 = vld [vmem:[%s3744_s20] sm:$0xf] }
  0x12   : > { %v3774_v9 = vunpack.c.l.b16 %v3765_v6  ;;  %v3777_v10 = vunpack.c.l.b16 %v3768_v7  ;;  %v3780_v11 = vunpack.c.l.b16 %v3771_v8  ;;  %v3811_v38 = vld [vmem:[%s3744_s20 + $0x20] sm:$0xf]  ;;  %v3828_v43 = vld [vmem:[%s3744_s20 + $0x1c] sm:$0xf]  ;;  %v3863_v53 = vld [vmem:[%s3744_s20 + $0x18] sm:$0xf] }
  0x13   : > { %6527 = vst [vmem:[#allocation2_spill] sm:$0xff] %v3756_v3  ;;  %v251_v12 = vpack.c.b16 %v3756_v3, %v3756_v3  ;;  %v249_v13 = vpack.c.b16 %v3759_v4, %v3759_v4  ;;  %v247_v14 = vpack.c.b16 %v3762_v5, %v3762_v5  ;;  %v3842_v47 = vunpack.c.l.b16 %v3811_v38  ;;  %v3868_v55 = vld [vmem:[%s3744_s20 + $0x2c] sm:$0xf]  ;;  %v3871_v56 = vld [vmem:[%s3744_s20 + $0x28] sm:$0xf]  ;;  %s3689_s29 = smov 12  }
  0x14   : > { %6528 = vst [vmem:[#allocation3_spill] sm:$0xff] %v3759_v4  ;;  %v252_v15 = vpack.c.b16 %v3774_v9, %v3774_v9  ;;  %v250_v16 = vpack.c.b16 %v3777_v10, %v3777_v10  ;;  %v248_v17 = vpack.c.b16 %v3780_v11, %v3780_v11  ;;  %v3847_v48 = vunpack.c.l.b16 %v3828_v43  ;;  %s3690_s8 = smov 24   ;;  %s3691_s9 = smov 32  }
  0x15   : > { %6529 = vst [vmem:[#allocation4_spill] sm:$0xff] %v3762_v5  ;;  %v292_v18 = vshrl.u32 %v251_v12, 16  ;;  %v295_v19 = vshll.u32 %v251_v12, 16  ;;  %v278_v20 = vshrl.u32 %v249_v13, 16  ;;  %v281_v21 = vshll.u32 %v249_v13, 16  ;;  %s3692_s10 = smov 40  }
  0x16   : > { %6530 = vst [vmem:[#allocation5_spill] sm:$0xff] %v3774_v9  ;;  %v264_v22 = vshrl.u32 %v247_v14, 16  ;;  %v267_v23 = vshll.u32 %v247_v14, 16  ;;  %v299_v24 = vshrl.u32 %v252_v15, 16  ;;  %v285_v27 = vshrl.u32 %v250_v16, 16  ;;  %s3693_s11 = smov 56  }
  0x17   : > { %6531 = vst [vmem:[#allocation6_spill] sm:$0xff] %v3777_v10  ;;  %v3794_v25 = vrot.slane %v292_v18, 7  ;;  %v3796_v26 = vrot.slane %v278_v20, 7  ;;  %v302_v30 = vshll.u32 %v252_v15, 16  ;;  %v271_v31 = vshrl.u32 %v248_v17, 16  ;;  %s3694_s12 = smov 64  }
  0x18   : > { %6532 = vst [vmem:[#allocation7_spill] sm:$0xff] %v3780_v11  ;;  %v3803_v29 = vrot.slane %v264_v22, 7  ;;  %v3807_v34 = vrot.slane %v299_v24, 7  ;;  %v288_v35 = vshll.u32 %v250_v16, 16  ;;  %v274_v37 = vshll.u32 %v248_v17, 16  ;;  %s3695_s13 = smov 80  }
  0x19   : > { %v297_v32 = vor.u32 %v295_v19, %v3794_v25  ;;  %v283_v33 = vor.u32 %v281_v21, %v3796_v26  ;;  %v3823_v41 = vrot.slane %v285_v27, 7  ;;  %v3825_v42 = vrot.slane %v271_v31, 7  ;;  %6536 = vst [vmem:[#allocation9_spill] sm:$0xff] %v3842_v47  ;;  %v3905_v19 = vld [vmem:[%s3744_s20 + $0x24] sm:$0xf]  ;;  %s3696_s14 = smov 48  }
  0x1a   : > { %v269_v36 = vor.u32 %v267_v23, %v3803_v29  ;;  %v304_v45 = vor.u32 %v302_v30, %v3807_v34  ;;  %6537 = vst [vmem:[#allocation10_spill] sm:$0xff] %v3847_v48  ;;  %v255_v52 = vpack.c.b16 %v3842_v47, %v3842_v47  ;;  %v254_v54 = vpack.c.b16 %v3847_v48, %v3847_v48  ;;  %s3697_s18 = smov 88   ;;  %s3698_s19 = smov 104  }
  0x1b   : > { %v3816_v39 = vsel %vm3799_vm2, %v3747_v0, %v297_v32  ;;  %v3821_v40 = vsel %vm3799_vm2, %v3750_v1, %v283_v33  ;;  %v290_v46 = vor.u32 %v288_v35, %v3823_v41  ;;  %v276_v49 = vor.u32 %v274_v37, %v3825_v42  ;;  %v3928_v37 = vld [vmem:[%s3744_s20 + $0x38] sm:$0xf] }
  0x1c   : > { %487 = vrot.lane.b32.xlu2 %v3816_v39, %s3683_s21  ;;  %483 = vrot.lane.b32.xlu1 %v3821_v40, %s3683_s21  ;;  %v3837_v44 = vsel %vm3799_vm2, %v3753_v2, %v269_v36  ;;  %v3853_v50 = vsel %vm3799_vm2, %v3765_v6, %v304_v45  ;;  %v320_v58 = vshrl.u32 %v255_v52, 16  ;;  %v323_v59 = vshll.u32 %v255_v52, 16 }
  0x1d   : > { %479 = vrot.lane.b32.xlu0 %v3837_v44, %s3683_s21  ;;  %v3858_v51 = vsel %vm3799_vm2, %v3768_v7, %v290_v46  ;;  %v3876_v57 = vsel %vm3799_vm2, %v3771_v8, %v276_v49  ;;  %v313_v60 = vshrl.u32 %v254_v54, 16  ;;  %v316_v61 = vshll.u32 %v254_v54, 16 }
  0x1e   : > { %v3883_v62 = vunpack.c.l.b16 %v3863_v53  ;;  %v3885_v63 = vrot.slane %v320_v58, 7  ;;  %v3888_v12 = vunpack.c.l.b16 %v3868_v55  ;;  %v3891_v13 = vunpack.c.l.b16 %v3871_v56 }
  0x1f   : > { %v3895_v14 = vrot.slane %v313_v60, 7  ;;  %v3921_v33 = vunpack.c.l.b16 %v3905_v19  ;;  %v3950_v60 = vld [vmem:[%s3744_s20 + $0x34] sm:$0xf]  ;;  %vm2954_vm1 = vcmask 523264  }
  0x20   : > { %6538 = vst [vmem:[#allocation11_spill] sm:$0xff] %v3883_v62  ;;  %v253_v15 = vpack.c.b16 %v3883_v62, %v3883_v62  ;;  %v325_v16 = vor.u32 %v323_v59, %v3885_v63  ;;  %v258_v17 = vpack.c.b16 %v3888_v12, %v3888_v12  ;;  %v257_v18 = vpack.c.b16 %v3891_v13, %v3891_v13 }
  0x21   : > { %6539 = vst [vmem:[#allocation12_spill] sm:$0xff] %v3888_v12  ;;  %v318_v20 = vor.u32 %v316_v61, %v3895_v14  ;;  %v256_v58 = vpack.c.b16 %v3921_v33, %v3921_v33  ;;  %v3945_v59 = vunpack.c.l.b16 %v3928_v37 }
  0x22   : > { %6540 = vst [vmem:[#allocation13_spill] sm:$0xff] %v3891_v13  ;;  %v306_v21 = vshrl.u32 %v253_v15, 16  ;;  %v309_v22 = vshll.u32 %v253_v15, 16  ;;  %v3911_v23 = vsel %vm3799_vm2, %v3811_v38, %v325_v16  ;;  %v341_v24 = vshrl.u32 %v258_v17, 16  ;;  %v3953_v15 = vld [vmem:[%s3744_s20 + $0x30] sm:$0xf] }
  0x23   : > { %v344_v27 = vshll.u32 %v258_v17, 16  ;;  %v334_v30 = vshrl.u32 %v257_v18, 16  ;;  %v3916_v31 = vsel %vm3799_vm2, %v3828_v43, %v318_v20  ;;  %6541 = vst [vmem:[#allocation14_spill] sm:$0xff] %v3921_v33  ;;  %v337_v46 = vshll.u32 %v257_v18, 16 }
  0x24   : > { %489 = vrot.lane.b32.xlu2 %v3853_v50, %s3683_s21  ;;  %485 = vrot.lane.b32.xlu1 %v3858_v51, %s3683_s21  ;;  %v3918_v32 = vrot.slane %v306_v21, 7  ;;  %v3923_v35 = vrot.slane %v341_v24, 7  ;;  %6542 = vst [vmem:[#allocation15_spill] sm:$0xff] %v3945_v59  ;;  %v327_v61 = vshrl.u32 %v256_v58, 16  ;;  %v330_v18 = vshll.u32 %v256_v58, 16 }
  0x25   : > { %481 = vrot.lane.b32.xlu0 %v3876_v57, %s3683_s21  ;;  %v3925_v36 = vrot.slane %v334_v30, 7  ;;  %v261_v21 = vpack.c.b16 %v3945_v59, %v3945_v59  ;;  %v3971_v24 = vunpack.c.l.b16 %v3953_v15 }
  0x26   : > { %v311_v45 = vor.u32 %v309_v22, %v3918_v32  ;;  %v346_v49 = vor.u32 %v344_v27, %v3923_v35  ;;  %v329_v20 = vrot.slane %v327_v61, 7  ;;  %v3968_v22 = vunpack.c.l.b16 %v3950_v60 }
  0x27   : > { %v339_v54 = vor.u32 %v337_v46, %v3925_v36  ;;  %6544 = vst [vmem:[#allocation17_spill] sm:$0xff] %v3971_v24  ;;  %v362_v30 = vshrl.u32 %v261_v21, 16 }
  0x28   : > { %v3939_v52 = vsel %vm3799_vm2, %v3863_v53, %v311_v45  ;;  %v3958_v16 = vsel %vm3799_vm2, %v3868_v55, %v346_v49  ;;  %6543 = vst [vmem:[#allocation16_spill] sm:$0xff] %v3968_v22  ;;  %v332_v27 = vor.u32 %v330_v18, %v329_v20  ;;  %v365_v45 = vshll.u32 %v261_v21, 16 }
  0x29   : > { %v3963_v17 = vsel %vm3799_vm2, %v3871_v56, %v339_v54  ;;  %v260_v46 = vpack.c.b16 %v3968_v22, %v3968_v22  ;;  %v259_v49 = vpack.c.b16 %v3971_v24, %v3971_v24  ;;  %v364_v58 = vrot.slane %v362_v30, 7 }
  0x2a   : > { %v3984_v54 = vsel %vm3799_vm2, %v3905_v19, %v332_v27 }
  0x2b   : > { %v355_v61 = vshrl.u32 %v260_v46, 16  ;;  %v358_v59 = vshll.u32 %v260_v46, 16  ;;  %v367_v18 = vor.u32 %v365_v45, %v364_v58  ;;  %v348_v13 = vshrl.u32 %v259_v49, 16 }
  0x2c   : > { %495 = vrot.lane.b32.xlu2 %v3911_v23, %s3683_s21  ;;  %493 = vrot.lane.b32.xlu1 %v3916_v31, %s3683_s21  ;;  %v351_v21 = vshll.u32 %v259_v49, 16  ;;  %v583_v46 = vshrl.u32 %v3816_v39, 16 }
  0x2d   : > { %491 = vrot.lane.b32.xlu0 %v3939_v52, %s3683_s21  ;;  %v357_v47 = vrot.slane %v355_v61, 7  ;;  %v3991_v62 = vsel %vm3799_vm2, %v3928_v37, %v367_v18  ;;  %v350_v24 = vrot.slane %v348_v13, 7  ;;  %v4012_v13 = vsel %vm410_vm3, %v3750_v1, %v3796_v26 }
  0x2e   : > { %v4033_v1 = vsel %vm410_vm3, %v3765_v6, %v3807_v34  ;;  %v4054_v6 = vsel %vm410_vm3, %v3811_v38, %v3885_v63  ;;  %v4080_v26 = vsel %vm410_vm3, %v3871_v56, %v3925_v36  ;;  %v571_v34 = vshll.u32 %v3821_v40, 16 }
  0x2f   : > { %v360_v3 = vor.u32 %v358_v59, %v357_v47  ;;  %v353_v27 = vor.u32 %v351_v21, %v350_v24  ;;  %v4022_v59 = vsel %vm410_vm3, %v3753_v2, %v3803_v29  ;;  %v4038_v2 = vsel %vm410_vm3, %v3747_v0, %v3794_v25  ;;  %6546 = vst [vmem:[#allocation19_spill] sm:$0xff] %v4054_v6 }
  0x30   : > { %v4059_v0 = vsel %vm410_vm3, %v3828_v43, %v3895_v14  ;;  %v4075_v25 = vsel %vm410_vm3, %v3868_v55, %v3923_v35  ;;  %6549 = vst [vmem:[#allocation22_spill] sm:$0xff] %v4080_v26  ;;  %v4084_v29 = vsel %vm410_vm3, %v3905_v19, %v329_v20  ;;  %v4095_v38 = vsel %vm410_vm3, %v3928_v37, %v364_v58 }
  0x31   : > { %v3998_v30 = vsel %vm3799_vm2, %v3950_v60, %v360_v3  ;;  %v4005_v45 = vsel %vm3799_vm2, %v3953_v15, %v353_v27  ;;  %v4017_v3 = vsel %vm410_vm3, %v3771_v8, %v3825_v42  ;;  %v4043_v8 = vsel %vm410_vm3, %v3768_v7, %v3823_v41  ;;  %6547 = vst [vmem:[#allocation20_spill] sm:$0xff] %v4059_v0 }
  0x32   : > { %6545 = vst [vmem:[#allocation18_spill] sm:$0xff] %v4017_v3  ;;  %v4064_v7 = vsel %vm410_vm3, %v3863_v53, %v3918_v32  ;;  %v564_v41 = vshll.u32 %v3876_v57, 16  ;;  %v557_v42 = vshll.u32 %v3837_v44, 16  ;;  %v4101_v43 = vsel %vm410_vm3, %v3950_v60, %v357_v47 }
  0x33   : > { %6548 = vst [vmem:[#allocation21_spill] sm:$0xff] %v4075_v25  ;;  %v569_v53 = vshrl.u32 %v3821_v40, 16  ;;  %v573_v55 = vrot.slane %v571_v34, 1  ;;  %v4106_v56 = vsel %vm410_vm3, %v3953_v15, %v350_v24  ;;  %v562_v63 = vshrl.u32 %v3876_v57, 16 }
  0x34   : > { %501 = vrot.lane.b32.xlu2 %v3958_v16, %s3683_s21  ;;  %499 = vrot.lane.b32.xlu1 %v3963_v17, %s3683_s21  ;;  %6550 = vst [vmem:[#allocation23_spill] sm:$0xff] %v4084_v29  ;;  %v566_v14 = vrot.slane %v564_v41, 1  ;;  %v555_v19 = vshrl.u32 %v3837_v44, 16  ;;  %v559_v47 = vrot.slane %v557_v42, 1  ;;  %v592_v35 = vshll.u32 %v3853_v50, 16 }
  0x35   : > { %497 = vrot.lane.b32.xlu0 %v3984_v54, %s3683_s21  ;;  %v4116_v32 = vor.u32 %v573_v55, %v569_v53  ;;  %v585_v36 = vshll.u32 %v3816_v39, 16  ;;  %v578_v15 = vshll.u32 %v3858_v51, 16  ;;  %v590_v20 = vshrl.u32 %v3853_v50, 16 }
  0x36   : > { %v4120_v37 = vor.u32 %v566_v14, %v562_v63  ;;  %v4122_v60 = vor.u32 %v559_v47, %v555_v19  ;;  %v594_v24 = vrot.slane %v592_v35, 1  ;;  %v576_v58 = vshrl.u32 %v3858_v51, 16 }
  0x37   : > { %v587_v49 = vrot.slane %v585_v36, 1  ;;  %v580_v61 = vrot.slane %v578_v15, 1  ;;  %v613_v21 = vshll.u32 %v3911_v23, 16  ;;  %v606_v34 = vshll.u32 %v3916_v31, 16 }
  0x38   : > { %v4134_v18 = vor.u32 %v594_v24, %v590_v20  ;;  %v599_v42 = vshll.u32 %v3939_v52, 16  ;;  %v611_v53 = vshrl.u32 %v3911_v23, 16  ;;  %v604_v63 = vshrl.u32 %v3916_v31, 16 }
  0x39   : > { %v4137_v27 = vor.u32 %v587_v49, %v583_v46  ;;  %v4140_v41 = vor.u32 %v580_v61, %v576_v58  ;;  %v615_v55 = vrot.slane %v613_v21, 1  ;;  %v608_v14 = vrot.slane %v606_v34, 1 }
  0x3a   : > { %6551 = vst [vmem:[#allocation24_spill] sm:$0xff] %v4134_v18  ;;  %v597_v47 = vshrl.u32 %v3939_v52, 16  ;;  %v601_v35 = vrot.slane %v599_v42, 1  ;;  %v634_v15 = vshll.u32 %v3958_v16, 16  ;;  %v627_v24 = vshll.u32 %v3963_v17, 16 }
  0x3b   : > { %v4154_v36 = vor.u32 %v615_v55, %v611_v53  ;;  %v4157_v20 = vor.u32 %v608_v14, %v604_v63  ;;  %v620_v49 = vshll.u32 %v3984_v54, 16  ;;  %v632_v58 = vshrl.u32 %v3958_v16, 16 }
  0x3c   : > { %507 = vrot.lane.b32.xlu2 %v3991_v62, %s3683_s21  ;;  %505 = vrot.lane.b32.xlu1 %v3998_v30, %s3683_s21  ;;  %v4160_v46 = vor.u32 %v601_v35, %v597_v47  ;;  %v636_v61 = vrot.slane %v634_v15, 1  ;;  %v625_v21 = vshrl.u32 %v3963_v17, 16  ;;  %v629_v34 = vrot.slane %v627_v24, 1 }
  0x3d   : > { %503 = vrot.lane.b32.xlu0 %v4005_v45, %s3683_s21  ;;  %6553 = vst [vmem:[#allocation26_spill] sm:$0xff] %v4154_v36  ;;  %v618_v53 = vshrl.u32 %v3984_v54, 16  ;;  %v622_v55 = vrot.slane %v620_v49, 1  ;;  %v655_v14 = vshll.u32 %v3991_v62, 16  ;;  %v648_v35 = vshll.u32 %v3998_v30, 16 }
  0x3e   : > { %6554 = vst [vmem:[#allocation27_spill] sm:$0xff] %v4157_v20  ;;  %v4174_v63 = vor.u32 %v636_v61, %v632_v58  ;;  %v4177_v47 = vor.u32 %v629_v34, %v625_v21  ;;  %v641_v24 = vshll.u32 %v4005_v45, 16  ;;  %v653_v4 = vshrl.u32 %v3991_v62, 16 }
  0x3f   : > { %6555 = vst [vmem:[#allocation28_spill] sm:$0xff] %v4160_v46  ;;  %v4180_v15 = vor.u32 %v622_v55, %v618_v53  ;;  %v657_v11 = vrot.slane %v655_v14, 1  ;;  %v646_v49 = vshrl.u32 %v3998_v30, 16  ;;  %v650_v58 = vrot.slane %v648_v35, 1 }
  0x40   : > { %6557 = vst [vmem:[#allocation30_spill] sm:$0xff] %v4174_v63  ;;  %v639_v21 = vshrl.u32 %v4005_v45, 16  ;;  %v643_v34 = vrot.slane %v641_v24, 1 }
  0x41   : > { %6558 = vst [vmem:[#allocation31_spill] sm:$0xff] %v4177_v47  ;;  %v4194_v53 = vor.u32 %v657_v11, %v653_v4  ;;  %v4196_v55 = vor.u32 %v650_v58, %v646_v49 }
  0x42   : > { %6559 = vst [vmem:[#allocation32_spill] sm:$0xff] %v4180_v15  ;;  %v4198_v14 = vor.u32 %v643_v34, %v639_v21 }
  0x43   : > { %6561 = vst [vmem:[#allocation34_spill] sm:$0xff] %v4194_v53 }
  0x44   : > { %528 = vrot.lane.b32.xlu2 %v4012_v13, %s3684_s22  ;;  %526 = vrot.lane.b32.xlu1 %v4017_v3, %s3684_s22  ;;  %6562 = vst [vmem:[#allocation35_spill] sm:$0xff] %v4196_v55 }
  0x45   : > { %524 = vrot.lane.b32.xlu0 %v4022_v59, %s3684_s22  ;;  %6563 = vst [vmem:[#allocation36_spill] sm:$0xff] %v4198_v14 }
  0x4c   : > { %534 = vrot.lane.b32.xlu2 %v4033_v1, %s3684_s22  ;;  %532 = vrot.lane.b32.xlu1 %v4038_v2, %s3684_s22 }
  0x4d   : > { %530 = vrot.lane.b32.xlu0 %v4043_v8, %s3684_s22 }
  0x54   : > { %540 = vrot.lane.b32.xlu2 %v4054_v6, %s3684_s22  ;;  %538 = vrot.lane.b32.xlu1 %v4059_v0, %s3684_s22 }
  0x55   : > { %536 = vrot.lane.b32.xlu0 %v4064_v7, %s3684_s22 }
  0x5c   : > { %546 = vrot.lane.b32.xlu2 %v4075_v25, %s3684_s22  ;;  %544 = vrot.lane.b32.xlu1 %v4080_v26, %s3684_s22 }
  0x5d   : > { %542 = vrot.lane.b32.xlu0 %v4084_v29, %s3684_s22 }
  0x64   : > { %552 = vrot.lane.b32.xlu2 %v4095_v38, %s3684_s22  ;;  %550 = vrot.lane.b32.xlu1 %v4101_v43, %s3684_s22 }
  0x65   : > { %548 = vrot.lane.b32.xlu0 %v4106_v56, %s3684_s22 }
  0x6c   : > { %663 = vrot.lane.b32.xlu2 %v4116_v32, %s3684_s22  ;;  %661 = vrot.lane.b32.xlu1 %v4120_v37, %s3684_s22 }
  0x6d   : > { %659 = vrot.lane.b32.xlu0 %v4122_v60, %s3684_s22 }
  0x74   : > { %669 = vrot.lane.b32.xlu2 %v4134_v18, %s3684_s22  ;;  %667 = vrot.lane.b32.xlu1 %v4137_v27, %s3684_s22 }
  0x75   : > { %665 = vrot.lane.b32.xlu0 %v4140_v41, %s3684_s22 }
  0x76   : > { %v4149_v19 = vpop.permute.xlu2 %487 }
  0x77   : > { %6552 = vst [vmem:[#allocation25_spill] sm:$0xff] %v4149_v19 }
  0x7c   : > { %675 = vrot.lane.b32.xlu2 %v4154_v36, %s3684_s22  ;;  %673 = vrot.lane.b32.xlu1 %v4157_v20, %s3684_s22 }
  0x7d   : > { %671 = vrot.lane.b32.xlu0 %v4160_v46, %s3684_s22 }
  0x7e   : > { %v4169_v42 = vpop.permute.xlu2 %489 }
  0x7f   : > { %6556 = vst [vmem:[#allocation29_spill] sm:$0xff] %v4169_v42 }
  0x84   : > { %681 = vrot.lane.b32.xlu2 %v4174_v63, %s3684_s22  ;;  %679 = vrot.lane.b32.xlu1 %v4177_v47, %s3684_s22 }
  0x85   : > { %677 = vrot.lane.b32.xlu0 %v4180_v15, %s3684_s22 }
  0x86   : > { %v4189_v61 = vpop.permute.xlu2 %495 }
  0x87   : > { %6560 = vst [vmem:[#allocation33_spill] sm:$0xff] %v4189_v61 }
  0x8c   : > { %687 = vrot.lane.b32.xlu2 %v4194_v53, %s3684_s22  ;;  %685 = vrot.lane.b32.xlu1 %v4196_v55, %s3684_s22 }
  0x8d   : > { %683 = vrot.lane.b32.xlu0 %v4198_v14, %s3684_s22  ;;  %s3699_s22 = smov 72  }
  0x8e   : > { %v4204_v35 = vpop.permute.xlu2 %501  ;;  %v4206_v22 = vpop.permute.xlu1 %483 }
  0x8f   : > { %6564 = vst [vmem:[#allocation37_spill] sm:$0xff] %v4204_v35  ;;  %v4210_v4 = vpop.permute.xlu0 %479 }
  0x94   : > { %694 = vrot.lane.b32.xlu2 %v3821_v40, %s3685_s23  ;;  %692 = vrot.lane.b32.xlu1 %v3837_v44, %s3685_s23 }
  0x95   : > { %690 = vrot.lane.b32.xlu0 %v3876_v57, %s3685_s23  ;;  %v214_v57 = vld [vmem:[%s3744_s20 + $0x3c] sm:$0xf] }
  0x96   : > { %v4216_v11 = vpop.permute.xlu2 %507  ;;  %v4218_v24 = vpop.permute.xlu1 %485  ;;  %v4247_v48 = vunpack.c.l.b16 %v214_v57 }
  0x97   : > { %6565 = vst [vmem:[#allocation38_spill] sm:$0xff] %v4216_v11  ;;  %v4222_v49 = vpop.permute.xlu0 %481 }
  0x98   : > { %6566 = vst [vmem:[#allocation39_spill] sm:$0xff] %v4218_v24  ;;  %v262_v10 = vpack.c.b16 %v4247_v48, %v4247_v48 }
  0x99   : > { %6571 = vst [vmem:[#allocation44_spill] sm:$0xff] %v4247_v48 }
  0x9a   : > { %v369_v35 = vshrl.u32 %v262_v10, 16 }
  0x9c   : > { %700 = vrot.lane.b32.xlu2 %v3853_v50, %s3685_s23  ;;  %698 = vrot.lane.b32.xlu1 %v3816_v39, %s3685_s23 }
  0x9d   : > { %696 = vrot.lane.b32.xlu0 %v3858_v51, %s3685_s23 }
  0x9e   : > { %v4228_v58 = vpop.permute.xlu2 %528  ;;  %v4230_v21 = vpop.permute.xlu1 %493 }
  0x9f   : > { %6567 = vst [vmem:[#allocation40_spill] sm:$0xff] %v4230_v21  ;;  %v4234_v34 = vpop.permute.xlu0 %491  ;;  %v372_v21 = vshll.u32 %v262_v10, 16 }
  0xa0   : > { %6568 = vst [vmem:[#allocation41_spill] sm:$0xff] %v4234_v34 }
  0xa4   : > { %706 = vrot.lane.b32.xlu2 %v3911_v23, %s3685_s23  ;;  %704 = vrot.lane.b32.xlu1 %v3916_v31, %s3685_s23 }
  0xa5   : > { %702 = vrot.lane.b32.xlu0 %v3939_v52, %s3685_s23 }
  0xa6   : > { %v4241_v12 = vpop.permute.xlu2 %534  ;;  %v4243_v33 = vpop.permute.xlu1 %499 }
  0xa7   : > { %6569 = vst [vmem:[#allocation42_spill] sm:$0xff] %v4241_v12  ;;  %v4249_v9 = vpop.permute.xlu0 %497 }
  0xa8   : > { %6570 = vst [vmem:[#allocation43_spill] sm:$0xff] %v4243_v33 }
  0xa9   : > { %6572 = vst [vmem:[#allocation45_spill] sm:$0xff] %v4249_v9  ;;  %v371_v9 = vrot.slane %v369_v35, 7 }
  0xab   : > { %v4342_v12 = vsel %vm410_vm3, %v214_v57, %v371_v9 }
  0xac   : > { %712 = vrot.lane.b32.xlu2 %v3958_v16, %s3685_s23  ;;  %710 = vrot.lane.b32.xlu1 %v3963_v17, %s3685_s23 }
  0xad   : > { %708 = vrot.lane.b32.xlu0 %v3984_v54, %s3685_s23 }
  0xae   : > { %v4257_v5 = vpop.permute.xlu2 %540  ;;  %v4261_v11 = vpop.permute.xlu1 %505 }
  0xaf   : > { %6573 = vst [vmem:[#allocation46_spill] sm:$0xff] %v4257_v5  ;;  %v4263_v33 = vpop.permute.xlu0 %503  ;;  %v374_v5 = vor.u32 %v372_v21, %v371_v9 }
  0xb0   : > { %6574 = vst [vmem:[#allocation47_spill] sm:$0xff] %v4261_v11 }
  0xb1   : > { %6575 = vst [vmem:[#allocation48_spill] sm:$0xff] %v4263_v33  ;;  %v4281_v10 = vsel %vm3799_vm2, %v214_v57, %v374_v5 }
  0xb4   : > { %718 = vrot.lane.b32.xlu2 %v3991_v62, %s3685_s23  ;;  %716 = vrot.lane.b32.xlu1 %v3998_v30, %s3685_s23 }
  0xb5   : > { %714 = vrot.lane.b32.xlu0 %v4005_v45, %s3685_s23 }
  0xb6   : > { %v4269_v48 = vpop.permute.xlu2 %546  ;;  %v4273_v61 = vpop.permute.xlu1 %526 }
  0xb7   : > { %6576 = vst [vmem:[#allocation49_spill] sm:$0xff] %v4269_v48  ;;  %v4275_v11 = vpop.permute.xlu0 %524 }
  0xbc   : > { %725 = vrot.lane.b32.xlu2 %v4022_v59, %s3686_s24  ;;  %723 = vrot.lane.b32.xlu1 %v4017_v3, %s3686_s24 }
  0xbd   : > { %720 = vrot.lane.b32.xlu0 %v4281_v10, %s3685_s23 }
  0xbe   : > { %v4285_v35 = vpop.permute.xlu2 %552  ;;  %v4289_v33 = vpop.permute.xlu1 %532 }
  0xbf   : > { %6577 = vst [vmem:[#allocation50_spill] sm:$0xff] %v4285_v35  ;;  %v4291_v21 = vpop.permute.xlu0 %530 }
  0xc0   : > { %6578 = vst [vmem:[#allocation51_spill] sm:$0xff] %v4289_v33 }
  0xc1   : > { %6579 = vst [vmem:[#allocation52_spill] sm:$0xff] %v4291_v21 }
  0xc4   : > { %731 = vrot.lane.b32.xlu2 %v4038_v2, %s3686_s24  ;;  %729 = vrot.lane.b32.xlu1 %v4043_v8, %s3686_s24 }
  0xc5   : > { %727 = vrot.lane.b32.xlu0 %v4012_v13, %s3686_s24 }
  0xc6   : > { %v4297_v5 = vpop.permute.xlu2 %663  ;;  %v4301_v28 = vpop.permute.xlu1 %538 }
  0xc7   : > { %6580 = vst [vmem:[#allocation53_spill] sm:$0xff] %v4301_v28  ;;  %v4303_v35 = vpop.permute.xlu0 %536 }
  0xc8   : > { %6581 = vst [vmem:[#allocation54_spill] sm:$0xff] %v4303_v35 }
  0xcc   : > { %737 = vrot.lane.b32.xlu2 %v4059_v0, %s3686_s24  ;;  %735 = vrot.lane.b32.xlu1 %v4064_v7, %s3686_s24 }
  0xcd   : > { %733 = vrot.lane.b32.xlu0 %v4033_v1, %s3686_s24 }
  0xce   : > { %v4309_v48 = vpop.permute.xlu2 %669  ;;  %v4313_v34 = vpop.permute.xlu1 %544 }
  0xcf   : > { %6582 = vst [vmem:[#allocation55_spill] sm:$0xff] %v4309_v48  ;;  %v4315_v42 = vpop.permute.xlu0 %542 }
  0xd0   : > { %6583 = vst [vmem:[#allocation56_spill] sm:$0xff] %v4313_v34 }
  0xd1   : > { %6584 = vst [vmem:[#allocation57_spill] sm:$0xff] %v4315_v42 }
  0xd4   : > { %743 = vrot.lane.b32.xlu2 %v4080_v26, %s3686_s24  ;;  %741 = vrot.lane.b32.xlu1 %v4084_v29, %s3686_s24 }
  0xd5   : > { %739 = vrot.lane.b32.xlu0 %v4054_v6, %s3686_s24 }
  0xd6   : > { %v4321_v28 = vpop.permute.xlu2 %675  ;;  %v4325_v35 = vpop.permute.xlu1 %550 }
  0xd7   : > { %6585 = vst [vmem:[#allocation58_spill] sm:$0xff] %v4321_v28  ;;  %v4327_v48 = vpop.permute.xlu0 %548 }
  0xd8   : > { %6586 = vst [vmem:[#allocation59_spill] sm:$0xff] %v4325_v35 }
  0xd9   : > { %6587 = vst [vmem:[#allocation60_spill] sm:$0xff] %v4327_v48 }
  0xdc   : > { %749 = vrot.lane.b32.xlu2 %v4101_v43, %s3686_s24  ;;  %747 = vrot.lane.b32.xlu1 %v4106_v56, %s3686_s24 }
  0xdd   : > { %745 = vrot.lane.b32.xlu0 %v4075_v25, %s3686_s24 }
  0xde   : > { %v4333_v34 = vpop.permute.xlu2 %681  ;;  %v4337_v42 = vpop.permute.xlu1 %661 }
  0xdf   : > { %6588 = vst [vmem:[#allocation61_spill] sm:$0xff] %v4333_v34  ;;  %v4339_v28 = vpop.permute.xlu0 %659 }
  0xe4   : > { %762 = vrot.lane.b32.xlu2 %v4120_v37, %s3686_s24  ;;  %753 = vrot.lane.b32.xlu1 %v4342_v12, %s3686_s24 }
  0xe5   : > { %751 = vrot.lane.b32.xlu0 %v4095_v38, %s3686_s24 }
  0xe6   : > { %v4348_v35 = vpop.permute.xlu2 %687  ;;  %v4352_v34 = vpop.permute.xlu1 %667 }
  0xe7   : > { %6589 = vst [vmem:[#allocation62_spill] sm:$0xff] %v4348_v35  ;;  %v4354_v48 = vpop.permute.xlu0 %665 }
  0xe8   : > { %6590 = vst [vmem:[#allocation63_spill] sm:$0xff] %v4352_v34 }
  0xe9   : > { %6591 = vst [vmem:[#allocation64_spill] sm:$0xff] %v4354_v48 }
  0xec   : > { %768 = vrot.lane.b32.xlu2 %v4140_v41, %s3686_s24  ;;  %766 = vrot.lane.b32.xlu1 %v4116_v32, %s3686_s24 }
  0xed   : > { %764 = vrot.lane.b32.xlu0 %v4122_v60, %s3686_s24 }
  0xee   : > { %v4360_v9 = vpop.permute.xlu2 %694  ;;  %v4364_v57 = vpop.permute.xlu1 %673 }
  0xef   : > { %6592 = vst [vmem:[#allocation65_spill] sm:$0xff] %v4364_v57  ;;  %v4366_v35 = vpop.permute.xlu0 %671 }
  0xf0   : > { %6593 = vst [vmem:[#allocation66_spill] sm:$0xff] %v4366_v35  ;;  %v758_v35 = vshll.u32 %v4281_v10, 16 }
  0xf4   : > { %774 = vrot.lane.b32.xlu2 %v4160_v46, %s3686_s24  ;;  %772 = vrot.lane.b32.xlu1 %v4134_v18, %s3686_s24 }
  0xf5   : > { %770 = vrot.lane.b32.xlu0 %v4137_v27, %s3686_s24 }
  0xf6   : > { %v4372_v34 = vpop.permute.xlu2 %700  ;;  %v4376_v19 = vpop.permute.xlu1 %679 }
  0xf7   : > { %6594 = vst [vmem:[#allocation67_spill] sm:$0xff] %v4372_v34  ;;  %v4378_v33 = vpop.permute.xlu0 %677 }
  0xf8   : > { %6595 = vst [vmem:[#allocation68_spill] sm:$0xff] %v4376_v19  ;;  %v756_v19 = vshrl.u32 %v4281_v10, 16 }
  0xf9   : > { %6596 = vst [vmem:[#allocation69_spill] sm:$0xff] %v4378_v33  ;;  %v760_v33 = vrot.slane %v758_v35, 1 }
  0xfb   : > { %v4404_v21 = vor.u32 %v760_v33, %v756_v19 }
  0xfc   : > { %780 = vrot.lane.b32.xlu2 %v4180_v15, %s3686_s24  ;;  %778 = vrot.lane.b32.xlu1 %v4154_v36, %s3686_s24 }
  0xfd   : > { %776 = vrot.lane.b32.xlu0 %v4157_v20, %s3686_s24  ;;  %6601 = vst [vmem:[#allocation74_spill] sm:$0xff] %v4404_v21 }
  0xfe   : > { %v4384_v57 = vpop.permute.xlu2 %706  ;;  %v4389_v34 = vpop.permute.xlu1 %685 }
  0xff   : > { %6597 = vst [vmem:[#allocation70_spill] sm:$0xff] %v4384_v57  ;;  %v4391_v48 = vpop.permute.xlu0 %683 }
 0x100   : > { %6598 = vst [vmem:[#allocation71_spill] sm:$0xff] %v4389_v34 }
 0x101   : > { %6599 = vst [vmem:[#allocation72_spill] sm:$0xff] %v4391_v48 }
 0x104   : > { %786 = vrot.lane.b32.xlu2 %v4198_v14, %s3686_s24  ;;  %784 = vrot.lane.b32.xlu1 %v4174_v63, %s3686_s24 }
 0x105   : > { %782 = vrot.lane.b32.xlu0 %v4177_v47, %s3686_s24 }
 0x106   : > { %v4398_v24 = vpop.permute.xlu2 %712  ;;  %v4402_v57 = vpop.permute.xlu1 %692 }
 0x107   : > { %6600 = vst [vmem:[#allocation73_spill] sm:$0xff] %v4398_v24  ;;  %v4406_v34 = vpop.permute.xlu0 %690 }
 0x10c   : > { %792 = vrot.lane.b32.xlu2 %v4404_v21, %s3686_s24  ;;  %790 = vrot.lane.b32.xlu1 %v4194_v53, %s3686_s24 }
 0x10d   : > { %788 = vrot.lane.b32.xlu0 %v4196_v55, %s3686_s24 }
 0x10e   : > { %v4412_v35 = vpop.permute.xlu2 %718  ;;  %v4416_v48 = vpop.permute.xlu1 %698 }
 0x10f   : > { %6602 = vst [vmem:[#allocation75_spill] sm:$0xff] %v4412_v35  ;;  %v4418_v24 = vpop.permute.xlu0 %696 }
 0x110   : > { %6603 = vst [vmem:[#allocation76_spill] sm:$0xff] %v4416_v48 }
 0x114   : > { %798 = vrot.lane.b32.xlu2 %v3858_v51, %s3687_s25  ;;  %796 = vrot.lane.b32.xlu1 %v3821_v40, %s3687_s25 }
 0x115   : > { %794 = vrot.lane.b32.xlu0 %v3837_v44, %s3687_s25 }
 0x116   : > { %v4424_v33 = vpop.permute.xlu2 %725  ;;  %v4428_v19 = vpop.permute.xlu1 %704 }
 0x117   : > { %6604 = vst [vmem:[#allocation77_spill] sm:$0xff] %v4428_v19  ;;  %v4430_v35 = vpop.permute.xlu0 %702 }
 0x118   : > { %6605 = vst [vmem:[#allocation78_spill] sm:$0xff] %v4430_v35 }
 0x11c   : > { %804 = vrot.lane.b32.xlu2 %v3939_v52, %s3687_s25  ;;  %802 = vrot.lane.b32.xlu1 %v3853_v50, %s3687_s25 }
 0x11d   : > { %800 = vrot.lane.b32.xlu0 %v3816_v39, %s3687_s25 }
 0x11e   : > { %v4436_v48 = vpop.permute.xlu2 %731  ;;  %v4440_v40 = vpop.permute.xlu1 %710 }
 0x11f   : > { %6606 = vst [vmem:[#allocation79_spill] sm:$0xff] %v4436_v48  ;;  %v4442_v51 = vpop.permute.xlu0 %708  ;;  %v1383_v48 = vshll.u32 %v4080_v26, 16 }
 0x120   : > { %6607 = vst [vmem:[#allocation80_spill] sm:$0xff] %v4440_v40 }
 0x121   : > { %6608 = vst [vmem:[#allocation81_spill] sm:$0xff] %v4442_v51 }
 0x124   : > { %810 = vrot.lane.b32.xlu2 %v3984_v54, %s3687_s25  ;;  %808 = vrot.lane.b32.xlu1 %v3911_v23, %s3687_s25 }
 0x125   : > { %806 = vrot.lane.b32.xlu0 %v3916_v31, %s3687_s25 }
 0x126   : > { %v4448_v44 = vpop.permute.xlu2 %737  ;;  %v4452_v50 = vpop.permute.xlu1 %716 }
 0x127   : > { %6609 = vst [vmem:[#allocation82_spill] sm:$0xff] %v4448_v44  ;;  %v4454_v52 = vpop.permute.xlu0 %714 }
 0x128   : > { %6610 = vst [vmem:[#allocation83_spill] sm:$0xff] %v4452_v50 }
 0x129   : > { %6611 = vst [vmem:[#allocation84_spill] sm:$0xff] %v4454_v52 }
 0x12c   : > { %816 = vrot.lane.b32.xlu2 %v4005_v45, %s3687_s25  ;;  %814 = vrot.lane.b32.xlu1 %v3958_v16, %s3687_s25 }
 0x12d   : > { %812 = vrot.lane.b32.xlu0 %v3963_v17, %s3687_s25 }
 0x12e   : > { %v4460_v39 = vpop.permute.xlu2 %743  ;;  %v4464_v23 = vpop.permute.xlu1 %723 }
 0x12f   : > { %6612 = vst [vmem:[#allocation85_spill] sm:$0xff] %v4460_v39  ;;  %v4466_v54 = vpop.permute.xlu0 %720 }
 0x130   : > { %6613 = vst [vmem:[#allocation86_spill] sm:$0xff] %v4466_v54 }
 0x134   : > { %822 = vrot.lane.b32.xlu2 %v4281_v10, %s3687_s25  ;;  %820 = vrot.lane.b32.xlu1 %v3991_v62, %s3687_s25 }
 0x135   : > { %818 = vrot.lane.b32.xlu0 %v3998_v30, %s3687_s25 }
 0x136   : > { %v4472_v31 = vpop.permute.xlu2 %749  ;;  %v4476_v16 = vpop.permute.xlu1 %729 }
 0x137   : > { %6614 = vst [vmem:[#allocation87_spill] sm:$0xff] %v4472_v31  ;;  %v4478_v45 = vpop.permute.xlu0 %727 }
 0x13c   : > { %828 = vrot.lane.b32.xlu2 %v4043_v8, %s3688_s26  ;;  %826 = vrot.lane.b32.xlu1 %v4012_v13, %s3688_s26 }
 0x13d   : > { %824 = vrot.lane.b32.xlu0 %v4022_v59, %s3688_s26 }
 0x13e   : > { %v4484_v17 = vpop.permute.xlu2 %762  ;;  %v4488_v62 = vpop.permute.xlu1 %735 }
 0x13f   : > { %6615 = vst [vmem:[#allocation88_spill] sm:$0xff] %v4488_v62  ;;  %v4490_v10 = vpop.permute.xlu0 %733 }
 0x140   : > { %6616 = vst [vmem:[#allocation89_spill] sm:$0xff] %v4490_v10 }
 0x144   : > { %834 = vrot.lane.b32.xlu2 %v4064_v7, %s3688_s26  ;;  %832 = vrot.lane.b32.xlu1 %v4033_v1, %s3688_s26 }
 0x145   : > { %830 = vrot.lane.b32.xlu0 %v4038_v2, %s3688_s26 }
 0x146   : > { %v4496_v30 = vpop.permute.xlu2 %768  ;;  %v4500_v54 = vpop.permute.xlu1 %741 }
 0x147   : > { %6617 = vst [vmem:[#allocation90_spill] sm:$0xff] %v4500_v54  ;;  %v4502_v31 = vpop.permute.xlu0 %739 }
 0x148   : > { %6618 = vst [vmem:[#allocation91_spill] sm:$0xff] %v4502_v31 }
 0x14c   : > { %840 = vrot.lane.b32.xlu2 %v4084_v29, %s3688_s26  ;;  %838 = vrot.lane.b32.xlu1 %v4054_v6, %s3688_s26 }
 0x14d   : > { %836 = vrot.lane.b32.xlu0 %v4059_v0, %s3688_s26 }
 0x14e   : > { %v4508_v50 = vpop.permute.xlu2 %774  ;;  %v4512_v52 = vpop.permute.xlu1 %747 }
 0x14f   : > { %6619 = vst [vmem:[#allocation92_spill] sm:$0xff] %v4508_v50  ;;  %v4514_v39 = vpop.permute.xlu0 %745 }
 0x150   : > { %6620 = vst [vmem:[#allocation93_spill] sm:$0xff] %v4512_v52 }
 0x151   : > { %6621 = vst [vmem:[#allocation94_spill] sm:$0xff] %v4514_v39 }
 0x154   : > { %846 = vrot.lane.b32.xlu2 %v4106_v56, %s3688_s26  ;;  %844 = vrot.lane.b32.xlu1 %v4075_v25, %s3688_s26 }
 0x155   : > { %842 = vrot.lane.b32.xlu0 %v4080_v26, %s3688_s26 }
 0x156   : > { %v4520_v40 = vpop.permute.xlu2 %780  ;;  %v4524_v31 = vpop.permute.xlu1 %753 }
 0x157   : > { %6622 = vst [vmem:[#allocation95_spill] sm:$0xff] %v4520_v40  ;;  %v4526_v54 = vpop.permute.xlu0 %751 }
 0x158   : > { %6623 = vst [vmem:[#allocation96_spill] sm:$0xff] %v4524_v31 }
 0x159   : > { %6624 = vst [vmem:[#allocation97_spill] sm:$0xff] %v4526_v54 }
 0x15c   : > { %852 = vrot.lane.b32.xlu2 %v4342_v12, %s3688_s26  ;;  %850 = vrot.lane.b32.xlu1 %v4095_v38, %s3688_s26 }
 0x15d   : > { %848 = vrot.lane.b32.xlu0 %v4101_v43, %s3688_s26 }
 0x15e   : > { %v4532_v52 = vpop.permute.xlu2 %786  ;;  %v4536_v39 = vpop.permute.xlu1 %766 }
 0x15f   : > { %6625 = vst [vmem:[#allocation98_spill] sm:$0xff] %v4532_v52  ;;  %v4538_v40 = vpop.permute.xlu0 %764 }
 0x164   : > { %858 = vrot.lane.b32.xlu2 %v4140_v41, %s3688_s26  ;;  %856 = vrot.lane.b32.xlu1 %v4116_v32, %s3688_s26 }
 0x165   : > { %854 = vrot.lane.b32.xlu0 %v4122_v60, %s3688_s26 }
 0x166   : > { %v4544_v54 = vpop.permute.xlu2 %792  ;;  %v4548_v31 = vpop.permute.xlu1 %772 }
 0x167   : > { %6626 = vst [vmem:[#allocation99_spill] sm:$0xff] %v4544_v54  ;;  %v4550_v52 = vpop.permute.xlu0 %770 }
 0x168   : > { %6627 = vst [vmem:[#allocation100_spill] sm:$0xff] %v4548_v31 }
 0x169   : > { %6628 = vst [vmem:[#allocation101_spill] sm:$0xff] %v4550_v52 }
 0x16c   : > { %864 = vrot.lane.b32.xlu2 %v4160_v46, %s3688_s26  ;;  %862 = vrot.lane.b32.xlu1 %v4134_v18, %s3688_s26 }
 0x16d   : > { %860 = vrot.lane.b32.xlu0 %v4137_v27, %s3688_s26 }
 0x16e   : > { %v4556_v51 = vpop.permute.xlu2 %798  ;;  %v4560_v50 = vpop.permute.xlu1 %778 }
 0x16f   : > { %6629 = vst [vmem:[#allocation102_spill] sm:$0xff] %v4560_v50  ;;  %v4562_v54 = vpop.permute.xlu0 %776 }
 0x170   : > { %6630 = vst [vmem:[#allocation103_spill] sm:$0xff] %v4562_v54 }
 0x174   : > { %870 = vrot.lane.b32.xlu2 %v4180_v15, %s3688_s26  ;;  %868 = vrot.lane.b32.xlu1 %v4154_v36, %s3688_s26  ;;  %v1335_v36 = vshll.u32 %v4012_v13, 16 }
 0x175   : > { %866 = vrot.lane.b32.xlu0 %v4157_v20, %s3688_s26 }
 0x176   : > { %v4568_v62 = vpop.permute.xlu2 %804  ;;  %v4572_v46 = vpop.permute.xlu1 %784 }
 0x177   : > { %6631 = vst [vmem:[#allocation104_spill] sm:$0xff] %v4568_v62  ;;  %v4574_v18 = vpop.permute.xlu0 %782 }
 0x178   : > { %6632 = vst [vmem:[#allocation105_spill] sm:$0xff] %v4572_v46  ;;  %v1329_v46 = vshll.u32 %v4017_v3, 16 }
 0x179   : > { %6633 = vst [vmem:[#allocation106_spill] sm:$0xff] %v4574_v18  ;;  %v1323_v18 = vshll.u32 %v4022_v59, 16 }
 0x17b   : > { %v1325_v54 = vrot.slane %v1323_v18, 1  ;;  %v1351_v18 = vshrl.u32 %v4033_v1, 16 }
 0x17c   : > { %876 = vrot.lane.b32.xlu2 %v4198_v14, %s3688_s26  ;;  %874 = vrot.lane.b32.xlu1 %v4174_v63, %s3688_s26  ;;  %v1333_v14 = vshrl.u32 %v4012_v13, 16  ;;  %v1337_v63 = vrot.slane %v1335_v36, 1  ;;  %v1353_v36 = vshll.u32 %v4033_v1, 16 }
 0x17d   : > { %872 = vrot.lane.b32.xlu0 %v4177_v47, %s3688_s26 }
 0x17e   : > { %v4580_v50 = vpop.permute.xlu2 %810  ;;  %v4584_v15 = vpop.permute.xlu1 %790 }
 0x17f   : > { %6634 = vst [vmem:[#allocation107_spill] sm:$0xff] %v4580_v50  ;;  %v4587_v20 = vpop.permute.xlu0 %788  ;;  %v1331_v50 = vrot.slane %v1329_v46, 1  ;;  %v1341_v46 = vshll.u32 %v4043_v8, 16 }
 0x180   : > { %6635 = vst [vmem:[#allocation108_spill] sm:$0xff] %v4584_v15  ;;  %v1327_v15 = vshrl.u32 %v4017_v3, 16 }
 0x181   : > { %6636 = vst [vmem:[#allocation109_spill] sm:$0xff] %v4587_v20  ;;  %v1321_v20 = vshrl.u32 %v4022_v59, 16 }
 0x183   : > { %v4612_v35 = vor.u32 %v1325_v54, %v1321_v20  ;;  %v1339_v20 = vshrl.u32 %v4043_v8, 16 }
 0x184   : > { %882 = vrot.lane.b32.xlu2 %v4404_v21, %s3688_s26  ;;  %880 = vrot.lane.b32.xlu1 %v4194_v53, %s3688_s26  ;;  %v4604_v21 = vor.u32 %v1337_v63, %v1333_v14  ;;  %v4609_v53 = vor.u32 %v1331_v50, %v1327_v15  ;;  %v1345_v15 = vshrl.u32 %v4038_v2, 16  ;;  %v1343_v50 = vrot.slane %v1341_v46, 1 }
 0x185   : > { %878 = vrot.lane.b32.xlu0 %v4196_v55, %s3688_s26  ;;  %v1355_v55 = vrot.slane %v1353_v36, 1  ;;  %v1371_v36 = vshll.u32 %v4054_v6, 16  ;;  %v1369_v46 = vshrl.u32 %v4054_v6, 16 }
 0x186   : > { %v4596_v47 = vpop.permute.xlu2 %816  ;;  %v4602_v44 = vpop.permute.xlu1 %796  ;;  %6638 = vst [vmem:[#allocation111_spill] sm:$0xff] %v4604_v21  ;;  %v4636_v10 = vor.u32 %v1343_v50, %v1339_v20 }
 0x187   : > { %6637 = vst [vmem:[#allocation110_spill] sm:$0xff] %v4596_v47  ;;  %v4607_v19 = vpop.permute.xlu0 %794  ;;  %v1347_v47 = vshll.u32 %v4038_v2, 16 }
 0x188   : > { %6639 = vst [vmem:[#allocation112_spill] sm:$0xff] %v4609_v53 }
 0x189   : > { %v1349_v14 = vrot.slane %v1347_v47, 1  ;;  %6644 = vst [vmem:[#allocation117_spill] sm:$0xff] %v4636_v10  ;;  %v1359_v47 = vshll.u32 %v4064_v7, 16 }
 0x18b   : > { %v4633_v31 = vor.u32 %v1349_v14, %v1345_v15  ;;  %v1357_v14 = vshrl.u32 %v4064_v7, 16  ;;  %v1361_v20 = vrot.slane %v1359_v47, 1  ;;  %v1387_v47 = vshrl.u32 %v4075_v25, 16 }
 0x18c   : > { %1415 = vrot.lane.b32.xlu2 %v4604_v21, %s3685_s23  ;;  %1413 = vrot.lane.b32.xlu1 %v4609_v53, %s3685_s23  ;;  %v4628_v21 = vor.u32 %v1355_v55, %v1351_v18  ;;  %v1363_v18 = vshrl.u32 %v4059_v0, 16 }
 0x18d   : > { %1411 = vrot.lane.b32.xlu0 %v4612_v35, %s3685_s23  ;;  %6643 = vst [vmem:[#allocation116_spill] sm:$0xff] %v4633_v31  ;;  %v4660_v53 = vor.u32 %v1361_v20, %v1357_v14 }
 0x18e   : > { %v4620_v63 = vpop.permute.xlu2 %822  ;;  %v4626_v54 = vpop.permute.xlu1 %802  ;;  %6642 = vst [vmem:[#allocation115_spill] sm:$0xff] %v4628_v21 }
 0x18f   : > { %6640 = vst [vmem:[#allocation113_spill] sm:$0xff] %v4620_v63  ;;  %v4631_v62 = vpop.permute.xlu0 %800  ;;  %v1365_v63 = vshll.u32 %v4059_v0, 16 }
 0x190   : > { %6641 = vst [vmem:[#allocation114_spill] sm:$0xff] %v4626_v54  ;;  %v1373_v54 = vrot.slane %v1371_v36, 1  ;;  %v1389_v36 = vshll.u32 %v4075_v25, 16 }
 0x191   : > { %v1367_v15 = vrot.slane %v1365_v63, 1  ;;  %6649 = vst [vmem:[#allocation122_spill] sm:$0xff] %v4660_v53  ;;  %v1377_v63 = vshll.u32 %v4084_v29, 16 }
 0x193   : > { %v1379_v14 = vrot.slane %v1377_v63, 1  ;;  %v1405_v63 = vshrl.u32 %v4095_v38, 16 }
 0x194   : > { %1421 = vrot.lane.b32.xlu2 %v4628_v21, %s3685_s23  ;;  %1419 = vrot.lane.b32.xlu1 %v4633_v31, %s3685_s23  ;;  %v4652_v21 = vor.u32 %v1373_v54, %v1369_v46  ;;  %v4657_v31 = vor.u32 %v1367_v15, %v1363_v18  ;;  %v1381_v46 = vshrl.u32 %v4080_v26, 16  ;;  %v1385_v18 = vrot.slane %v1383_v48, 1 }
 0x195   : > { %1417 = vrot.lane.b32.xlu0 %v4636_v10, %s3685_s23  ;;  %v1391_v10 = vrot.slane %v1389_v36, 1  ;;  %v1375_v15 = vshrl.u32 %v4084_v29, 16  ;;  %v1407_v36 = vshll.u32 %v4095_v38, 16  ;;  %v1395_v48 = vshll.u32 %v4106_v56, 16 }
 0x196   : > { %v4644_v55 = vpop.permute.xlu2 %828  ;;  %v4650_v50 = vpop.permute.xlu1 %808  ;;  %6646 = vst [vmem:[#allocation119_spill] sm:$0xff] %v4652_v21 }
 0x197   : > { %6645 = vst [vmem:[#allocation118_spill] sm:$0xff] %v4650_v50  ;;  %v4655_v52 = vpop.permute.xlu0 %806 }
 0x198   : > { %6647 = vst [vmem:[#allocation120_spill] sm:$0xff] %v4655_v52  ;;  %v1401_v52 = vshll.u32 %v4101_v43, 16 }
 0x199   : > { %6648 = vst [vmem:[#allocation121_spill] sm:$0xff] %v4657_v31 }
 0x19c   : > { %1427 = vrot.lane.b32.xlu2 %v4652_v21, %s3685_s23  ;;  %1425 = vrot.lane.b32.xlu1 %v4657_v31, %s3685_s23  ;;  %v4676_v21 = vor.u32 %v1391_v10, %v1387_v47  ;;  %v4681_v31 = vor.u32 %v1385_v18, %v1381_v46  ;;  %v1399_v47 = vshrl.u32 %v4101_v43, 16  ;;  %v1403_v46 = vrot.slane %v1401_v52, 1 }
 0x19d   : > { %1423 = vrot.lane.b32.xlu0 %v4660_v53, %s3685_s23  ;;  %v1409_v53 = vrot.slane %v1407_v36, 1  ;;  %v1393_v18 = vshrl.u32 %v4106_v56, 16 }
 0x19e   : > { %v4668_v54 = vpop.permute.xlu2 %834  ;;  %v4674_v20 = vpop.permute.xlu1 %814  ;;  %6652 = vst [vmem:[#allocation125_spill] sm:$0xff] %v4676_v21  ;;  %v4704_v36 = vor.u32 %v1403_v46, %v1399_v47 }
 0x19f   : > { %6650 = vst [vmem:[#allocation123_spill] sm:$0xff] %v4668_v54  ;;  %v4679_v50 = vpop.permute.xlu0 %812  ;;  %v4684_v54 = vor.u32 %v1379_v14, %v1375_v15  ;;  %v1397_v15 = vrot.slane %v1395_v48, 1  ;;  %v463_v48 = vld [vmem:[%s6437_s1 + $0x10] sm:$0x3] }
 0x1a0   : > { %6651 = vst [vmem:[#allocation124_spill] sm:$0xff] %v4674_v20 }
 0x1a1   : > { %6653 = vst [vmem:[#allocation126_spill] sm:$0xff] %v4681_v31 }
 0x1a2   : > { %6654 = vst [vmem:[#allocation127_spill] sm:$0xff] %v4684_v54 }
 0x1a3   : > { %6656 = vst [vmem:[#allocation129_spill] sm:$0xff] %v4704_v36 }
 0x1a4   : > { %1433 = vrot.lane.b32.xlu2 %v4676_v21, %s3685_s23  ;;  %1431 = vrot.lane.b32.xlu1 %v4681_v31, %s3685_s23  ;;  %v4700_v21 = vor.u32 %v1409_v53, %v1405_v63  ;;  %v4706_v31 = vor.u32 %v1397_v15, %v1393_v18  ;;  %v1205_v53 = vunpack.c.l.b16 %v463_v48  ;;  %v3605_v48 = vld [vmem:[%s6437_s1 + $0x8] sm:$0xff] }
 0x1a5   : > { %1429 = vrot.lane.b32.xlu0 %v4684_v54, %s3685_s23 }
 0x1a6   : > { %v4692_v10 = vpop.permute.xlu2 %840  ;;  %v4698_v14 = vpop.permute.xlu1 %820  ;;  %6655 = vst [vmem:[#allocation128_spill] sm:$0xff] %v4700_v21  ;;  %v1208_v46 = vpack.c.b16 %v1205_v53, %v1205_v53 }
 0x1a7   : > { %v4702_v20 = vpop.permute.xlu0 %818  ;;  %6657 = vst [vmem:[#allocation130_spill] sm:$0xff] %v4706_v31 }
 0x1a8   : > { %v1238_v18 = vsel %vm1236_vm4, %v1208_v46, 0 }
 0x1a9   : > { %1245 = vmatpush.bf16.msra.mxu0 %v1238_v18  ;;  %1951 = vmatpush.bf16.msra.mxu1 %v1238_v18  ;;  %v3604_v18 = vld [vmem:[%s6437_s1] sm:$0xff] }
 0x1ac   : > { %1439 = vrot.lane.b32.xlu2 %v4700_v21, %s3685_s23  ;;  %1437 = vrot.lane.b32.xlu1 %v4704_v36, %s3685_s23 }
 0x1ad   : > { %1435 = vrot.lane.b32.xlu0 %v4706_v31, %s3685_s23  ;;  %1246 = vmatpush.bf16.msra.mxu0 %v3605_v48 }
 0x1ae   : > { %v4712_v52 = vpop.permute.xlu2 %846  ;;  %v827_v63 = vpop.permute.xlu1 %826  ;;  %1952 = vmatpush.bf16.msra.mxu1 %v3605_v48 }
 0x1af   : > { %v4719_v47 = vpop.permute.xlu0 %824 }
 0x1b1   : > { %1247 = vmatpush.bf16.msra.mxu0 %v3604_v18 }
 0x1b2   : > { %1953 = vmatpush.bf16.msra.mxu1 %v3604_v18 }
 0x1b4   : > { %1445 = vrot.lane.b32.xlu2 %v4012_v13, %s3689_s29  ;;  %1443 = vrot.lane.b32.xlu1 %v4022_v59, %s3689_s29 }
 0x1b5   : > { %1441 = vrot.lane.b32.xlu0 %v4017_v3, %s3689_s29 }
 0x1b6   : > { %v4726_v15 = vpop.permute.xlu2 %852  ;;  %v4733_v53 = vpop.permute.xlu1 %832 }
 0x1b7   : > { %6658 = vst [vmem:[#allocation131_spill] sm:$0xff] %v4726_v15  ;;  %v4735_v46 = vpop.permute.xlu0 %830 }
 0x1bc   : > { %1451 = vrot.lane.b32.xlu2 %v4033_v1, %s3689_s29  ;;  %1449 = vrot.lane.b32.xlu1 %v4038_v2, %s3689_s29 }
 0x1bd   : > { %1447 = vrot.lane.b32.xlu0 %v4043_v8, %s3689_s29 }
 0x1be   : > { %v4744_v21 = vpop.permute.xlu2 %858  ;;  %v4748_v36 = vpop.permute.xlu1 %838 }
 0x1bf   : > { %v4750_v48 = vpop.permute.xlu0 %836 }
 0x1c4   : > { %1457 = vrot.lane.b32.xlu2 %v4054_v6, %s3689_s29  ;;  %1455 = vrot.lane.b32.xlu1 %v4059_v0, %s3689_s29  ;;  %v890_v0 = vsel %vm884_vm5, %v4222_v49, %v4273_v61 }
 0x1c5   : > { %1453 = vrot.lane.b32.xlu0 %v4064_v7, %s3689_s29 }
 0x1c6   : > { %v4756_v31 = vpop.permute.xlu2 %864  ;;  %v4760_v18 = vpop.permute.xlu1 %844 }
 0x1c7   : > { %v4762_v3 = vpop.permute.xlu0 %842 }
 0x1cc   : > { %1463 = vrot.lane.b32.xlu2 %v4075_v25, %s3689_s29  ;;  %1461 = vrot.lane.b32.xlu1 %v4080_v26, %s3689_s29  ;;  %v887_v25 = vsel %vm884_vm5, %v4210_v4, %v4275_v11  ;;  %v934_v26 = vsel %vm930_vm6, %v890_v0, %v4337_v42 }
 0x1cd   : > { %1459 = vrot.lane.b32.xlu0 %v4084_v29, %s3689_s29  ;;  %v932_v29 = vsel %vm930_vm6, %v887_v25, %v4339_v28 }
 0x1ce   : > { %v4768_v54 = vpop.permute.xlu2 %870  ;;  %v4772_v15 = vpop.permute.xlu1 %850  ;;  %v963_v61 = vsel %vm961_vm8, %v932_v29, %v4406_v34 }
 0x1cf   : > { %6659 = vst [vmem:[#allocation132_spill] sm:$0xff] %v4772_v15  ;;  %v4774_v6 = vpop.permute.xlu0 %848  ;;  %v965_v15 = vsel %vm961_vm8, %v934_v26, %v4402_v57  ;;  %v996_v0 = vsel %vm994_vm7, %v963_v61, %v4464_v23 }
 0x1d0   : > { %v998_v4 = vsel %vm994_vm7, %v965_v15, %v4424_v33  ;;  %v1029_v25 = vsel %vm1027_vm9, %v996_v0, %v4484_v17 }
 0x1d1   : > { %v1031_v42 = vsel %vm1027_vm9, %v998_v4, %v4538_v40  ;;  %v1062_v11 = vsel %vm1060_vm10, %v1029_v25, %v4607_v19  ;;  %v967_v25 = vsel %vm961_vm8, %v932_v29, %v4360_v9 }
 0x1d2   : > { %v1064_v26 = vsel %vm1060_vm10, %v1031_v42, %v4602_v44  ;;  %v1094_v57 = vsel %vm1092_vm11, %v1062_v11, %v4719_v47 }
 0x1d3   : > { %v1096_v49 = vsel %vm1092_vm11, %v1064_v26, %v827_v63  ;;  %v893_v63 = vsel %vm884_vm5, %v4206_v22, %v4228_v58  ;;  %v1000_v58 = vsel %vm994_vm7, %v967_v25, %v4478_v45  ;;  %v6668_v25 = vld [vmem:[#allocation79_spill] sm:$0xff] }
 0x1d4   : > { %1469 = vrot.lane.b32.xlu2 %v4095_v38, %s3689_s29  ;;  %1467 = vrot.lane.b32.xlu1 %v4101_v43, %s3689_s29  ;;  %v936_v47 = vsel %vm930_vm6, %v893_v63, %v4297_v5  ;;  %v6666_v63 = vld [vmem:[#allocation76_spill] sm:$0xff] }
 0x1d5   : > { %1465 = vrot.lane.b32.xlu0 %v4106_v56, %s3689_s29  ;;  %v969_v4 = vsel %vm961_vm8, %v936_v47, %v4418_v24  ;;  %v1033_v24 = vsel %vm1027_vm9, %v1000_v58, %v4536_v39  ;;  %v6669_v58 = vld [vmem:[#allocation67_spill] sm:$0xff] }
 0x1d6   : > { %v4800_v28 = vpop.permute.xlu2 %876  ;;  %v857_v34 = vpop.permute.xlu1 %856  ;;  %v1002_v42 = vsel %vm994_vm7, %v969_v4, %v4476_v16  ;;  %v1066_v29 = vsel %vm1060_vm10, %v1033_v24, %v4556_v51  ;;  %v6670_v24 = vld [vmem:[#allocation101_spill] sm:$0xff] }
 0x1d7   : > { %v855_v33 = vpop.permute.xlu0 %854  ;;  %v1128_v40 = vsel %vm1124_vm12, %v1096_v49, %v857_v34  ;;  %v1035_v22 = vsel %vm1027_vm9, %v1002_v42, %v4496_v30  ;;  %v6660_v49 = vld [vmem:[#allocation52_spill] sm:$0xff]  ;;  %v6661_v34 = vld [vmem:[#allocation39_spill] sm:$0xff] }
 0x1d8   : > { %v1126_v23 = vsel %vm1124_vm12, %v1094_v57, %v855_v33  ;;  %v1173_v44 = vunpack.c.l.b16 %v1128_v40  ;;  %v1068_v5 = vsel %vm1060_vm10, %v1035_v22, %v4631_v62  ;;  %v1098_v62 = vsel %vm1092_vm11, %v1066_v29, %v4644_v55  ;;  %v6663_v33 = vld [vmem:[#allocation64_spill] sm:$0xff]  ;;  %v6671_v29 = vld [vmem:[#allocation89_spill] sm:$0xff] }
 0x1d9   : > { %v1172_v17 = vunpack.c.l.b16 %v1126_v23  ;;  %v1100_v16 = vsel %vm1092_vm11, %v1068_v5, %v4735_v46  ;;  %v1130_v39 = vsel %vm1124_vm12, %v1098_v62, %v4744_v21  ;;  %v896_v57 = vsel %vm884_vm5, %v6661_v34, %v6660_v49  ;;  %v6662_v21 = vld [vmem:[#allocation112_spill] sm:$0xff]  ;;  %v6672_v62 = vld [vmem:[#allocation114_spill] sm:$0xff] }
 0x1da   : > { %v1174_v26 = vunpack.c.l.b16 %v1130_v39  ;;  %v938_v40 = vsel %vm930_vm6, %v896_v57, %v6663_v33  ;;  %v6674_v49 = vld [vmem:[#allocation104_spill] sm:$0xff]  ;;  %v6675_v33 = vld [vmem:[#allocation123_spill] sm:$0xff] }
 0x1db   : > { %v1188_v15 = vpack.c.b16 %v1173_v44, %v1172_v17  ;;  %v6664_v44 = vld [vmem:[#allocation51_spill] sm:$0xff]  ;;  %v6665_v17 = vld [vmem:[#allocation25_spill] sm:$0xff]  ;;  %v971_v47 = vsel %vm961_vm8, %v938_v40, %v6666_v63 }
 0x1dc   : > { %1475 = vrot.lane.b32.xlu2 %v4122_v60, %s3689_s29  ;;  %1473 = vrot.lane.b32.xlu1 %v4120_v37, %s3689_s29  ;;  %v1004_v22 = vsel %vm994_vm7, %v971_v47, %v6668_v25  ;;  %v6676_v63 = vld [vmem:[#allocation111_spill] sm:$0xff]  ;;  %v6679_v25 = vld [vmem:[#allocation29_spill] sm:$0xff] }
 0x1dd   : > { %1471 = vrot.lane.b32.xlu0 %v4342_v12, %s3689_s29  ;;  %3536 = vmatmul.msk.bf16.vlgmr.msra.gmra.mxu0 %vm1211_vm13, %v1188_v15  ;;  %v899_v15 = vsel %vm884_vm5, %v6665_v17, %v6664_v44 }
 0x1de   : > { %v4819_v19 = vpop.permute.xlu2 %882  ;;  %v863_v61 = vpop.permute.xlu1 %862 }
 0x1df   : > { %v861_v0 = vpop.permute.xlu0 %860 }
 0x1e0   : > { %v1132_v9 = vsel %vm1124_vm12, %v1100_v16, %v861_v0  ;;  %v6667_v0 = vld [vmem:[#allocation63_spill] sm:$0xff]  ;;  %v1037_v16 = vsel %vm1027_vm9, %v1004_v22, %v6670_v24  ;;  %v6680_v22 = vld [vmem:[#allocation54_spill] sm:$0xff] }
 0x1e1   : > { %v1175_v46 = vunpack.c.l.b16 %v1132_v9  ;;  %v940_v42 = vsel %vm930_vm6, %v899_v15, %v6667_v0  ;;  %v1070_v39 = vsel %vm1060_vm10, %v1037_v16, %v6672_v62  ;;  %v6682_v24 = vld [vmem:[#allocation55_spill] sm:$0xff] }
 0x1e2   : > { %v973_v5 = vsel %vm961_vm8, %v940_v42, %v6669_v58  ;;  %v6678_v42 = vld [vmem:[#allocation42_spill] sm:$0xff]  ;;  %v6681_v58 = vld [vmem:[#allocation41_spill] sm:$0xff] }
 0x1e3   : > { %v1189_v11 = vpack.c.b16 %v1175_v46, %v1174_v26  ;;  %v1006_v9 = vsel %vm994_vm7, %v973_v5, %v6671_v29  ;;  %v6673_v46 = vld [vmem:[#allocation100_spill] sm:$0xff]  ;;  %v905_v5 = vsel %vm884_vm5, %v6681_v58, %v6680_v22  ;;  %v6683_v29 = vld [vmem:[#allocation66_spill] sm:$0xff] }
 0x1e4   : > { %1481 = vrot.lane.b32.xlu2 %v4137_v27, %s3689_s29  ;;  %1479 = vrot.lane.b32.xlu1 %v4140_v41, %s3689_s29  ;;  %v1039_v26 = vsel %vm1027_vm9, %v1006_v9, %v6673_v46  ;;  %v944_v9 = vsel %vm930_vm6, %v905_v5, %v6683_v29 }
 0x1e5   : > { %1477 = vrot.lane.b32.xlu0 %v4116_v32, %s3689_s29  ;;  %v1072_v34 = vsel %vm1060_vm10, %v1039_v26, %v6674_v49  ;;  %v6685_v26 = vld [vmem:[#allocation77_spill] sm:$0xff] }
 0x1e6   : > { %v4852_v45 = vpop.permute.xlu2 %1415  ;;  %v4860_v30 = vpop.permute.xlu1 %868  ;;  %v1104_v40 = vsel %vm1092_vm11, %v1072_v34, %v6675_v33  ;;  %v6686_v34 = vld [vmem:[#allocation82_spill] sm:$0xff] }
 0x1e7   : > { %v867_v51 = vpop.permute.xlu0 %866  ;;  %v1136_v44 = vsel %vm1124_vm12, %v1104_v40, %v4756_v31  ;;  %v902_v31 = vsel %vm884_vm5, %v6679_v25, %v6678_v42  ;;  %v6688_v40 = vld [vmem:[#allocation92_spill] sm:$0xff]  ;;  %v6691_v42 = vld [vmem:[#allocation118_spill] sm:$0xff] }
 0x1e8   : > { %v942_v16 = vsel %vm930_vm6, %v902_v31, %v6682_v24 }
 0x1ec   : > { %1543 = vrot.lane.b32.xlu2 %v4022_v59, %s3690_s8  ;;  %1513 = vrot.lane.b32.xlu1 %v4612_v35, %s3687_s25 }
 0x1ed   : > { %1511 = vrot.lane.b32.xlu0 %v6662_v21, %s3687_s25  ;;  %3537 = vmatmul.msk.bf16.gmra.mxu0 %vm1211_vm13, %v1189_v11  ;;  %v1102_v11 = vsel %vm1092_vm11, %v1070_v39, %v4733_v53  ;;  %v6684_v39 = vld [vmem:[#allocation78_spill] sm:$0xff] }
 0x1ee   : > { %v4866_v55 = vpop.permute.xlu2 %1421  ;;  %v4876_v23 = vpop.permute.xlu1 %874  ;;  %v1134_v57 = vsel %vm1124_vm12, %v1102_v11, %v863_v61  ;;  %v1177_v61 = vunpack.c.l.b16 %v1136_v44  ;;  %v975_v46 = vsel %vm961_vm8, %v942_v16, %v6684_v39  ;;  %v977_v11 = vsel %vm961_vm8, %v944_v9, %v6685_v26  ;;  %v6693_v16 = vld [vmem:[#allocation117_spill] sm:$0xff] }
 0x1ef   : > { %v4883_v4 = vpop.permute.xlu0 %872  ;;  %v1176_v17 = vunpack.c.l.b16 %v1134_v57  ;;  %v6687_v57 = vld [vmem:[#allocation88_spill] sm:$0xff] }
 0x1f0   : > { %v1008_v33 = vsel %vm994_vm7, %v975_v46, %v6687_v57  ;;  %v6695_v46 = vld [vmem:[#allocation33_spill] sm:$0xff] }
 0x1f1   : > { %v1190_v47 = vpack.c.b16 %v1177_v61, %v1176_v17  ;;  %v1041_v44 = vsel %vm1027_vm9, %v1008_v33, %v6688_v40  ;;  %v6689_v17 = vld [vmem:[#allocation103_spill] sm:$0xff]  ;;  %v6697_v57 = vld [vmem:[#allocation53_spill] sm:$0xff]  ;;  %v6698_v33 = vld [vmem:[#allocation40_spill] sm:$0xff] }
 0x1f2   : > { %v908_v40 = vsel %vm884_vm5, %v6698_v33, %v6697_v57  ;;  %v6708_v33 = vld [vmem:[#allocation24_spill] sm:$0xff] }
 0x1f4   : > { %1575 = vrot.lane.b32.xlu2 %v4116_v32, %s3690_s8  ;;  %1573 = vrot.lane.b32.xlu1 %v4122_v60, %s3690_s8 }
 0x1f5   : > { %1545 = vrot.lane.b32.xlu0 %v4012_v13, %s3690_s8 }
 0x1f6   : > { %v4908_v21 = vpop.permute.xlu2 %1427  ;;  %v4916_v53 = vpop.permute.xlu1 %880 }
 0x1f7   : > { %v4918_v15 = vpop.permute.xlu0 %878 }
 0x1fc   : > { %1515 = vrot.lane.b32.xlu2 %v6676_v63, %s3687_s25  ;;  %1605 = vrot.lane.b32.xlu1 %v6676_v63, %s3691_s9  ;;  %v6690_v63 = vld [vmem:[#allocation120_spill] sm:$0xff] }
 0x1fd   : > { %1603 = vrot.lane.b32.xlu0 %v4612_v35, %s3691_s9  ;;  %3538 = vmatmul.msk.bf16.gmra.mxu0 %vm1211_vm13, %v1190_v47  ;;  %v1010_v35 = vsel %vm994_vm7, %v977_v11, %v6686_v34  ;;  %v1074_v47 = vsel %vm1060_vm10, %v1041_v44, %v6690_v63  ;;  %v6696_v11 = vld [vmem:[#allocation58_spill] sm:$0xff]  ;;  %v6699_v44 = vld [vmem:[#allocation81_spill] sm:$0xff] }
 0x1fe   : > { %v4924_v0 = vpop.permute.xlu2 %1433  ;;  %v4939_v62 = vpop.permute.xlu1 %1413  ;;  %v1043_v61 = vsel %vm1027_vm9, %v1010_v35, %v6689_v17  ;;  %v1106_v31 = vsel %vm1092_vm11, %v1074_v47, %v4750_v48  ;;  %v6700_v63 = vld [vmem:[#allocation65_spill] sm:$0xff] }
 0x1ff   : > { %6677 = vst [vmem:[#allocation52_spill] sm:$0xff] %v4924_v0  ;;  %v4945_v49 = vpop.permute.xlu0 %1411  ;;  %v1076_v25 = vsel %vm1060_vm10, %v1043_v61, %v6691_v42  ;;  %v1138_v58 = vsel %vm1124_vm12, %v1106_v31, %v867_v51  ;;  %v6694_v51 = vld [vmem:[#allocation46_spill] sm:$0xff]  ;;  %v946_v47 = vsel %vm930_vm6, %v908_v40, %v6700_v63  ;;  %v6758_v0 = vld [vmem:[#allocation96_spill] sm:$0xff] }
 0x200   : > { %v1108_v22 = vsel %vm1092_vm11, %v1076_v25, %v4748_v36  ;;  %v1178_v9 = vunpack.c.l.b16 %v1138_v58  ;;  %v911_v26 = vsel %vm884_vm5, %v6695_v46, %v6694_v51  ;;  %v6701_v42 = vld [vmem:[#allocation90_spill] sm:$0xff]  ;;  %v6703_v58 = vld [vmem:[#allocation95_spill] sm:$0xff] }
 0x201   : > { %v1140_v5 = vsel %vm1124_vm12, %v1108_v22, %v4860_v30  ;;  %v948_v34 = vsel %vm930_vm6, %v911_v26, %v6696_v11  ;;  %v6702_v31 = vld [vmem:[#allocation70_spill] sm:$0xff]  ;;  %v6707_v11 = vld [vmem:[#allocation107_spill] sm:$0xff] }
 0x202   : > { %v1179_v48 = vunpack.c.l.b16 %v1140_v5  ;;  %v981_v17 = vsel %vm961_vm8, %v948_v34, %v6699_v44  ;;  %v979_v22 = vsel %vm961_vm8, %v946_v47, %v6702_v31  ;;  %v6706_v51 = vld [vmem:[#allocation102_spill] sm:$0xff] }
 0x203   : > { %v1014_v25 = vsel %vm994_vm7, %v981_v17, %v6701_v42  ;;  %v6711_v42 = vld [vmem:[#allocation57_spill] sm:$0xff] }
 0x204   : > { %1549 = vrot.lane.b32.xlu2 %v4038_v2, %s3690_s8  ;;  %1547 = vrot.lane.b32.xlu1 %v4043_v8, %s3690_s8  ;;  %v1191_v36 = vpack.c.b16 %v1179_v48, %v1178_v9  ;;  %v1047_v5 = vsel %vm1027_vm9, %v1014_v25, %v6703_v58  ;;  %v6712_v25 = vld [vmem:[#allocation45_spill] sm:$0xff] }
 0x205   : > { %1517 = vrot.lane.b32.xlu0 %v6693_v16, %s3687_s25  ;;  %v1080_v48 = vsel %vm1060_vm10, %v1047_v5, %v4679_v50  ;;  %v914_v31 = vsel %vm884_vm5, %v6712_v25, %v6711_v42  ;;  %v6725_v25 = vld [vmem:[#allocation124_spill] sm:$0xff] }
 0x206   : > { %v4970_v24 = vpop.permute.xlu2 %1439  ;;  %v4974_v29 = vpop.permute.xlu1 %1419  ;;  %v1112_v26 = vsel %vm1092_vm11, %v1080_v48, %v4762_v3 }
 0x207   : > { %6692 = vst [vmem:[#allocation39_spill] sm:$0xff] %v4970_v24  ;;  %v4976_v39 = vpop.permute.xlu0 %1417  ;;  %v1144_v57 = vsel %vm1124_vm12, %v1112_v26, %v4883_v4  ;;  %v6720_v26 = vld [vmem:[#allocation68_spill] sm:$0xff] }
 0x208   : > { %v1181_v17 = vunpack.c.l.b16 %v1144_v57 }
 0x20c   : > { %1607 = vrot.lane.b32.xlu2 %v6693_v16, %s3691_s9  ;;  %1579 = vrot.lane.b32.xlu1 %v4137_v27, %s3690_s8  ;;  %v6704_v16 = vld [vmem:[#allocation91_spill] sm:$0xff] }
 0x20d   : > { %1577 = vrot.lane.b32.xlu0 %v4140_v41, %s3690_s8  ;;  %3539 = vmatmul.msk.bf16.gmra.mxu0 %vm1211_vm13, %v1191_v36  ;;  %v1012_v9 = vsel %vm994_vm7, %v979_v22, %v6704_v16  ;;  %v6705_v36 = vld [vmem:[#allocation116_spill] sm:$0xff]  ;;  %v6714_v22 = vld [vmem:[#allocation69_spill] sm:$0xff] }
 0x20e   : > { %v4982_v30 = vpop.permute.xlu2 %1445  ;;  %v4992_v35 = vpop.permute.xlu1 %1425  ;;  %v1045_v46 = vsel %vm1027_vm9, %v1012_v9, %v6706_v51  ;;  %v950_v58 = vsel %vm930_vm6, %v914_v31, %v6714_v22  ;;  %v6716_v16 = vld [vmem:[#allocation56_spill] sm:$0xff]  ;;  %v6717_v9 = vld [vmem:[#allocation43_spill] sm:$0xff]  ;;  %v6726_v22 = vld [vmem:[#allocation105_spill] sm:$0xff] }
 0x20f   : > { %v4999_v61 = vpop.permute.xlu0 %1423  ;;  %v1078_v34 = vsel %vm1060_vm10, %v1045_v46, %v6707_v11  ;;  %v917_v48 = vsel %vm884_vm5, %v6717_v9, %v6716_v16  ;;  %v6727_v9 = vld [vmem:[#allocation110_spill] sm:$0xff] }
 0x210   : > { %v1110_v50 = vsel %vm1092_vm11, %v1078_v34, %v4692_v10  ;;  %v952_v11 = vsel %vm930_vm6, %v917_v48, %v6720_v26  ;;  %v6721_v34 = vld [vmem:[#allocation85_spill] sm:$0xff] }
 0x211   : > { %v1142_v3 = vsel %vm1124_vm12, %v1110_v50, %v4768_v54  ;;  %v6713_v54 = vld [vmem:[#allocation115_spill] sm:$0xff]  ;;  %v6722_v50 = vld [vmem:[#allocation73_spill] sm:$0xff] }
 0x212   : > { %v1180_v4 = vunpack.c.l.b16 %v1142_v3  ;;  %v985_v3 = vsel %vm961_vm8, %v952_v11, %v6722_v50  ;;  %v6730_v50 = vld [vmem:[#allocation27_spill] sm:$0xff] }
 0x214   : > { %1519 = vrot.lane.b32.xlu2 %v6705_v36, %s3687_s25  ;;  %1483 = vrot.lane.b32.xlu1 %v6708_v33, %s3689_s29  ;;  %v1192_v47 = vpack.c.b16 %v1181_v17, %v1180_v4  ;;  %v6723_v17 = vld [vmem:[#allocation106_spill] sm:$0xff] }
 0x215   : > { %1609 = vrot.lane.b32.xlu0 %v6705_v36, %s3691_s9  ;;  %v6718_v36 = vld [vmem:[#allocation80_spill] sm:$0xff] }
 0x216   : > { %v5025_v40 = vpop.permute.xlu2 %1451  ;;  %v5033_v44 = vpop.permute.xlu1 %1431  ;;  %v983_v51 = vsel %vm961_vm8, %v950_v58, %v6718_v36 }
 0x217   : > { %6709 = vst [vmem:[#allocation112_spill] sm:$0xff] %v5033_v44  ;;  %v5035_v63 = vpop.permute.xlu0 %1429  ;;  %v1016_v57 = vsel %vm994_vm7, %v983_v51, %v6721_v34  ;;  %v6728_v51 = vld [vmem:[#allocation28_spill] sm:$0xff]  ;;  %v6761_v44 = vld [vmem:[#allocation97_spill] sm:$0xff] }
 0x218   : > { %6710 = vst [vmem:[#allocation64_spill] sm:$0xff] %v5035_v63  ;;  %v1049_v4 = vsel %vm1027_vm9, %v1016_v57, %v6723_v17  ;;  %v6732_v17 = vld [vmem:[#allocation49_spill] sm:$0xff] }
 0x219   : > { %v1082_v31 = vsel %vm1060_vm10, %v1049_v4, %v6725_v25  ;;  %v6733_v4 = vld [vmem:[#allocation37_spill] sm:$0xff] }
 0x21a   : > { %v1114_v16 = vsel %vm1092_vm11, %v1082_v31, %v4760_v18  ;;  %v6736_v31 = vld [vmem:[#allocation122_spill] sm:$0xff] }
 0x21b   : > { %v1146_v36 = vsel %vm1124_vm12, %v1114_v16, %v4876_v23  ;;  %v6738_v16 = vld [vmem:[#allocation72_spill] sm:$0xff] }
 0x21c   : > { %1553 = vrot.lane.b32.xlu2 %v4064_v7, %s3690_s8  ;;  %1551 = vrot.lane.b32.xlu1 %v4033_v1, %s3690_s8  ;;  %v1182_v34 = vunpack.c.l.b16 %v1146_v36  ;;  %v6739_v36 = vld [vmem:[#allocation84_spill] sm:$0xff] }
 0x21d   : > { %1521 = vrot.lane.b32.xlu0 %v6713_v54, %s3687_s25  ;;  %3540 = vmatmul.msk.bf16.gmra.mxu0 %vm1211_vm13, %v1192_v47  ;;  %v6724_v47 = vld [vmem:[#allocation94_spill] sm:$0xff] }
 0x21e   : > { %v5041_v10 = vpop.permute.xlu2 %1457  ;;  %v5051_v5 = vpop.permute.xlu1 %1437  ;;  %v1018_v42 = vsel %vm994_vm7, %v985_v3, %v6724_v47  ;;  %v920_v47 = vsel %vm884_vm5, %v6733_v4, %v6732_v17  ;;  %v6741_v17 = vld [vmem:[#allocation87_spill] sm:$0xff] }
 0x21f   : > { %6715 = vst [vmem:[#allocation51_spill] sm:$0xff] %v5051_v5  ;;  %v5058_v46 = vpop.permute.xlu0 %1435  ;;  %v1051_v58 = vsel %vm1027_vm9, %v1018_v42, %v6726_v22  ;;  %v6735_v42 = vld [vmem:[#allocation48_spill] sm:$0xff]  ;;  %v6737_v22 = vld [vmem:[#allocation61_spill] sm:$0xff] }
 0x220   : > { %6719 = vst [vmem:[#allocation25_spill] sm:$0xff] %v5058_v46  ;;  %v1084_v48 = vsel %vm1060_vm10, %v1051_v58, %v6727_v9  ;;  %v954_v58 = vsel %vm930_vm6, %v920_v47, %v6737_v22  ;;  %v6743_v47 = vld [vmem:[#allocation98_spill] sm:$0xff]  ;;  %v6759_v46 = vld [vmem:[#allocation75_spill] sm:$0xff] }
 0x224   : > { %1611 = vrot.lane.b32.xlu2 %v6713_v54, %s3691_s9  ;;  %1583 = vrot.lane.b32.xlu1 %v6728_v51, %s3690_s8  ;;  %v1116_v54 = vsel %vm1092_vm11, %v1084_v48, %v4712_v52 }
 0x225   : > { %1581 = vrot.lane.b32.xlu0 %v6708_v33, %s3690_s8  ;;  %v1148_v18 = vsel %vm1124_vm12, %v1116_v54, %v4800_v28  ;;  %v6734_v28 = vld [vmem:[#allocation60_spill] sm:$0xff]  ;;  %v987_v54 = vsel %vm961_vm8, %v954_v58, %v6739_v36 }
 0x226   : > { %v5084_v26 = vpop.permute.xlu2 %1463  ;;  %v5092_v11 = vpop.permute.xlu1 %1443  ;;  %v1183_v23 = vunpack.c.l.b16 %v1148_v18  ;;  %v923_v25 = vsel %vm884_vm5, %v6735_v42, %v6734_v28  ;;  %v6740_v18 = vld [vmem:[#allocation83_spill] sm:$0xff] }
 0x227   : > { %6729 = vst [vmem:[#allocation76_spill] sm:$0xff] %v5084_v26  ;;  %v5094_v57 = vpop.permute.xlu0 %1441  ;;  %v956_v9 = vsel %vm930_vm6, %v923_v25, %v6738_v16  ;;  %v6744_v25 = vld [vmem:[#allocation109_spill] sm:$0xff] }
 0x228   : > { %v1193_v3 = vpack.c.b16 %v1183_v23, %v1182_v34  ;;  %v989_v34 = vsel %vm961_vm8, %v956_v9, %v6740_v18  ;;  %v6745_v9 = vld [vmem:[#allocation20_spill] sm:$0xff] }
 0x229   : > { %v1022_v4 = vsel %vm994_vm7, %v989_v34, %v6741_v17  ;;  %v6746_v18 = vld [vmem:[#allocation132_spill] sm:$0xff] }
 0x22a   : > { %v1055_v22 = vsel %vm1027_vm9, %v1022_v4, %v6744_v25 }
 0x22b   : > { %v1088_v16 = vsel %vm1060_vm10, %v1055_v22, %v4698_v14  ;;  %v6749_v22 = vld [vmem:[#allocation50_spill] sm:$0xff] }
 0x22c   : > { %1487 = vrot.lane.b32.xlu2 %v6730_v50, %s3689_s29  ;;  %1485 = vrot.lane.b32.xlu1 %v6728_v51, %s3689_s29 }
 0x22d   : > { %1613 = vrot.lane.b32.xlu0 %v6736_v31, %s3691_s9  ;;  %3541 = vmatmul.msk.bf16.gmra.mxu0 %vm1211_vm13, %v1193_v3  ;;  %v6742_v3 = vld [vmem:[#allocation93_spill] sm:$0xff] }
 0x22e   : > { %v5100_v52 = vpop.permute.xlu2 %1469  ;;  %v5115_v48 = vpop.permute.xlu1 %1449  ;;  %v1020_v28 = vsel %vm994_vm7, %v987_v54, %v6742_v3  ;;  %v1120_v54 = vsel %vm1092_vm11, %v1088_v16, %v6746_v18 }
 0x22f   : > { %6731 = vst [vmem:[#allocation63_spill] sm:$0xff] %v5100_v52  ;;  %v5121_v23 = vpop.permute.xlu0 %1447  ;;  %v1053_v42 = vsel %vm1027_vm9, %v1020_v28, %v6743_v47  ;;  %v1152_v17 = vsel %vm1124_vm12, %v1120_v54, %v4916_v53  ;;  %v6756_v52 = vld [vmem:[#allocation86_spill] sm:$0xff] }
 0x230   : > { %v1086_v58 = vsel %vm1060_vm10, %v1053_v42, %v4702_v20  ;;  %v6747_v20 = vld [vmem:[#allocation121_spill] sm:$0xff]  ;;  %v1185_v28 = vunpack.c.l.b16 %v1152_v17  ;;  %v6748_v42 = vld [vmem:[#allocation26_spill] sm:$0xff]  ;;  %v6754_v17 = vld [vmem:[#allocation59_spill] sm:$0xff] }
 0x231   : > { %v1118_v36 = vsel %vm1092_vm11, %v1086_v58, %v4774_v6  ;;  %v6750_v58 = vld [vmem:[#allocation38_spill] sm:$0xff] }
 0x232   : > { %v1150_v34 = vsel %vm1124_vm12, %v1118_v36, %v4918_v15  ;;  %v929_v16 = vsel %vm884_vm5, %v6750_v58, %v6749_v22  ;;  %v6752_v36 = vld [vmem:[#allocation62_spill] sm:$0xff]  ;;  %v6757_v22 = vld [vmem:[#allocation71_spill] sm:$0xff] }
 0x233   : > { %v1184_v6 = vunpack.c.l.b16 %v1150_v34  ;;  %v960_v54 = vsel %vm930_vm6, %v929_v16, %v6752_v36  ;;  %v6760_v36 = vld [vmem:[#allocation99_spill] sm:$0xff] }
 0x234   : > { %1555 = vrot.lane.b32.xlu2 %v6745_v9, %s3690_s8  ;;  %1525 = vrot.lane.b32.xlu1 %v6747_v20, %s3687_s25  ;;  %v993_v5 = vsel %vm961_vm8, %v960_v54, %v6756_v52  ;;  %v6762_v54 = vld [vmem:[#allocation108_spill] sm:$0xff] }
 0x235   : > { %1523 = vrot.lane.b32.xlu0 %v6736_v31, %s3687_s25  ;;  %v1194_v15 = vpack.c.b16 %v1185_v28, %v1184_v6  ;;  %v6751_v31 = vld [vmem:[#allocation19_spill] sm:$0xff] }
 0x236   : > { %v5147_v4 = vpop.permute.xlu2 %1475  ;;  %v5151_v3 = vpop.permute.xlu1 %1455  ;;  %v6755_v6 = vld [vmem:[#allocation47_spill] sm:$0xff] }
 0x237   : > { %v5153_v47 = vpop.permute.xlu0 %1453  ;;  %v926_v28 = vsel %vm884_vm5, %v6755_v6, %v6754_v17 }
 0x238   : > { %v958_v58 = vsel %vm930_vm6, %v926_v28, %v6757_v22 }
 0x239   : > { %v991_v16 = vsel %vm961_vm8, %v958_v58, %v6759_v46 }
 0x23a   : > { %v1024_v17 = vsel %vm994_vm7, %v991_v16, %v6761_v44  ;;  %v6764_v44 = vld [vmem:[#allocation119_spill] sm:$0xff] }
 0x23b   : > { %v1057_v6 = vsel %vm1027_vm9, %v1024_v17, %v6762_v54  ;;  %v6769_v54 = vld [vmem:[#allocation32_spill] sm:$0xff] }
 0x23c   : > { %1587 = vrot.lane.b32.xlu2 %v6748_v42, %s3690_s8  ;;  %1585 = vrot.lane.b32.xlu1 %v6730_v50, %s3690_s8 }
 0x23d   : > { %1557 = vrot.lane.b32.xlu0 %v6751_v31, %s3690_s8  ;;  %3542 = vmatmul.msk.bf16.gmra.mxu0 %vm1211_vm13, %v1194_v15  ;;  %v1026_v15 = vsel %vm994_vm7, %v993_v5, %v6758_v0  ;;  %v6763_v5 = vld [vmem:[#allocation113_spill] sm:$0xff] }
 0x23e   : > { %v5159_v25 = vpop.permute.xlu2 %1481  ;;  %v5169_v34 = vpop.permute.xlu1 %1461  ;;  %v1059_v26 = vsel %vm1027_vm9, %v1026_v15, %v6760_v36  ;;  %v1090_v46 = vsel %vm1060_vm10, %v1057_v6, %v6763_v5  ;;  %v6771_v6 = vld [vmem:[#allocation22_spill] sm:$0xff]  ;;  %v6772_v5 = vld [vmem:[#allocation23_spill] sm:$0xff] }
 0x23f   : > { %6753 = vst [vmem:[#allocation79_spill] sm:$0xff] %v5169_v34  ;;  %v5176_v24 = vpop.permute.xlu0 %1459  ;;  %v1091_v52 = vsel %vm1060_vm10, %v1059_v26, %v4698_v14  ;;  %v6765_v14 = vld [vmem:[#allocation131_spill] sm:$0xff] }
 0x240   : > { %v1123_v0 = vsel %vm1092_vm11, %v1091_v52, %v6746_v18  ;;  %v1122_v26 = vsel %vm1092_vm11, %v1090_v46, %v6765_v14  ;;  %v6774_v14 = vld [vmem:[#allocation126_spill] sm:$0xff] }
 0x241   : > { %v1155_v28 = vsel %vm1124_vm12, %v1123_v0, %v4916_v53  ;;  %v1154_v58 = vsel %vm1124_vm12, %v1122_v26, %v4819_v19  ;;  %v6768_v53 = vld [vmem:[#allocation127_spill] sm:$0xff] }
 0x242   : > { %v1187_v15 = vunpack.c.l.b16 %v1155_v28  ;;  %v1186_v36 = vunpack.c.l.b16 %v1154_v58  ;;  %v6775_v58 = vld [vmem:[#allocation31_spill] sm:$0xff] }
 0x244   : > { %1489 = vrot.lane.b32.xlu2 %v6748_v42, %s3689_s29  ;;  %1617 = vrot.lane.b32.xlu1 %v6764_v44, %s3691_s9  ;;  %v1195_v17 = vpack.c.b16 %v1187_v15, %v1186_v36 }
 0x245   : > { %1615 = vrot.lane.b32.xlu0 %v6747_v20, %s3691_s9 }
 0x246   : > { %v1544_v22 = vpop.permute.xlu2 %1543  ;;  %v5208_v18 = vpop.permute.xlu1 %1467 }
 0x247   : > { %6766 = vst [vmem:[#allocation67_spill] sm:$0xff] %v5208_v18  ;;  %v5210_v16 = vpop.permute.xlu0 %1465  ;;  %v1634_v18 = vsel %vm884_vm5, %v4022_v59, %v4122_v60 }
 0x248   : > { %6767 = vst [vmem:[#allocation101_spill] sm:$0xff] %v5210_v16  ;;  %v6777_v16 = vld [vmem:[#allocation30_spill] sm:$0xff]  ;;  %v1664_v63 = vsel %vm930_vm6, %v1634_v18, %v4945_v49 }
 0x24c   : > { %1529 = vrot.lane.b32.xlu2 %v6768_v53, %s3687_s25  ;;  %1527 = vrot.lane.b32.xlu1 %v6764_v44, %s3687_s25 }
 0x24d   : > { %1491 = vrot.lane.b32.xlu0 %v6769_v54, %s3689_s29  ;;  %3543 = vmatmul.msk.bf16.gmra.mxu0 %vm1211_vm13, %v1195_v17 }
 0x24e   : > { %v1576_v52 = vpop.permute.xlu2 %1575  ;;  %v1474_v19 = vpop.permute.xlu1 %1473 }
 0x24f   : > { %v5219_v20 = vpop.permute.xlu0 %1471 }
 0x250   : > { %6770 = vst [vmem:[#allocation89_spill] sm:$0xff] %v5219_v20 }
 0x254   : > { %1589 = vrot.lane.b32.xlu2 %v6769_v54, %s3690_s8  ;;  %1561 = vrot.lane.b32.xlu1 %v6771_v6, %s3690_s8 }
 0x255   : > { %1559 = vrot.lane.b32.xlu0 %v6772_v5, %s3690_s8 }
 0x256   : > { %v5225_v0 = vpop.permute.xlu2 %1515  ;;  %v5229_v46 = vpop.permute.xlu1 %1479 }
 0x257   : > { %v1478_v28 = vpop.permute.xlu0 %1477 }
 0x25a   : > { %v5231_v44 = vpop.f32.mrf.mxu0 }
 0x25b   : > { %6773 = vst [vmem:[#allocation114_spill] sm:$0xff] %v5231_v44  ;;  %v6776_v44 = vld [vmem:[#allocation18_spill] sm:$0xff] }
 0x25c   : > { %1621 = vrot.lane.b32.xlu2 %v6774_v14, %s3691_s9  ;;  %1619 = vrot.lane.b32.xlu1 %v6768_v53, %s3691_s9  ;;  %v1636_v20 = vsel %vm884_vm5, %v6776_v44, %v4120_v37  ;;  %v1694_v44 = vsel %vm961_vm8, %v1664_v63, %v5094_v57 }
 0x25d   : > { %1591 = vrot.lane.b32.xlu0 %v6775_v58, %s3690_s8  ;;  %v1666_v6 = vsel %vm930_vm6, %v1636_v20, %v4939_v62  ;;  %v1726_v60 = vsel %vm994_vm7, %v1694_v44, %v1474_v19 }
 0x25e   : > { %v5237_v26 = vpop.permute.xlu2 %1549  ;;  %v1514_v15 = vpop.permute.xlu1 %1513  ;;  %v1696_v37 = vsel %vm961_vm8, %v1666_v6, %v5092_v11  ;;  %v6778_v11 = vld [vmem:[#allocation21_spill] sm:$0xff] }
 0x25f   : > { %v1512_v36 = vpop.permute.xlu0 %1511  ;;  %v1728_v59 = vsel %vm994_vm7, %v1696_v37, %v5147_v4  ;;  %v6779_v4 = vld [vmem:[#allocation125_spill] sm:$0xff] }
 0x260   : > { %v1758_v62 = vsel %vm1027_vm9, %v1726_v60, %v1512_v36 }
 0x261   : > { %v1790_v18 = vsel %vm1060_vm10, %v1758_v62, %v1544_v22  ;;  %v6780_v22 = vld [vmem:[#allocation36_spill] sm:$0xff] }
 0x262   : > { %v5241_v17 = vpop.f32.mrf.mxu0 }
 0x264   : > { %1531 = vrot.lane.b32.xlu2 %v6774_v14, %s3687_s25  ;;  %1495 = vrot.lane.b32.xlu1 %v6777_v16, %s3689_s29 }
 0x265   : > { %1493 = vrot.lane.b32.xlu0 %v6775_v58, %s3689_s29  ;;  %v1760_v58 = vsel %vm1027_vm9, %v1728_v59, %v1514_v15 }
 0x266   : > { %v1608_v53 = vpop.permute.xlu2 %1607  ;;  %v1574_v34 = vpop.permute.xlu1 %1573 }
 0x267   : > { %v1546_v14 = vpop.permute.xlu0 %1545  ;;  %v1821_v6 = vsel %vm1092_vm11, %v1790_v18, %v1574_v34  ;;  %v1638_v18 = vsel %vm884_vm5, %v4012_v13, %v4116_v32 }
 0x268   : > { %v1792_v49 = vsel %vm1060_vm10, %v1760_v58, %v1546_v14 }
 0x269   : > { %v1823_v20 = vsel %vm1092_vm11, %v1792_v49, %v1576_v52  ;;  %v6781_v49 = vld [vmem:[#allocation35_spill] sm:$0xff] }
 0x26a   : > { %v5267_v5 = vpop.f32.mrf.mxu0 }
 0x26c   : > { %1565 = vrot.lane.b32.xlu2 %v4106_v56, %s3690_s8  ;;  %1563 = vrot.lane.b32.xlu1 %v6778_v11, %s3690_s8 }
 0x26d   : > { %1533 = vrot.lane.b32.xlu0 %v6779_v4, %s3687_s25 }
 0x26e   : > { %v5275_v57 = vpop.permute.xlu2 %1519  ;;  %v1606_v19 = vpop.permute.xlu1 %1605 }
 0x26f   : > { %v1604_v15 = vpop.permute.xlu0 %1603  ;;  %v1854_v36 = vsel %vm1124_vm12, %v1823_v20, %v1606_v19  ;;  %v1698_v19 = vsel %vm961_vm8, %v1664_v63, %v4982_v30  ;;  %v6782_v20 = vld [vmem:[#allocation130_spill] sm:$0xff] }
 0x270   : > { %v1852_v58 = vsel %vm1124_vm12, %v1821_v6, %v1604_v15  ;;  %v1899_v14 = vunpack.c.l.b16 %v1854_v36  ;;  %v1730_v6 = vsel %vm994_vm7, %v1698_v19, %v1478_v28 }
 0x271   : > { %v1898_v37 = vunpack.c.l.b16 %v1852_v58  ;;  %v1668_v58 = vsel %vm930_vm6, %v1638_v18, %v4852_v45  ;;  %v6783_v45 = vld [vmem:[#allocation129_spill] sm:$0xff] }
 0x272   : > { %v5284_v44 = vpop.f32.mrf.mxu0 }
 0x273   : > { %v1914_v59 = vpack.c.b16 %v1899_v14, %v1898_v37  ;;  %v1700_v14 = vsel %vm961_vm8, %v1668_v58, %v5121_v23  ;;  %v1762_v37 = vsel %vm1027_vm9, %v1730_v6, %v5225_v0  ;;  %v6784_v58 = vld [vmem:[#allocation34_spill] sm:$0xff] }
 0x274   : > { %1623 = vrot.lane.b32.xlu2 %v6779_v4, %s3691_s9  ;;  %1595 = vrot.lane.b32.xlu1 %v6780_v22, %s3690_s8  ;;  %v1732_v13 = vsel %vm994_vm7, %v1700_v14, %v5229_v46 }
 0x275   : > { %1593 = vrot.lane.b32.xlu0 %v6777_v16, %s3690_s8  ;;  %3544 = vmatmul.msk.bf16.vlgmr.msra.gmra.mxu1 %vm1211_vm13, %v1914_v59 }
 0x276   : > { %v5290_v60 = vpop.permute.xlu2 %1553  ;;  %v1548_v34 = vpop.permute.xlu1 %1547 }
 0x277   : > { %v1518_v52 = vpop.permute.xlu0 %1517  ;;  %v1794_v32 = vsel %vm1060_vm10, %v1762_v37, %v1548_v34 }
 0x278   : > { %v1764_v63 = vsel %vm1027_vm9, %v1732_v13, %v1518_v52 }
 0x279   : > { %v1796_v46 = vsel %vm1060_vm10, %v1764_v63, %v5237_v26 }
 0x27a   : > { %v5295_v62 = vpop.f32.mrf.mxu0 }
 0x27c   : > { %1499 = vrot.lane.b32.xlu2 %v6781_v49, %s3689_s29  ;;  %1497 = vrot.lane.b32.xlu1 %v6780_v22, %s3689_s29 }
 0x27d   : > { %1625 = vrot.lane.b32.xlu0 %v6782_v20, %s3691_s9 }
 0x27e   : > { %v5301_v4 = vpop.permute.xlu2 %1611  ;;  %v1580_v15 = vpop.permute.xlu1 %1579 }
 0x27f   : > { %v1578_v36 = vpop.permute.xlu0 %1577  ;;  %v1827_v34 = vsel %vm1092_vm11, %v1796_v46, %v1580_v15  ;;  %v1290_v46 = vmax.f32 %v5241_v17, 0.0 }
 0x280   : > { %v1825_v28 = vsel %vm1092_vm11, %v1794_v32, %v1578_v36  ;;  %v1505_v32 = vshrl.u32 %v4342_v12, 16 }
 0x281   : > { %v1856_v0 = vsel %vm1124_vm12, %v1825_v28, %v1608_v53  ;;  %v1640_v28 = vsel %vm884_vm5, %v4043_v8, %v4140_v41 }
 0x282   : > { %v1261_v30 = vpop.f32.mrf.mxu0  ;;  %v1900_v19 = vunpack.c.l.b16 %v1856_v0  ;;  %v1292_v0 = vmax.f32 %v5284_v44, 0.0 }
 0x283   : > { %v1294_v37 = vmax.f32 %v1261_v30, 0.0  ;;  %v1642_v30 = vsel %vm884_vm5, %v4038_v2, %v4137_v27  ;;  %v1306_v27 = vpack.c.bf16 %v1290_v46, %v1290_v46 }
 0x284   : > { %1567 = vrot.lane.b32.xlu2 %v4101_v43, %s3690_s8  ;;  %1537 = vrot.lane.b32.xlu1 %v6783_v45, %s3687_s25  ;;  %v1308_v17 = vpack.c.bf16 %v1292_v0, %v1292_v0 }
 0x285   : > { %1535 = vrot.lane.b32.xlu0 %v6782_v20, %s3687_s25  ;;  %v1507_v20 = vshll.u32 %v4342_v12, 16 }
 0x286   : > { %v5326_v23 = vpop.permute.xlu2 %1487  ;;  %v1484_v59 = vpop.permute.xlu1 %1483 }
 0x287   : > { %v1610_v18 = vpop.permute.xlu0 %1609  ;;  %v1509_v63 = vrot.slane %v1507_v20, 1 }
 0x288   : > { %v1858_v52 = vsel %vm1124_vm12, %v1827_v34, %v1610_v18  ;;  %v6785_v34 = vld [vmem:[#allocation128_spill] sm:$0xff]  ;;  %v1310_v18 = vpack.c.bf16 %v1294_v37, %v1294_v37 }
 0x289   : > { %v1901_v6 = vunpack.c.l.b16 %v1858_v52  ;;  %v1670_v52 = vsel %vm930_vm6, %v1640_v28, %v4976_v39  ;;  %v1510_v8 = vor.u32 %v1509_v63, %v1505_v32  ;;  %v2236_v28 = vunpack.c.l.b16 %v1306_v27 }
 0x28a   : > { %v5335_v36 = vpop.f32.mrf.mxu0  ;;  %v1702_v41 = vsel %vm961_vm8, %v1670_v52, %v5115_v48  ;;  %v2240_v20 = vunpack.c.l.b16 %v1310_v18 }
 0x28b   : > { %v1915_v14 = vpack.c.b16 %v1901_v6, %v1900_v19  ;;  %v1734_v2 = vsel %vm994_vm7, %v1702_v41, %v5159_v25  ;;  %v2252_v41 = vpack.c.b16 %v2236_v28, %v2236_v28 }
 0x28c   : > { %1599 = vrot.lane.b32.xlu2 %v6784_v58, %s3690_s8  ;;  %1597 = vrot.lane.b32.xlu1 %v6781_v49, %s3690_s8  ;;  %v1766_v39 = vsel %vm1027_vm9, %v1734_v2, %v5275_v57  ;;  %v6786_v57 = vld [vmem:[#allocation74_spill] sm:$0xff] }
 0x28d   : > { %1569 = vrot.lane.b32.xlu0 %v4095_v38, %s3690_s8  ;;  %3545 = vmatmul.msk.bf16.gmra.mxu1 %vm1211_vm13, %v1915_v14  ;;  %v1672_v14 = vsel %vm930_vm6, %v1642_v30, %v4974_v29  ;;  %v2238_v29 = vunpack.c.l.b16 %v1308_v17 }
 0x28e   : > { %v5344_v26 = vpop.permute.xlu2 %1555  ;;  %v1552_v53 = vpop.permute.xlu1 %1551 }
 0x28f   : > { %v1522_v15 = vpop.permute.xlu0 %1521  ;;  %v1798_v37 = vsel %vm1060_vm10, %v1766_v39, %v1552_v53  ;;  %v2254_v30 = vpack.c.b16 %v2238_v29, %v2238_v29 }
 0x292   : > { %v1266_v13 = vpop.f32.mrf.mxu0 }
 0x293   : > { %v1296_v0 = vmax.f32 %v1266_v13, 0.0 }
 0x294   : > { %1501 = vrot.lane.b32.xlu2 %v6784_v58, %s3689_s29  ;;  %1629 = vrot.lane.b32.xlu1 %v6785_v34, %s3691_s9 }
 0x295   : > { %1627 = vrot.lane.b32.xlu0 %v6783_v45, %s3691_s9  ;;  %v1704_v45 = vsel %vm961_vm8, %v1672_v14, %v5025_v40  ;;  %v2256_v40 = vpack.c.b16 %v2240_v20, %v2240_v20  ;;  %v1312_v13 = vpack.c.bf16 %v1296_v0, %v1296_v0 }
 0x296   : > { %v1584_v19 = vpop.permute.xlu1 %1583  ;;  %v5366_v6 = vpop.permute.xlu2 %1587  ;;  %v1736_v48 = vsel %vm994_vm7, %v1704_v45, %v1484_v59 }
 0x297   : > { %v1582_v44 = vpop.permute.xlu0 %1581  ;;  %v1768_v63 = vsel %vm1027_vm9, %v1736_v48, %v1522_v15  ;;  %v2272_v48 = vshrl.u32 %v2252_v41, 16 }
 0x298   : > { %v1829_v25 = vsel %vm1092_vm11, %v1798_v37, %v1582_v44  ;;  %v1800_v53 = vsel %vm1060_vm10, %v1768_v63, %v5290_v60  ;;  %v2242_v37 = vunpack.c.l.b16 %v1312_v13 }
 0x299   : > { %v1860_v59 = vsel %vm1124_vm12, %v1829_v25, %v5301_v4  ;;  %v1831_v15 = vsel %vm1092_vm11, %v1800_v53, %v1584_v19  ;;  %v2280_v4 = vshrl.u32 %v2254_v30, 16 }
 0x29a   : > { %v5378_v32 = vpop.f32.mrf.mxu0  ;;  %v1902_v14 = vunpack.c.l.b16 %v1860_v59 }
 0x29b   : > { %v2282_v25 = vrot.slane %v2280_v4, 7 }
 0x29c   : > { %1541 = vrot.lane.b32.xlu2 %v1510_v8, %s3687_s25  ;;  %1539 = vrot.lane.b32.xlu1 %v6785_v34, %s3687_s25  ;;  %v2288_v34 = vshrl.u32 %v2256_v40, 16  ;;  %v2258_v40 = vpack.c.b16 %v2242_v37, %v2242_v37  ;;  %s3702_s25 = smov 120  }
 0x29d   : > { %1503 = vrot.lane.b32.xlu0 %v6786_v57, %s3689_s29 }
 0x29e   : > { %v1486_v46 = vpop.permute.xlu1 %1485  ;;  %v5393_v45 = vpop.permute.xlu2 %1489  ;;  %v2290_v19 = vrot.slane %v2288_v34, 7  ;;  %v2296_v41 = vshrl.u32 %v2258_v40, 16 }
 0x29f   : > { %v1614_v52 = vpop.permute.xlu0 %1613 }
 0x2a0   : > { %v1862_v44 = vsel %vm1124_vm12, %v1831_v15, %v1614_v52  ;;  %v5402_v53 = vsel %vm410_vm3, %v1310_v18, %v2290_v19  ;;  %v1646_v52 = vsel %vm884_vm5, %v4064_v7, %v6728_v51  ;;  %v1644_v18 = vsel %vm884_vm5, %v4033_v1, %v6708_v33 }
 0x2a1   : > { %v1903_v2 = vunpack.c.l.b16 %v1862_v44  ;;  %v1676_v34 = vsel %vm930_vm6, %v1646_v52, %v4999_v61  ;;  %v1674_v51 = vsel %vm930_vm6, %v1644_v18, %v4866_v55 }
 0x2a2   : > { %v1271_v39 = vpop.f32.mrf.mxu0 }
 0x2a3   : > { %v1298_v20 = vmax.f32 %v1271_v39, 0.0  ;;  %v1916_v60 = vpack.c.b16 %v1903_v2, %v1902_v14  ;;  %v2298_v2 = vrot.slane %v2296_v41, 7  ;;  %v1706_v39 = vsel %vm961_vm8, %v1674_v51, %v5153_v47 }
 0x2a4   : > { %1631 = vrot.lane.b32.xlu2 %v1510_v8, %s3691_s9  ;;  %1601 = vrot.lane.b32.xlu1 %v6786_v57, %s3690_s8  ;;  %v2274_v8 = vrot.slane %v2272_v48, 7  ;;  %v1738_v33 = vsel %vm994_vm7, %v1706_v39, %v1486_v46 }
 0x2a5   : > { %v1314_v29 = vpack.c.bf16 %v1298_v20, %v1298_v20  ;;  %1571 = vrot.lane.b32.xlu0 %v4342_v12, %s3690_s8  ;;  %3546 = vmatmul.msk.bf16.gmra.mxu1 %vm1211_vm13, %v1916_v60  ;;  %v5411_v12 = vsel %vm410_vm3, %v1308_v17, %v2282_v25 }
 0x2a6   : > { %v1526_v63 = vpop.permute.xlu1 %1525  ;;  %v5408_v15 = vpop.permute.xlu2 %1529  ;;  %v5417_v44 = vsel %vm410_vm3, %v1306_v27, %v2274_v8  ;;  %v1708_v27 = vsel %vm961_vm8, %v1676_v34, %v5151_v3  ;;  %v5444_v3 = vsel %vm410_vm3, %v1312_v13, %v2298_v2 }
 0x2a7   : > { %v2244_v28 = vunpack.c.l.b16 %v1314_v29  ;;  %v1524_v0 = vpop.permute.xlu0 %1523  ;;  %v1740_v1 = vsel %vm994_vm7, %v1708_v27, %v5326_v23  ;;  %v1650_v27 = vsel %vm884_vm5, %v6751_v31, %v6748_v42 }
 0x2a8   : > { %v1772_v4 = vsel %vm1027_vm9, %v1740_v1, %v1526_v63  ;;  %v1770_v20 = vsel %vm1027_vm9, %v1738_v33, %v1524_v0 }
 0x2a9   : > { %v2260_v59 = vpack.c.b16 %v2244_v28, %v2244_v28  ;;  %v1802_v46 = vsel %vm1060_vm10, %v1770_v20, %v5344_v26 }
 0x2aa   : > { %v5404_v30 = vpop.f32.mrf.mxu0 }
 0x2ab   : > { %v2304_v57 = vshrl.u32 %v2260_v59, 16 }
 0x2ac   : > { %2390 = vrot.lane.b32.xlu2 %v5402_v53, %s3685_s23  ;;  %2388 = vrot.lane.b32.xlu1 %v5411_v12, %s3685_s23 }
 0x2ad   : > { %2386 = vrot.lane.b32.xlu0 %v5417_v44, %s3685_s23  ;;  %v2306_v14 = vrot.slane %v2304_v57, 7 }
 0x2ae   : > { %v1586_v17 = vpop.permute.xlu1 %1585  ;;  %v1590_v47 = vpop.permute.xlu2 %1589 }
 0x2af   : > { %v1558_v7 = vpop.permute.xlu0 %1557  ;;  %v5441_v48 = vsel %vm410_vm3, %v1314_v29, %v2306_v14  ;;  %v1833_v29 = vsel %vm1092_vm11, %v1802_v46, %v1586_v17 }
 0x2b0   : > { %v1804_v60 = vsel %vm1060_vm10, %v1772_v4, %v1558_v7  ;;  %v1648_v7 = vsel %vm884_vm5, %v6745_v9, %v6730_v50 }
 0x2b1   : > { %v1835_v37 = vsel %vm1092_vm11, %v1804_v60, %v5366_v6  ;;  %v1678_v39 = vsel %vm930_vm6, %v1648_v7, %v4992_v35  ;;  %v6791_v7 = vld [vmem:[#allocation79_spill] sm:$0xff] }
 0x2b2   : > { %v1276_v61 = vpop.f32.mrf.mxu0  ;;  %v1710_v4 = vsel %vm961_vm8, %v1678_v39, %v5041_v10 }
 0x2b3   : > { %v1300_v55 = vmax.f32 %v1276_v61, 0.0  ;;  %v1680_v61 = vsel %vm930_vm6, %v1650_v27, %v4908_v21  ;;  %v1742_v50 = vsel %vm994_vm7, %v1710_v4, %v5393_v45 }
 0x2b4   : > { %2394 = vrot.lane.b32.xlu1 %v5441_v48, %s3685_s23  ;;  %v1712_v42 = vsel %vm961_vm8, %v1680_v61, %v5176_v24  ;;  %v6793_v61 = vld [vmem:[#allocation76_spill] sm:$0xff] }
 0x2b5   : > { %v1316_v23 = vpack.c.bf16 %v1300_v55, %v1300_v55  ;;  %2392 = vrot.lane.b32.xlu0 %v5444_v3, %s3685_s23 }
 0x2b6   : > { %v1618_v19 = vpop.permute.xlu1 %1617  ;;  %v1622_v41 = vpop.permute.xlu2 %1621 }
 0x2b7   : > { %v2246_v63 = vunpack.c.l.b16 %v1316_v23  ;;  %v1616_v13 = vpop.permute.xlu0 %1615  ;;  %v1866_v25 = vsel %vm1124_vm12, %v1835_v37, %v1618_v19 }
 0x2b8   : > { %v1864_v28 = vsel %vm1124_vm12, %v1833_v29, %v1616_v13  ;;  %v1905_v0 = vunpack.c.l.b16 %v1866_v25 }
 0x2b9   : > { %v2262_v8 = vpack.c.b16 %v2246_v63, %v2246_v63  ;;  %v1904_v40 = vunpack.c.l.b16 %v1864_v28 }
 0x2ba   : > { %v5457_v59 = vpop.f32.mrf.mxu0 }
 0x2bb   : > { %v2312_v57 = vshrl.u32 %v2262_v8, 16  ;;  %v1917_v52 = vpack.c.b16 %v1905_v0, %v1904_v40 }
 0x2bd   : > { %v2314_v26 = vrot.slane %v2312_v57, 7  ;;  %3547 = vmatmul.msk.bf16.gmra.mxu1 %vm1211_vm13, %v1917_v52  ;;  %v6787_v52 = vld [vmem:[#allocation23_spill] sm:$0xff] }
 0x2be   : > { %v1528_v6 = vpop.permute.xlu1 %1527  ;;  %v1532_v9 = vpop.permute.xlu2 %1531 }
 0x2bf   : > { %v1492_v18 = vpop.permute.xlu0 %1491  ;;  %v5461_v17 = vsel %vm410_vm3, %v1316_v23, %v2314_v26  ;;  %v1774_v31 = vsel %vm1027_vm9, %v1742_v50, %v1528_v6  ;;  %v1652_v26 = vsel %vm884_vm5, %v6787_v52, %v6769_v54  ;;  %v6788_v6 = vld [vmem:[#allocation64_spill] sm:$0xff] }
 0x2c0   : > { %2396 = vrot.lane.b32.xlu2 %v5461_v17, %s3685_s23  ;;  %v1744_v35 = vsel %vm994_vm7, %v1712_v42, %v1492_v18  ;;  %v1682_v18 = vsel %vm930_vm6, %v1652_v26, %v6788_v6 }
 0x2c1   : > { %v1776_v10 = vsel %vm1027_vm9, %v1744_v35, %v5408_v15 }
 0x2c2   : > { %v1281_v34 = vpop.f32.mrf.mxu0 }
 0x2c3   : > { %v1302_v14 = vmax.f32 %v1281_v34, 0.0  ;;  %v6789_v34 = vld [vmem:[#allocation31_spill] sm:$0xff] }
 0x2c5   : > { %v1318_v51 = vpack.c.bf16 %v1302_v14, %v1302_v14  ;;  %v6790_v14 = vld [vmem:[#allocation22_spill] sm:$0xff] }
 0x2c6   : > { %v1562_v2 = vpop.permute.xlu1 %1561  ;;  %v1566_v25 = vpop.permute.xlu2 %1565 }
 0x2c7   : > { %v2248_v1 = vunpack.c.l.b16 %v1318_v51  ;;  %v1560_v33 = vpop.permute.xlu0 %1559  ;;  %v1808_v45 = vsel %vm1060_vm10, %v1776_v10, %v1562_v2 }
 0x2c8   : > { %v1806_v55 = vsel %vm1060_vm10, %v1774_v31, %v1560_v33  ;;  %v6792_v33 = vld [vmem:[#allocation112_spill] sm:$0xff] }
 0x2c9   : > { %v2264_v20 = vpack.c.b16 %v2248_v1, %v2248_v1  ;;  %v1837_v21 = vsel %vm1092_vm11, %v1806_v55, %v1590_v47 }
 0x2cb   : > { %v2320_v60 = vshrl.u32 %v2264_v20, 16 }
 0x2cd   : > { %v2322_v23 = vrot.slane %v2320_v60, 7 }
 0x2ce   : > { %v1620_v46 = vpop.permute.xlu1 %1619  ;;  %v1624_v8 = vpop.permute.xlu2 %1623 }
 0x2cf   : > { %v1592_v37 = vpop.permute.xlu0 %1591  ;;  %v1868_v19 = vsel %vm1124_vm12, %v1837_v21, %v1620_v46  ;;  %v5490_v24 = vsel %vm410_vm3, %v1318_v51, %v2322_v23  ;;  %v1714_v51 = vsel %vm961_vm8, %v1682_v18, %v6791_v7  ;;  %v6795_v18 = vld [vmem:[#allocation52_spill] sm:$0xff]  ;;  %v6797_v7 = vld [vmem:[#allocation101_spill] sm:$0xff] }
 0x2d0   : > { %v1839_v29 = vsel %vm1092_vm11, %v1808_v45, %v1592_v37  ;;  %v1906_v63 = vunpack.c.l.b16 %v1868_v19  ;;  %2398 = vrot.lane.b32.xlu0 %v5490_v24, %s3685_s23  ;;  %s3700_s23 = smov 112  }
 0x2d1   : > { %v1870_v13 = vsel %vm1124_vm12, %v1839_v29, %v1622_v41  ;;  %v1654_v41 = vsel %vm884_vm5, %v6790_v14, %v6789_v34  ;;  %v6796_v14 = vld [vmem:[#allocation67_spill] sm:$0xff] }
 0x2d2   : > { %v1907_v15 = vunpack.c.l.b16 %v1870_v13  ;;  %v1684_v4 = vsel %vm930_vm6, %v1654_v41, %v6792_v33 }
 0x2d3   : > { %v1716_v54 = vsel %vm961_vm8, %v1684_v4, %v6793_v61 }
 0x2d4   : > { %v1918_v47 = vpack.c.b16 %v1907_v15, %v1906_v63 }
 0x2d6   : > { %3548 = vmatmul.msk.bf16.gmra.mxu1 %vm1211_vm13, %v1918_v47  ;;  %v1496_v28 = vpop.permute.xlu1 %1495  ;;  %v1500_v39 = vpop.permute.xlu2 %1499 }
 0x2d7   : > { %v1494_v0 = vpop.permute.xlu0 %1493  ;;  %v1748_v20 = vsel %vm994_vm7, %v1716_v54, %v1496_v28 }
 0x2d8   : > { %v1746_v27 = vsel %vm994_vm7, %v1714_v51, %v1494_v0  ;;  %v1656_v0 = vsel %vm884_vm5, %v6778_v11, %v6777_v16 }
 0x2d9   : > { %v1778_v50 = vsel %vm1027_vm9, %v1746_v27, %v1532_v9  ;;  %v1686_v34 = vsel %vm930_vm6, %v1656_v0, %v6795_v18  ;;  %v6800_v0 = vld [vmem:[#allocation89_spill] sm:$0xff] }
 0x2de   : > { %v1564_v40 = vpop.permute.xlu1 %1563  ;;  %v1568_v45 = vpop.permute.xlu2 %1567 }
 0x2df   : > { %v1534_v57 = vpop.permute.xlu0 %1533  ;;  %v1810_v42 = vsel %vm1060_vm10, %v1778_v50, %v1564_v40 }
 0x2e0   : > { %v1780_v31 = vsel %vm1027_vm9, %v1748_v20, %v1534_v57  ;;  %v6794_v57 = vld [vmem:[#allocation25_spill] sm:$0xff] }
 0x2e1   : > { %v1812_v55 = vsel %vm1060_vm10, %v1780_v31, %v1566_v25  ;;  %v1658_v25 = vsel %vm884_vm5, %v4106_v56, %v6780_v22  ;;  %v1718_v56 = vsel %vm961_vm8, %v1686_v34, %v6797_v7  ;;  %v6802_v7 = vld [vmem:[#allocation63_spill] sm:$0xff] }
 0x2e2   : > { %v1688_v52 = vsel %vm930_vm6, %v1658_v25, %v6794_v57 }
 0x2e3   : > { %v1720_v41 = vsel %vm961_vm8, %v1688_v52, %v6796_v14  ;;  %v6801_v14 = vld [vmem:[#allocation51_spill] sm:$0xff] }
 0x2e4   : > { %v1752_v22 = vsel %vm994_vm7, %v1720_v41, %v1500_v39 }
 0x2e6   : > { %v1596_v2 = vpop.permute.xlu1 %1595  ;;  %v1600_v47 = vpop.permute.xlu2 %1599 }
 0x2e7   : > { %v1594_v1 = vpop.permute.xlu0 %1593  ;;  %v1843_v10 = vsel %vm1092_vm11, %v1812_v55, %v1596_v2 }
 0x2e8   : > { %v1841_v35 = vsel %vm1092_vm11, %v1810_v42, %v1594_v1 }
 0x2e9   : > { %v1872_v60 = vsel %vm1124_vm12, %v1841_v35, %v1624_v8 }
 0x2ea   : > { %v1908_v9 = vunpack.c.l.b16 %v1872_v60 }
 0x2ee   : > { %v1498_v23 = vpop.permute.xlu1 %1497  ;;  %v1502_v33 = vpop.permute.xlu2 %1501 }
 0x2ef   : > { %v1626_v21 = vpop.permute.xlu0 %1625  ;;  %v1750_v16 = vsel %vm994_vm7, %v1718_v56, %v1498_v23 }
 0x2f0   : > { %v1874_v46 = vsel %vm1124_vm12, %v1843_v10, %v1626_v21 }
 0x2f1   : > { %v1909_v37 = vunpack.c.l.b16 %v1874_v46 }
 0x2f2   : > { %v5521_v19 = vpop.f32.mrf.mxu1 }
 0x2f3   : > { %v1919_v29 = vpack.c.b16 %v1909_v37, %v1908_v9  ;;  %v1662_v9 = vsel %vm884_vm5, %v4095_v38, %v6784_v58  ;;  %v1660_v38 = vsel %vm884_vm5, %v4101_v43, %v6781_v49 }
 0x2f4   : > { %v1690_v41 = vsel %vm930_vm6, %v1660_v38, %v6801_v14 }
 0x2f5   : > { %3549 = vmatmul.msk.bf16.gmra.mxu1 %vm1211_vm13, %v1919_v29  ;;  %v1722_v56 = vsel %vm961_vm8, %v1690_v41, %v6802_v7 }
 0x2f6   : > { %v1538_v63 = vpop.permute.xlu1 %1537 }
 0x2f7   : > { %v1536_v13 = vpop.permute.xlu0 %1535  ;;  %v1784_v11 = vsel %vm1027_vm9, %v1752_v22, %v1538_v63 }
 0x2f8   : > { %v1782_v27 = vsel %vm1027_vm9, %v1750_v16, %v1536_v13  ;;  %v6799_v13 = vld [vmem:[#allocation39_spill] sm:$0xff]  ;;  %v1754_v16 = vsel %vm994_vm7, %v1722_v56, %v1502_v33 }
 0x2f9   : > { %v1814_v54 = vsel %vm1060_vm10, %v1782_v27, %v1568_v45 }
 0x2fa   : > { %v1957_v15 = vpop.f32.mrf.mxu1 }
 0x2fb   : > { %v1996_v28 = vmax.f32 %v1957_v15, 0.0  ;;  %v1692_v15 = vsel %vm930_vm6, %v1662_v9, %v6799_v13 }
 0x2fd   : > { %v2012_v8 = vpack.c.bf16 %v1996_v28, %v1996_v28 }
 0x2fe   : > { %v1598_v40 = vpop.permute.xlu1 %1597 }
 0x2ff   : > { %v2044_v26 = vunpack.c.l.b16 %v2012_v8  ;;  %v1570_v6 = vpop.permute.xlu0 %1569  ;;  %v1845_v39 = vsel %vm1092_vm11, %v1814_v54, %v1598_v40  ;;  %v1542_v40 = vpop.permute.xlu2 %1541 }
 0x300   : > { %v1816_v1 = vsel %vm1060_vm10, %v1784_v11, %v1570_v6 }
 0x301   : > { %v2060_v51 = vpack.c.b16 %v2044_v26, %v2044_v26  ;;  %v1847_v50 = vsel %vm1092_vm11, %v1816_v1, %v1600_v47 }
 0x303   : > { %v2083_v2 = vshrl.u32 %v2060_v51, 16  ;;  %v2086_v61 = vshll.u32 %v2060_v51, 16 }
 0x305   : > { %v2085_v4 = vrot.slane %v2083_v2, 7 }
 0x306   : > { %v1630_v20 = vpop.permute.xlu1 %1629 }
 0x307   : > { %v2088_v42 = vor.u32 %v2086_v61, %v2085_v4  ;;  %v1628_v31 = vpop.permute.xlu0 %1627  ;;  %v1878_v35 = vsel %vm1124_vm12, %v1847_v50, %v1630_v20  ;;  %v1632_v1 = vpop.permute.xlu2 %1631 }
 0x308   : > { %v1876_v60 = vsel %vm1124_vm12, %v1845_v39, %v1628_v31  ;;  %v1911_v55 = vunpack.c.l.b16 %v1878_v35 }
 0x309   : > { %v5550_v10 = vsel %vm3799_vm2, %v2012_v8, %v2088_v42  ;;  %v1910_v21 = vunpack.c.l.b16 %v1876_v60  ;;  %v1724_v8 = vsel %vm961_vm8, %v1692_v15, %v6800_v0  ;;  %vm3038_vm8 = vcmask 850944  }
 0x30a   : > { %v2403_v46 = vshll.u32 %v5550_v10, 16  ;;  %v5553_v45 = vpop.f32.mrf.mxu1  ;;  %v2401_v29 = vshrl.u32 %v5550_v10, 16 }
 0x30b   : > { %v1920_v37 = vpack.c.b16 %v1911_v55, %v1910_v21 }
 0x30c   : > { %v2405_v63 = vrot.slane %v2403_v46, 1 }
 0x30d   : > { %3550 = vmatmul.msk.bf16.gmra.mxu1 %vm1211_vm13, %v1920_v37 }
 0x30e   : > { %v1540_v28 = vpop.permute.xlu1 %1539  ;;  %v5562_v25 = vor.u32 %v2405_v63, %v2401_v29 }
 0x30f   : > { %v1504_v57 = vpop.permute.xlu0 %1503  ;;  %v1786_v43 = vsel %vm1027_vm9, %v1754_v16, %v1540_v28 }
 0x310   : > { %v1756_v52 = vsel %vm994_vm7, %v1724_v8, %v1504_v57  ;;  %2449 = vrot.lane.b32.xlu1 %v5562_v25, %s3686_s24 }
 0x311   : > { %v1788_v58 = vsel %vm1027_vm9, %v1756_v52, %v1542_v40  ;;  %vm3054_vm9 = vcmask 916480  }
 0x312   : > { %v1819_v26 = vsel %vm1060_vm10, %v1788_v58, %v1570_v6  ;;  %v1962_v18 = vpop.f32.mrf.mxu1 }
 0x313   : > { %v1998_v34 = vmax.f32 %v1962_v18, 0.0  ;;  %v1850_v51 = vsel %vm1092_vm11, %v1819_v26, %v1600_v47 }
 0x314   : > { %v1881_v2 = vsel %vm1124_vm12, %v1850_v51, %v1630_v20 }
 0x315   : > { %v2014_v22 = vpack.c.bf16 %v1998_v34, %v1998_v34  ;;  %v1913_v47 = vunpack.c.l.b16 %v1881_v2 }
 0x316   : > { %v1602_v11 = vpop.permute.xlu1 %1601 }
 0x317   : > { %v2046_v49 = vunpack.c.l.b16 %v2014_v22  ;;  %v1572_v27 = vpop.permute.xlu0 %1571 }
 0x318   : > { %v1818_v6 = vsel %vm1060_vm10, %v1786_v43, %v1572_v27 }
 0x319   : > { %v2062_v4 = vpack.c.b16 %v2046_v49, %v2046_v49  ;;  %v1849_v61 = vsel %vm1092_vm11, %v1818_v6, %v1602_v11 }
 0x31a   : > { %v1880_v54 = vsel %vm1124_vm12, %v1849_v61, %v1632_v1 }
 0x31b   : > { %v2097_v50 = vshrl.u32 %v2062_v4, 16  ;;  %v1912_v42 = vunpack.c.l.b16 %v1880_v54  ;;  %v2100_v33 = vshll.u32 %v2062_v4, 16 }
 0x31d   : > { %v2099_v39 = vrot.slane %v2097_v50, 7  ;;  %v1921_v31 = vpack.c.b16 %v1913_v47, %v1912_v42 }
 0x31f   : > { %v2102_v35 = vor.u32 %v2100_v33, %v2099_v39  ;;  %3551 = vmatmul.msk.bf16.gmra.mxu1 %vm1211_vm13, %v1921_v31 }
 0x321   : > { %v5588_v60 = vsel %vm3799_vm2, %v2014_v22, %v2102_v35 }
 0x322   : > { %v2410_v20 = vshll.u32 %v5588_v60, 16  ;;  %v5591_v55 = vpop.f32.mrf.mxu1  ;;  %v2408_v21 = vshrl.u32 %v5588_v60, 16 }
 0x324   : > { %v2412_v46 = vrot.slane %v2410_v20, 1 }
 0x326   : > { %v5594_v9 = vor.u32 %v2412_v46, %v2408_v21 }
 0x328   : > { %2451 = vrot.lane.b32.xlu2 %v5594_v9, %s3686_s24 }
 0x32a   : > { %v1967_v37 = vpop.f32.mrf.mxu1 }
 0x32b   : > { %v2000_v29 = vmax.f32 %v1967_v37, 0.0  ;;  %v2465_v37 = vshll.u32 %v5417_v44, 16 }
 0x32d   : > { %v2016_v63 = vpack.c.bf16 %v2000_v29, %v2000_v29 }
 0x32f   : > { %v2048_v13 = vunpack.c.l.b16 %v2016_v63 }
 0x331   : > { %v2064_v15 = vpack.c.b16 %v2048_v13, %v2048_v13  ;;  %v2467_v13 = vrot.slane %v2465_v37, 1 }
 0x333   : > { %v2111_v28 = vshrl.u32 %v2064_v15, 16  ;;  %v2114_v8 = vshll.u32 %v2064_v15, 16  ;;  %v1995_v15 = vmax.f32 %v5521_v19, 0.0  ;;  %v2489_v19 = vshll.u32 %v5441_v48, 16 }
 0x335   : > { %v2113_v0 = vrot.slane %v2111_v28, 7  ;;  %v2463_v28 = vshrl.u32 %v5417_v44, 16 }
 0x337   : > { %v2116_v40 = vor.u32 %v2114_v8, %v2113_v0  ;;  %v2483_v0 = vshll.u32 %v5444_v3, 16  ;;  %v5636_v8 = vor.u32 %v2467_v13, %v2463_v28 }
 0x339   : > { %v5600_v57 = vsel %vm3799_vm2, %v2016_v63, %v2116_v40  ;;  %v2011_v40 = vpack.c.bf16 %v1995_v15, %v1995_v15 }
 0x33a   : > { %v2417_v52 = vshll.u32 %v5600_v57, 16  ;;  %v5603_v38 = vpop.f32.mrf.mxu1  ;;  %v2415_v58 = vshrl.u32 %v5600_v57, 16 }
 0x33c   : > { %v2419_v26 = vrot.slane %v2417_v52, 1 }
 0x33e   : > { %v5606_v18 = vor.u32 %v2419_v26, %v2415_v58  ;;  %v2485_v58 = vrot.slane %v2483_v0, 1 }
 0x340   : > { %2453 = vrot.lane.b32.xlu0 %v5606_v18, %s3686_s24 }
 0x342   : > { %v1972_v34 = vpop.f32.mrf.mxu1 }
 0x343   : > { %v2002_v14 = vmax.f32 %v1972_v34, 0.0  ;;  %v2043_v34 = vunpack.c.l.b16 %v2011_v40 }
 0x345   : > { %v2018_v41 = vpack.c.bf16 %v2002_v14, %v2002_v14 }
 0x347   : > { %v2050_v7 = vunpack.c.l.b16 %v2018_v41 }
 0x349   : > { %v2066_v56 = vpack.c.b16 %v2050_v7, %v2050_v7 }
 0x34b   : > { %v2125_v22 = vshrl.u32 %v2066_v56, 16  ;;  %v2128_v16 = vshll.u32 %v2066_v56, 16 }
 0x34d   : > { %v2127_v51 = vrot.slane %v2125_v22, 7 }
 0x34f   : > { %v2130_v11 = vor.u32 %v2128_v16, %v2127_v51  ;;  %v2059_v51 = vpack.c.b16 %v2043_v34, %v2043_v34 }
 0x351   : > { %v5612_v43 = vsel %vm3799_vm2, %v2018_v41, %v2130_v11  ;;  %v2481_v41 = vshrl.u32 %v5444_v3, 16  ;;  %v5644_v11 = vpop.permute.xlu2 %2390  ;;  %v2079_v37 = vshll.u32 %v2059_v51, 16 }
 0x352   : > { %v2424_v49 = vshll.u32 %v5612_v43, 16  ;;  %v2422_v6 = vshrl.u32 %v5612_v43, 16 }
 0x353   : > { %v1975_v27 = vpop.f32.mrf.mxu1  ;;  %v5642_v22 = vor.u32 %v2485_v58, %v2481_v41 }
 0x354   : > { %v2426_v2 = vrot.slane %v2424_v49, 1  ;;  %v2003_v14 = vmax.f32 %v1975_v27, 0.0 }
 0x355   : > { %6803 = vst [vmem:[#allocation100_spill] sm:$0xff] %v5642_v22 }
 0x356   : > { %v5616_v1 = vor.u32 %v2426_v2, %v2422_v6  ;;  %v2019_v16 = vpack.c.bf16 %v2003_v14, %v2003_v14  ;;  %v1297_v6 = vmax.f32 %v5378_v32, 0.0  ;;  %v2491_v2 = vrot.slane %v2489_v19, 1 }
 0x357   : > { %v2471_v14 = vshll.u32 %v5411_v12, 16 }
 0x358   : > { %2455 = vrot.lane.b32.xlu1 %v5616_v1, %s3686_s24 }
 0x35b   : > { %v1977_v4 = vpop.f32.mrf.mxu1 }
 0x35c   : > { %v2004_v61 = vmax.f32 %v1977_v4, 0.0  ;;  %v2076_v4 = vshrl.u32 %v2059_v51, 16 }
 0x35e   : > { %v2020_v54 = vpack.c.bf16 %v2004_v61, %v2004_v61  ;;  %v2051_v61 = vunpack.c.l.b16 %v2019_v16 }
 0x360   : > { %v2052_v50 = vunpack.c.l.b16 %v2020_v54 }
 0x362   : > { %v2068_v42 = vpack.c.b16 %v2052_v50, %v2052_v50 }
 0x364   : > { %v2139_v47 = vshrl.u32 %v2068_v42, 16  ;;  %v2142_v33 = vshll.u32 %v2068_v42, 16 }
 0x366   : > { %v2141_v39 = vrot.slane %v2139_v47, 7  ;;  %v1313_v47 = vpack.c.bf16 %v1297_v6, %v1297_v6 }
 0x368   : > { %v2144_v31 = vor.u32 %v2142_v33, %v2141_v39  ;;  %v1299_v39 = vmax.f32 %v5404_v30, 0.0  ;;  %v2243_v28 = vunpack.c.l.b16 %v1313_v47 }
 0x36a   : > { %v5622_v35 = vsel %vm3799_vm2, %v2020_v54, %v2144_v31  ;;  %v2487_v54 = vshrl.u32 %v5441_v48, 16  ;;  %v1315_v0 = vpack.c.bf16 %v1299_v39, %v1299_v39 }
 0x36b   : > { %v2431_v20 = vshll.u32 %v5622_v35, 16  ;;  %v2429_v21 = vshrl.u32 %v5622_v35, 16 }
 0x36c   : > { %v5651_v31 = vor.u32 %v2491_v2, %v2487_v54  ;;  %v2245_v19 = vunpack.c.l.b16 %v1315_v0  ;;  %v2469_v54 = vshrl.u32 %v5411_v12, 16 }
 0x36d   : > { %v2433_v46 = vrot.slane %v2431_v20, 1  ;;  %v2078_v20 = vrot.slane %v2076_v4, 7 }
 0x36f   : > { %v5627_v29 = vor.u32 %v2433_v46, %v2429_v21  ;;  %v2067_v21 = vpack.c.b16 %v2051_v61, %v2051_v61  ;;  %v2397_v46 = vpop.permute.xlu2 %2396  ;;  %v2261_v61 = vpack.c.b16 %v2245_v19, %v2245_v19  ;;  %v3659_v19 = vld [vmem:[%s3744_s20 + $0x20] sm:$0xf] }
 0x371   : > { %2457 = vrot.lane.b32.xlu2 %v5627_v29, %s3686_s24  ;;  %v2132_v58 = vshrl.u32 %v2067_v21, 16  ;;  %v2135_v6 = vshll.u32 %v2067_v21, 16 }
 0x372   : > { %v5631_v63 = vpop.f32.mrf.mxu1 }
 0x379   : > { %2505 = vrot.lane.b32.xlu2 %v5636_v8, %s3690_s8 }
 0x37a   : > { %v1982_v52 = vpop.f32.mrf.mxu1 }
 0x37b   : > { %v2006_v26 = vmax.f32 %v1982_v52, 0.0  ;;  %v2081_v52 = vor.u32 %v2079_v37, %v2078_v20  ;;  %v2005_v37 = vmax.f32 %v5631_v63, 0.0 }
 0x37d   : > { %v2022_v7 = vpack.c.bf16 %v2006_v26, %v2006_v26  ;;  %v5674_v51 = vsel %vm3799_vm2, %v2011_v40, %v2081_v52  ;;  %v2308_v40 = vshrl.u32 %v2261_v61, 16 }
 0x37f   : > { %v2054_v56 = vunpack.c.l.b16 %v2022_v7  ;;  %v2310_v52 = vrot.slane %v2308_v40, 7 }
 0x381   : > { %v2070_v49 = vpack.c.b16 %v2054_v56, %v2054_v56  ;;  %2511 = vrot.lane.b32.xlu2 %v5642_v22, %s3690_s8  ;;  %v2134_v56 = vrot.slane %v2132_v58, 7 }
 0x383   : > { %v2153_v27 = vshrl.u32 %v2070_v49, 16  ;;  %v2156_v42 = vshll.u32 %v2070_v49, 16  ;;  %v2473_v49 = vrot.slane %v2471_v14, 1 }
 0x385   : > { %v2155_v50 = vrot.slane %v2153_v27, 7  ;;  %v5679_v39 = vor.u32 %v2473_v49, %v2469_v54  ;;  %v2477_v54 = vshll.u32 %v5402_v53, 16 }
 0x387   : > { %v2158_v33 = vor.u32 %v2156_v42, %v2155_v50  ;;  %v2137_v50 = vor.u32 %v2135_v6, %v2134_v56  ;;  %v5698_v56 = vsel %vm410_vm3, %v1315_v0, %v2310_v52 }
 0x389   : > { %v5655_v32 = vsel %vm3799_vm2, %v2022_v7, %v2158_v33  ;;  %2513 = vrot.lane.b32.xlu2 %v5651_v31, %s3690_s8  ;;  %v2259_v7 = vpack.c.b16 %v2243_v28, %v2243_v28  ;;  %v5685_v21 = vsel %vm3799_vm2, %v2019_v16, %v2137_v50 }
 0x38a   : > { %v2438_v13 = vshll.u32 %v5655_v32, 16  ;;  %v5660_v15 = vpop.f32.mrf.mxu1  ;;  %v5664_v30 = vsel %vm930_vm6, %v5655_v32, %v2397_v46  ;;  %v2436_v26 = vshrl.u32 %v5655_v32, 16 }
 0x38b   : > { %v2300_v4 = vshrl.u32 %v2259_v7, 16  ;;  %v2021_v7 = vpack.c.bf16 %v2005_v37, %v2005_v37  ;;  %v2007_v40 = vmax.f32 %v5660_v15, 0.0  ;;  %v3660_v15 = vld [vmem:[%s3744_s20 + $0x30] sm:$0xf] }
 0x38c   : > { %v2440_v34 = vrot.slane %v2438_v13, 1 }
 0x38d   : > { %v2302_v20 = vrot.slane %v2300_v4, 7  ;;  %v2053_v6 = vunpack.c.l.b16 %v2021_v7  ;;  %v2023_v52 = vpack.c.bf16 %v2007_v40, %v2007_v40  ;;  %v2671_v40 = vshll.u32 %v5698_v56, 16 }
 0x38e   : > { %v5668_v41 = vor.u32 %v2440_v34, %v2436_v26  ;;  %v2495_v34 = vshll.u32 %v5461_v17, 16 }
 0x38f   : > { %v5691_v28 = vsel %vm410_vm3, %v1313_v47, %v2302_v20 }
 0x390   : > { %2459 = vrot.lane.b32.xlu0 %v5668_v41, %s3686_s24  ;;  %6804 = vst [vmem:[#allocation104_spill] sm:$0xff] %v5691_v28  ;;  %v2665_v14 = vshll.u32 %v5691_v28, 16  ;;  %v2497_v47 = vrot.slane %v2495_v34, 1  ;;  %v2663_v0 = vshrl.u32 %v5691_v28, 16  ;;  %v2055_v34 = vunpack.c.l.b16 %v2023_v52 }
 0x391   : > { %2527 = vrot.lane.b32.xlu2 %v5674_v51, %s3691_s9 }
 0x392   : > { %v1987_v2 = vpop.f32.mrf.mxu1 }
 0x393   : > { %v2008_v27 = vmax.f32 %v1987_v2, 0.0  ;;  %v2667_v2 = vrot.slane %v2665_v14, 1 }
 0x395   : > { %v2024_v42 = vpack.c.bf16 %v2008_v27, %v2008_v27  ;;  %v2493_v27 = vshrl.u32 %v5461_v17, 16  ;;  %v5713_v20 = vor.u32 %v2667_v2, %v2663_v0 }
 0x397   : > { %v2056_v33 = vunpack.c.l.b16 %v2024_v42  ;;  %v2498_v50 = vor.u32 %v2497_v47, %v2493_v27  ;;  %6805 = vst [vmem:[#allocation123_spill] sm:$0xff] %v5713_v20  ;;  %v2501_v47 = vshll.u32 %v5490_v24, 16  ;;  %v3661_v27 = vld [vmem:[%s3744_s20 + $0x28] sm:$0xf] }
 0x398   : > { %2507 = vrot.lane.b32.xlu0 %v5679_v39, %s3690_s8 }
 0x399   : > { %v2072_v46 = vpack.c.b16 %v2056_v33, %v2056_v33  ;;  %2535 = vrot.lane.b32.xlu2 %v5685_v21, %s3691_s9  ;;  %v2069_v33 = vpack.c.b16 %v2053_v6, %v2053_v6 }
 0x39b   : > { %v2167_v13 = vshrl.u32 %v2072_v46, 16  ;;  %v2170_v26 = vshll.u32 %v2072_v46, 16  ;;  %v2479_v46 = vrot.slane %v2477_v54, 1  ;;  %v2146_v37 = vshrl.u32 %v2069_v33, 16 }
 0x39c   : > { %v2149_v14 = vshll.u32 %v2069_v33, 16  ;;  %v2596_v54 = vshrl.u32 %v5685_v21, 16 }
 0x39d   : > { %v2169_v58 = vrot.slane %v2167_v13, 7  ;;  %v2475_v13 = vshrl.u32 %v5402_v53, 16 }
 0x39f   : > { %v2172_v16 = vor.u32 %v2170_v26, %v2169_v58  ;;  %v5722_v58 = vor.u32 %v2479_v46, %v2475_v13  ;;  %v2148_v26 = vrot.slane %v2146_v37, 7 }
 0x3a0   : > { %3227 = vrot.lane.b32.xlu0 %v3659_v19, %s3683_s21  ;;  %v2071_v19 = vpack.c.b16 %v2055_v34, %v2055_v34  ;;  %v5757_v34 = vpop.permute.xlu2 %2451 }
 0x3a1   : > { %v5702_v63 = vsel %vm3799_vm2, %v2024_v42, %v2172_v16  ;;  %2561 = vrot.lane.b32.xlu2 %v5698_v56, %s3692_s10  ;;  %v2151_v16 = vor.u32 %v2149_v14, %v2148_v26  ;;  %v1301_v26 = vmax.f32 %v5457_v59, 0.0  ;;  %v2669_v14 = vshrl.u32 %v5698_v56, 16  ;;  %v3662_v59 = vld [vmem:[%s3744_s20 + $0x38] sm:$0xf] }
 0x3a2   : > { %v2445_v49 = vshll.u32 %v5702_v63, 16  ;;  %v2443_v4 = vshrl.u32 %v5702_v63, 16  ;;  %v2160_v2 = vshrl.u32 %v2071_v19, 16  ;;  %v2163_v33 = vshll.u32 %v2071_v19, 16 }
 0x3a3   : > { %v5734_v6 = vsel %vm3799_vm2, %v2021_v7, %v2151_v16  ;;  %v5744_v7 = vpop.permute.xlu1 %2388  ;;  %v1284_v16 = vpop.f32.mrf.mxu0 }
 0x3a4   : > { %v2447_v61 = vrot.slane %v2445_v49, 1  ;;  %v2598_v49 = vshll.u32 %v5685_v21, 16  ;;  %v2162_v0 = vrot.slane %v2160_v2, 7  ;;  %v1990_v2 = vpop.f32.mrf.mxu1 }
 0x3a6   : > { %v5711_v42 = vor.u32 %v2447_v61, %v2443_v4  ;;  %v2600_v4 = vrot.slane %v2598_v49, 1  ;;  %v2499_v61 = vshrl.u32 %v5490_v24, 16  ;;  %v2165_v13 = vor.u32 %v2163_v33, %v2162_v0 }
 0x3a8   : > { %2515 = vrot.lane.b32.xlu0 %v2498_v50, %s3690_s8  ;;  %2461 = vrot.lane.b32.xlu1 %v5711_v42, %s3686_s24  ;;  %v5747_v46 = vor.u32 %v2600_v4, %v2596_v54  ;;  %s3701_s24 = smov 96  }
 0x3a9   : > { %2695 = vrot.lane.b32.xlu2 %v5713_v20, %s3693_s11 }
 0x3aa   : > { %6806 = vst [vmem:[#allocation111_spill] sm:$0xff] %v5747_v46 }
 0x3b0   : > { %3231 = vrot.lane.b32.xlu0 %v3660_v15, %s3683_s21  ;;  %2509 = vrot.lane.b32.xlu1 %v5722_v58, %s3690_s8  ;;  %v5761_v15 = vsel %vm3799_vm2, %v2023_v52, %v2165_v13 }
 0x3b1   : > { %2721 = vrot.lane.b32.xlu2 %v5655_v32, %s3694_s12  ;;  %v2503_v32 = vrot.slane %v2501_v47, 1  ;;  %v1317_v47 = vpack.c.bf16 %v1301_v26, %v1301_v26  ;;  %v2612_v49 = vshll.u32 %v5761_v15, 16  ;;  %v2610_v33 = vshrl.u32 %v5761_v15, 16 }
 0x3b3   : > { %v5749_v37 = vor.u32 %v2503_v32, %v2499_v61  ;;  %v2247_v52 = vunpack.c.l.b16 %v1317_v47  ;;  %v2614_v61 = vrot.slane %v2612_v49, 1 }
 0x3b5   : > { %v2263_v13 = vpack.c.b16 %v2247_v52, %v2247_v52  ;;  %v5778_v26 = vor.u32 %v2614_v61, %v2610_v33 }
 0x3b8   : > { %2537 = vrot.lane.b32.xlu0 %v5734_v6, %s3691_s9  ;;  %3229 = vrot.lane.b32.xlu1 %v3661_v27, %s3683_s21  ;;  %v1303_v27 = vmax.f32 %v1284_v16, 0.0 }
 0x3b9   : > { %2759 = vrot.lane.b32.xlu2 %v5627_v29, %s3695_s13  ;;  %v2673_v29 = vrot.slane %v2671_v40, 1  ;;  %v2605_v40 = vshll.u32 %v5734_v6, 16 }
 0x3ba   : > { %v1319_v0 = vpack.c.bf16 %v1303_v27, %v1303_v27 }
 0x3bb   : > { %v5764_v19 = vor.u32 %v2673_v29, %v2669_v14  ;;  %v2387_v29 = vpop.permute.xlu0 %2386  ;;  %v2607_v27 = vrot.slane %v2605_v40, 1  ;;  %v1286_v40 = vpop.f32.mrf.mxu0 }
 0x3bc   : > { %v2249_v14 = vunpack.c.l.b16 %v1319_v0  ;;  %v2846_v49 = vsel %vm930_vm6, %v5550_v10, %v2387_v29 }
 0x3c0   : > { %2631 = vrot.lane.b32.xlu0 %v5747_v46, %s3696_s14  ;;  %2517 = vrot.lane.b32.xlu1 %v5749_v37, %s3690_s8 }
 0x3c1   : > { %2783 = vrot.lane.b32.xlu2 %v2498_v50, %s3697_s18  ;;  %v2395_v50 = vpop.permute.xlu1 %2394 }
 0x3c2   : > { %v2854_v32 = vsel %vm930_vm6, %v5622_v35, %v2395_v50  ;;  %v2316_v50 = vshrl.u32 %v2263_v13, 16 }
 0x3c3   : > { %v2393_v13 = vpop.permute.xlu0 %2392 }
 0x3c4   : > { %v2318_v46 = vrot.slane %v2316_v50, 7  ;;  %v2852_v29 = vsel %vm930_vm6, %v5612_v43, %v2393_v13 }
 0x3c8   : > { %2697 = vrot.lane.b32.xlu0 %v5764_v19, %s3693_s11  ;;  %3233 = vrot.lane.b32.xlu1 %v3662_v59, %s3683_s21 }
 0x3c9   : > { %2811 = vrot.lane.b32.xlu2 %v5698_v56, %s3698_s19  ;;  %v2450_v16 = vpop.permute.xlu1 %2449  ;;  %v1992_v56 = vpop.f32.mrf.mxu1 }
 0x3ca   : > { %v2860_v59 = vsel %vm994_vm7, %v2846_v49, %v2450_v16  ;;  %v5805_v49 = vsel %vm410_vm3, %v1317_v47, %v2318_v46 }
 0x3cb   : > { %v2458_v4 = vpop.permute.xlu2 %2457 }
 0x3cc   : > { %v2868_v54 = vsel %vm994_vm7, %v2854_v32, %v2458_v4  ;;  %v2265_v32 = vpack.c.b16 %v2249_v14, %v2249_v14  ;;  %v2010_v4 = vmax.f32 %v1992_v56, 0.0  ;;  %v2009_v14 = vmax.f32 %v1990_v2, 0.0 }
 0x3ce   : > { %v2026_v22 = vpack.c.bf16 %v2010_v4, %v2010_v4 }
 0x3d0   : > { %2736 = vrot.lane.b32.xlu0 %v5441_v48, %s3699_s22  ;;  %2559 = vrot.lane.b32.xlu1 %v5691_v28, %s3692_s10  ;;  %v2603_v48 = vshrl.u32 %v5734_v6, 16  ;;  %v2324_v28 = vshrl.u32 %v2265_v32, 16  ;;  %v2058_v50 = vunpack.c.l.b16 %v2026_v22  ;;  %v2677_v32 = vshll.u32 %v5805_v49, 16 }
 0x3d1   : > { %2827 = vrot.lane.b32.xlu2 %v5778_v26, %s3700_s23  ;;  %v2456_v20 = vpop.permute.xlu1 %2455 }
 0x3d2   : > { %v5793_v33 = vor.u32 %v2607_v27, %v2603_v48  ;;  %v2866_v16 = vsel %vm994_vm7, %v2852_v29, %v2456_v20  ;;  %v2326_v27 = vrot.slane %v2324_v28, 7  ;;  %v2074_v48 = vpack.c.b16 %v2058_v50, %v2058_v50 }
 0x3d3   : > { %v2506_v52 = vpop.permute.xlu2 %2505  ;;  %v2679_v47 = vrot.slane %v2677_v32, 1  ;;  %v2675_v29 = vshrl.u32 %v5805_v49, 16 }
 0x3d4   : > { %v5791_v61 = vsel %vm1060_vm10, %v2860_v59, %v2506_v52  ;;  %v2025_v52 = vpack.c.bf16 %v2009_v14, %v2009_v14  ;;  %v5814_v20 = vsel %vm410_vm3, %v1319_v0, %v2326_v27  ;;  %v2184_v0 = vshll.u32 %v2074_v48, 16 }
 0x3d5   : > { %v2680_v14 = vor.u32 %v2679_v47, %v2675_v29 }
 0x3d6   : > { %v2057_v28 = vunpack.c.l.b16 %v2025_v52 }
 0x3d8   : > { %2761 = vrot.lane.b32.xlu0 %v5668_v41, %s3695_s13  ;;  %2633 = vrot.lane.b32.xlu1 %v5793_v33, %s3696_s14  ;;  %v1304_v41 = vmax.f32 %v1286_v40, 0.0  ;;  %v2181_v40 = vshrl.u32 %v2074_v48, 16 }
 0x3d9   : > { %2539 = vrot.lane.b32.xlu2 %v5761_v15, %s3691_s9 }
 0x3da   : > { %v1320_v4 = vpack.c.bf16 %v1304_v41, %v1304_v41 }
 0x3db   : > { %v2512_v56 = vpop.permute.xlu2 %2511 }
 0x3dc   : > { %v2880_v59 = vsel %vm1060_vm10, %v2866_v16, %v2512_v56  ;;  %v2250_v2 = vunpack.c.l.b16 %v1320_v4 }
 0x3de   : > { %v2266_v16 = vpack.c.b16 %v2250_v2, %v2250_v2 }
 0x3e0   : > { %2797 = vrot.lane.b32.xlu0 %v5734_v6, %s3701_s24  ;;  %2719 = vrot.lane.b32.xlu1 %v5622_v35, %s3694_s12  ;;  %v2073_v6 = vpack.c.b16 %v2057_v28, %v2057_v28  ;;  %v2183_v35 = vrot.slane %v2181_v40, 7  ;;  %v2328_v41 = vshrl.u32 %v2266_v16, 16  ;;  %v2683_v16 = vshll.u32 %v5814_v20, 16 }
 0x3e1   : > { %2565 = vrot.lane.b32.xlu2 %v5814_v20, %s3692_s10 }
 0x3e2   : > { %v2174_v56 = vshrl.u32 %v2073_v6, 16  ;;  %v2330_v28 = vrot.slane %v2328_v41, 7  ;;  %v2177_v48 = vshll.u32 %v2073_v6, 16  ;;  %v2681_v41 = vshrl.u32 %v5814_v20, 16 }
 0x3e3   : > { %v2514_v46 = vpop.permute.xlu2 %2513 }
 0x3e4   : > { %v5819_v13 = vsel %vm1060_vm10, %v2868_v54, %v2514_v46  ;;  %v2186_v54 = vor.u32 %v2184_v0, %v2183_v35  ;;  %v2176_v32 = vrot.slane %v2174_v56, 7  ;;  %v5838_v46 = vpop.permute.xlu0 %2398  ;;  %v5841_v40 = vsel %vm410_vm3, %v1320_v4, %v2330_v28 }
 0x3e5   : > { %v2767_v6 = vshrl.u32 %v5841_v40, 16 }
 0x3e6   : > { %v2179_v47 = vor.u32 %v2177_v48, %v2176_v32  ;;  %v3251_v48 = vld [vmem:[%s6439_s3] sm:$0x3] }
 0x3e8   : > { %2813 = vrot.lane.b32.xlu0 %v5805_v49, %s3698_s19  ;;  %2738 = vrot.lane.b32.xlu1 %v5461_v17, %s3699_s22  ;;  %v2218_v17 = vsel %vm3799_vm2, %v2026_v22, %v2186_v54 }
 0x3e9   : > { %2699 = vrot.lane.b32.xlu2 %v2680_v14, %s3693_s11 }
 0x3eb   : > { %v2528_v27 = vpop.permute.xlu2 %2527 }
 0x3ec   : > { %v5829_v50 = vsel %vm1124_vm12, %v5791_v61, %v2528_v27  ;;  %v5857_v22 = vpop.permute.xlu0 %2453 }
 0x3f0   : > { %2839 = vrot.lane.b32.xlu0 %v5764_v19, %s3702_s25  ;;  %2781 = vrot.lane.b32.xlu1 %v5651_v31, %s3697_s18  ;;  %v2769_v19 = vshll.u32 %v5841_v40, 16  ;;  %v5849_v31 = vsel %vm3799_vm2, %v2025_v52, %v2179_v47 }
 0x3f1   : > { %2725 = vrot.lane.b32.xlu2 %v2218_v17, %s3694_s12  ;;  %v2619_v52 = vshll.u32 %v5849_v31, 16  ;;  %v2617_v54 = vshrl.u32 %v5849_v31, 16 }
 0x3f2   : > { %v2771_v4 = vrot.slane %v2769_v19, 1  ;;  %v2747_v19 = vshll.u32 %v2218_v17, 16 }
 0x3f3   : > { %v2536_v2 = vpop.permute.xlu2 %2535  ;;  %v2621_v0 = vrot.slane %v2619_v52, 1 }
 0x3f4   : > { %v5844_v29 = vsel %vm1124_vm12, %v2880_v59, %v2536_v2  ;;  %v2772_v35 = vor.u32 %v2771_v4, %v2767_v6  ;;  %v5895_v2 = vsel %vm1236_vm4, %v3251_v48, 0  ;;  %v3663_v6 = vld [vmem:[%s3744_s20 + $0xc] sm:$0xf]  ;;  %vm3005_vm4 = vcmask 719872  }
 0x3f5   : > { %3630 = vmatpush.bf16.msra.mxu3 %v5895_v2 }
 0x3f8   : > { %2799 = vrot.lane.b32.xlu1 %v5761_v15, %s3701_s24  ;;  %2541 = vrot.lane.b32.xlu0 %v5849_v31, %s3691_s9 }
 0x3f9   : > { %2763 = vrot.lane.b32.xlu2 %v5711_v42, %s3695_s13  ;;  %v2685_v42 = vrot.slane %v2683_v16, 1  ;;  %v2749_v16 = vrot.slane %v2747_v19, 1 }
 0x3fb   : > { %v5859_v59 = vpop.permute.xlu2 %2561  ;;  %v5875_v32 = vor.u32 %v2685_v42, %v2681_v41 }
 0x400   : > { %2825 = vrot.lane.b32.xlu1 %v5793_v33, %s3700_s23  ;;  %2635 = vrot.lane.b32.xlu0 %v5778_v26, %s3696_s14  ;;  %v2622_v33 = vor.u32 %v2621_v0, %v2617_v54  ;;  %v2848_v26 = vsel %vm930_vm6, %v5588_v60, %v5744_v7  ;;  %v2001_v7 = vmax.f32 %v5603_v38, 0.0  ;;  %v1293_v0 = vmax.f32 %v5295_v62, 0.0 }
 0x401   : > { %2787 = vrot.lane.b32.xlu2 %v2772_v35, %s3697_s18 }
 0x402   : > { %v2460_v15 = vpop.permute.xlu0 %2459  ;;  %v2017_v4 = vpack.c.bf16 %v2001_v7, %v2001_v7  ;;  %v1309_v7 = vpack.c.bf16 %v1293_v0, %v1293_v0 }
 0x403   : > { %v2870_v56 = vsel %vm994_vm7, %v5664_v30, %v2460_v15  ;;  %v5871_v27 = vpop.permute.xlu2 %2695  ;;  %v2862_v30 = vsel %vm994_vm7, %v2848_v26, %v5757_v34  ;;  %v1997_v34 = vmax.f32 %v5553_v45, 0.0  ;;  %v2745_v15 = vshrl.u32 %v2218_v17, 16  ;;  %v6808_v17 = vld [vmem:[#allocation114_spill] sm:$0xff] }
 0x404   : > { %v2049_v42 = vunpack.c.l.b16 %v2017_v4  ;;  %v2858_v26 = vsel %vm930_vm6, %v5702_v63, %v5838_v46  ;;  %v2850_v46 = vsel %vm930_vm6, %v5600_v57, %v5644_v11 }
 0x405   : > { %v2013_v35 = vpack.c.bf16 %v1997_v34, %v1997_v34  ;;  %v2750_v45 = vor.u32 %v2749_v16, %v2745_v15  ;;  %v2239_v16 = vunpack.c.l.b16 %v1309_v7  ;;  %v2864_v0 = vsel %vm994_vm7, %v2850_v46, %v5857_v22 }
 0x407   : > { %v2045_v41 = vunpack.c.l.b16 %v2013_v35 }
 0x408   : > { %2841 = vrot.lane.b32.xlu1 %v2680_v14, %s3702_s25  ;;  %2701 = vrot.lane.b32.xlu0 %v5875_v32, %s3693_s11 }
 0x409   : > { %2829 = vrot.lane.b32.xlu2 %v2622_v33, %s3700_s23  ;;  %v2061_v19 = vpack.c.b16 %v2045_v41, %v2045_v41 }
 0x40a   : > { %v2508_v28 = vpop.permute.xlu0 %2507 }
 0x40b   : > { %v5890_v14 = vsel %vm1060_vm10, %v2862_v30, %v2508_v28  ;;  %v5892_v47 = vpop.permute.xlu2 %2721  ;;  %v1289_v28 = vmax.f32 %v6808_v17, 0.0 }
 0x40c   : > { %6807 = vst [vmem:[#allocation42_spill] sm:$0xff] %v5890_v14 }
 0x410   : > { %2563 = vrot.lane.b32.xlu1 %v5805_v49, %s3692_s10  ;;  %2740 = vrot.lane.b32.xlu0 %v5490_v24, %s3699_s22  ;;  %v2065_v49 = vpack.c.b16 %v2049_v42, %v2049_v42  ;;  %v3664_v24 = vld [vmem:[%s3744_s20] sm:$0xf]  ;;  %v2090_v42 = vshrl.u32 %v2061_v19, 16 }
 0x411   : > { %3237 = vrot.lane.b32.xlu2 %v3663_v6, %s3683_s21  ;;  %v1305_v6 = vpack.c.bf16 %v1289_v28, %v1289_v28  ;;  %v2093_v28 = vshll.u32 %v2061_v19, 16 }
 0x412   : > { %v5906_v52 = vpop.permute.xlu0 %3227  ;;  %v2118_v34 = vshrl.u32 %v2065_v49, 16  ;;  %v2092_v11 = vrot.slane %v2090_v42, 7 }
 0x413   : > { %v5908_v38 = vpop.permute.xlu2 %2759 }
 0x414   : > { %v2120_v15 = vrot.slane %v2118_v34, 7  ;;  %v2095_v14 = vor.u32 %v2093_v28, %v2092_v11 }
 0x418   : > { %2637 = vrot.lane.b32.xlu1 %v2622_v33, %s3696_s14  ;;  %2765 = vrot.lane.b32.xlu0 %v2750_v45, %s3695_s13  ;;  %v2121_v45 = vshll.u32 %v2065_v49, 16 }
 0x419   : > { %3219 = vrot.lane.b32.xlu2 %v3664_v24, %s3683_s21 }
 0x41a   : > { %v2516_v54 = vpop.permute.xlu0 %2515  ;;  %v2462_v30 = vpop.permute.xlu1 %2461  ;;  %v2123_v17 = vor.u32 %v2121_v45, %v2120_v15 }
 0x41b   : > { %v5920_v62 = vsel %vm1060_vm10, %v2870_v56, %v2516_v54  ;;  %v2872_v48 = vsel %vm994_vm7, %v2858_v26, %v2462_v30  ;;  %v5923_v33 = vpop.permute.xlu2 %2783  ;;  %v3665_v56 = vld [vmem:[%s3744_s20 + $0x2c] sm:$0xf]  ;;  %v2235_v54 = vunpack.c.l.b16 %v1305_v6  ;;  %v1295_v30 = vmax.f32 %v5335_v36, 0.0 }
 0x41c   : > { %v5950_v22 = vsel %vm3799_vm2, %v2017_v4, %v2123_v17  ;;  %v5963_v4 = vsel %vm3799_vm2, %v2013_v35, %v2095_v14  ;;  %vm3022_vm7 = vcmask 785408  }
 0x41d   : > { %v2251_v34 = vpack.c.b16 %v2235_v54, %v2235_v54 }
 0x420   : > { %2723 = vrot.lane.b32.xlu1 %v5702_v63, %s3694_s12  ;;  %2801 = vrot.lane.b32.xlu0 %v5849_v31, %s3701_s24  ;;  %v2255_v31 = vpack.c.b16 %v2239_v16, %v2239_v16  ;;  %v3256_v16 = vunpack.c.l.b16 %v5906_v52 }
 0x421   : > { %3245 = vrot.lane.b32.xlu2 %v3665_v56, %s3683_s21  ;;  %v1311_v56 = vpack.c.bf16 %v1295_v30, %v1295_v30 }
 0x422   : > { %v5936_v41 = vpop.permute.xlu0 %3231  ;;  %v2510_v24 = vpop.permute.xlu1 %2509  ;;  %v2284_v49 = vshrl.u32 %v2255_v31, 16  ;;  %v3666_v31 = vld [vmem:[%s3744_s20 + $0x14] sm:$0xf] }
 0x423   : > { %v5939_v63 = vsel %vm1060_vm10, %v2864_v0, %v2510_v24  ;;  %v5941_v26 = vpop.permute.xlu2 %2811  ;;  %v2241_v45 = vunpack.c.l.b16 %v1311_v56  ;;  %v2577_v0 = vshll.u32 %v5963_v4, 16  ;;  %v1999_v24 = vmax.f32 %v5591_v55, 0.0 }
 0x424   : > { %v2286_v46 = vrot.slane %v2284_v49, 7 }
 0x425   : > { %v5979_v35 = vpack.c.bf16 %v1999_v24, %v1999_v24 }
 0x426   : > { %v5973_v30 = vsel %vm410_vm3, %v1309_v7, %v2286_v46  ;;  %v2575_v7 = vshrl.u32 %v5963_v4, 16 }
 0x428   : > { %2742 = vrot.lane.b32.xlu1 %v5841_v40, %s3699_s22  ;;  %2843 = vrot.lane.b32.xlu0 %v5875_v32, %s3702_s25  ;;  %v2268_v32 = vshrl.u32 %v2251_v34, 16 }
 0x429   : > { %2533 = vrot.lane.b32.xlu2 %v5950_v22, %s3691_s9 }
 0x42a   : > { %v2538_v36 = vpop.permute.xlu0 %2537  ;;  %v3230_v19 = vpop.permute.xlu1 %3229  ;;  %v2270_v54 = vrot.slane %v2268_v32, 7 }
 0x42b   : > { %v5957_v42 = vsel %vm1124_vm12, %v5819_v13, %v2538_v36  ;;  %v3257_v40 = vunpack.c.l.b16 %v3230_v19  ;;  %v5959_v15 = vpop.permute.xlu2 %2827  ;;  %v2257_v13 = vpack.c.b16 %v2241_v45, %v2241_v45  ;;  %v1291_v45 = vmax.f32 %v5267_v5, 0.0  ;;  %v3613_v5 = vld [vmem:[%s6438_s2 + $0x38] sm:$0xff] }
 0x42c   : > { %v2333_v28 = vsel %vm410_vm3, %v1305_v6, %v2270_v54  ;;  %3615 = vmatpush.bf16.msra.mxu2 %v3613_v5  ;;  %3174 = vmatpush.bf16.msrb.mxu0 %v3613_v5 }
 0x42d   : > { %v3274_v52 = vpack.c.b16 %v3257_v40, %v3256_v16  ;;  %v2292_v34 = vshrl.u32 %v2257_v13, 16  ;;  %v2641_v49 = vshll.u32 %v2333_v28, 16  ;;  %v2047_v16 = vunpack.c.l.b16 %v5979_v35  ;;  %v3667_v40 = vld [vmem:[%s3744_s20 + $0x8] sm:$0xf]  ;;  %3614 = vmatpush.bf16.msrb.mxu1 %v3613_v5 }
 0x42e   : > { %v2639_v54 = vshrl.u32 %v2333_v28, 16 }
 0x42f   : > { %3590 = vmatmul.msk.bf16.vlgmr.msra.gmra.mxu3 %vm884_vm5, %v3274_v52  ;;  %v2294_v19 = vrot.slane %v2292_v34, 7  ;;  %v2643_v46 = vrot.slane %v2641_v49, 1  ;;  %v2063_v52 = vpack.c.b16 %v2047_v16, %v2047_v16  ;;  %v3668_v34 = vld [vmem:[%s3744_s20 + $0x4] sm:$0xf] }
 0x430   : > { %2785 = vrot.lane.b32.xlu1 %v5749_v37, %s3697_s18  ;;  %3239 = vrot.lane.b32.xlu0 %v3666_v31, %s3683_s21  ;;  %v2579_v37 = vrot.slane %v2577_v0, 1 }
 0x431   : > { %2555 = vrot.lane.b32.xlu2 %v5973_v30, %s3692_s10 }
 0x432   : > { %v5977_v14 = vpop.permute.xlu0 %2631  ;;  %v2518_v55 = vpop.permute.xlu1 %2517  ;;  %v5989_v36 = vor.u32 %v2579_v37, %v2575_v7  ;;  %v2644_v37 = vor.u32 %v2643_v46, %v2639_v54 }
 0x433   : > { %v5982_v11 = vsel %vm1060_vm10, %v2872_v48, %v2518_v55  ;;  %v5984_v17 = vpop.permute.xlu2 %2539  ;;  %v3258_v48 = vunpack.c.l.b16 %v5936_v41  ;;  %v1307_v41 = vpack.c.bf16 %v1291_v45, %v1291_v45  ;;  %v2104_v55 = vshrl.u32 %v2063_v52, 16 }
 0x434   : > { %6809 = vst [vmem:[#allocation29_spill] sm:$0xff] %v5989_v36  ;;  %vm3070_vm10 = vcmask 982016  }
 0x435   : > { %v2237_v49 = vunpack.c.l.b16 %v1307_v41  ;;  %v2106_v16 = vrot.slane %v2104_v55, 7  ;;  %v3669_v55 = vld [vmem:[%s3744_s20 + $0x1c] sm:$0xf] }
 0x437   : > { %v2253_v45 = vpack.c.b16 %v2237_v49, %v2237_v49 }
 0x438   : > { %2815 = vrot.lane.b32.xlu1 %v5814_v20, %s3698_s19  ;;  %3221 = vrot.lane.b32.xlu0 %v3667_v40, %s3683_s21  ;;  %v6004_v20 = vsel %vm410_vm3, %v1311_v56, %v2294_v19 }
 0x439   : > { %2625 = vrot.lane.b32.xlu2 %v5989_v36, %s3696_s14  ;;  %v2659_v31 = vshll.u32 %v6004_v20, 16  ;;  %v2657_v46 = vshrl.u32 %v6004_v20, 16 }
 0x43a   : > { %v5998_v6 = vpop.permute.xlu0 %2697  ;;  %v3234_v32 = vpop.permute.xlu1 %3233 }
 0x43b   : > { %v3259_v0 = vunpack.c.l.b16 %v3234_v32  ;;  %v6001_v24 = vpop.permute.xlu2 %2565  ;;  %v2661_v40 = vrot.slane %v2659_v31, 1  ;;  %v2107_v32 = vshll.u32 %v2063_v52, 16 }
 0x43d   : > { %v3275_v13 = vpack.c.b16 %v3259_v0, %v3258_v48  ;;  %v3612_v48 = vld [vmem:[%s6438_s2 + $0x30] sm:$0xff]  ;;  %v2109_v0 = vor.u32 %v2107_v32, %v2106_v16  ;;  %v6026_v54 = vor.u32 %v2661_v40, %v2657_v46  ;;  %v3609_v40 = vld [vmem:[%s6438_s2 + $0x18] sm:$0xff] }
 0x43e   : > { %3617 = vmatpush.bf16.msra.mxu2 %v3612_v48  ;;  %3175 = vmatpush.bf16.msrb.mxu0 %v3612_v48 }
 0x43f   : > { %3591 = vmatmul.msk.bf16.gmra.mxu3 %vm884_vm5, %v3275_v13  ;;  %3616 = vmatpush.bf16.msrb.mxu1 %v3612_v48  ;;  %6810 = vst [vmem:[#allocation54_spill] sm:$0xff] %v6026_v54  ;;  %v3611_v13 = vld [vmem:[%s6438_s2 + $0x28] sm:$0xff]  ;;  %v3670_v48 = vld [vmem:[%s3744_s20 + $0x24] sm:$0xf] }
 0x440   : > { %3235 = vrot.lane.b32.xlu1 %v3668_v34, %s3683_s21  ;;  %2529 = vrot.lane.b32.xlu0 %v5963_v4, %s3691_s9  ;;  %v6045_v34 = vsel %vm3799_vm2, %v5979_v35, %v2109_v0  ;;  %v3608_v0 = vld [vmem:[%s6438_s2 + $0x10] sm:$0xff]  ;;  %vm2971_vm2 = vcmask 588800  }
 0x441   : > { %2687 = vrot.lane.b32.xlu2 %v2644_v37, %s3693_s11  ;;  %v2276_v37 = vshrl.u32 %v2253_v45, 16  ;;  %v2584_v49 = vshll.u32 %v6045_v34, 16 }
 0x442   : > { %v6016_v56 = vpop.permute.xlu0 %2736  ;;  %v6018_v7 = vpop.permute.xlu1 %2559  ;;  %3619 = vmatpush.bf16.msra.mxu2 %v3611_v13  ;;  %3176 = vmatpush.bf16.msrb.mxu0 %v3611_v13 }
 0x443   : > { %v6020_v19 = vpop.permute.xlu2 %2699  ;;  %3618 = vmatpush.bf16.msrb.mxu1 %v3611_v13  ;;  %v2278_v16 = vrot.slane %v2276_v37, 7  ;;  %v2586_v32 = vrot.slane %v2584_v49, 1  ;;  %v2582_v13 = vshrl.u32 %v6045_v34, 16 }
 0x445   : > { %v6065_v45 = vsel %vm410_vm3, %v1307_v41, %v2278_v16  ;;  %v3607_v41 = vld [vmem:[%s6438_s2 + $0x8] sm:$0xff]  ;;  %vm2988_vm3 = vcmask 654336  }
 0x446   : > { %v2647_v49 = vshll.u32 %v6065_v45, 16 }
 0x448   : > { %3241 = vrot.lane.b32.xlu1 %v3669_v55, %s3683_s21  ;;  %2551 = vrot.lane.b32.xlu0 %v2333_v28, %s3692_s10  ;;  %v3610_v28 = vld [vmem:[%s6438_s2 + $0x20] sm:$0xff]  ;;  %v6811_v55 = vld [vmem:[#allocation4_spill] sm:$0xff] }
 0x449   : > { %2693 = vrot.lane.b32.xlu2 %v6026_v54, %s3693_s11  ;;  %3621 = vmatpush.bf16.msra.mxu2 %v3610_v28  ;;  %v6814_v54 = vld [vmem:[#allocation10_spill] sm:$0xff] }
 0x44a   : > { %v6036_v52 = vpop.permute.xlu0 %2761  ;;  %v6038_v31 = vpop.permute.xlu1 %2633  ;;  %3177 = vmatpush.bf16.msrb.mxu0 %v3610_v28  ;;  %3620 = vmatpush.bf16.msrb.mxu1 %v3610_v28  ;;  %v6073_v28 = vor.u32 %v2586_v32, %v2582_v13  ;;  %v2645_v13 = vshrl.u32 %v6065_v45, 16 }
 0x44b   : > { %v6040_v5 = vpop.permute.xlu2 %2725 }
 0x44d   : > { %3623 = vmatpush.bf16.msra.mxu2 %v3609_v40 }
 0x44e   : > { %3178 = vmatpush.bf16.msrb.mxu0 %v3609_v40  ;;  %3622 = vmatpush.bf16.msrb.mxu1 %v3609_v40 }
 0x450   : > { %3243 = vrot.lane.b32.xlu1 %v3670_v48, %s3683_s21  ;;  %2557 = vrot.lane.b32.xlu0 %v6004_v20, %s3692_s10  ;;  %v2649_v48 = vrot.slane %v2647_v49, 1 }
 0x451   : > { %2715 = vrot.lane.b32.xlu2 %v5600_v57, %s3694_s12  ;;  %v6812_v57 = vld [vmem:[#allocation6_spill] sm:$0xff]  ;;  %3625 = vmatpush.bf16.msra.mxu2 %v3608_v0 }
 0x452   : > { %v6060_v23 = vpop.permute.xlu0 %2797  ;;  %v2720_v35 = vpop.permute.xlu1 %2719  ;;  %v3276_v37 = vpack.c.b16 %v6812_v57, %v6811_v55  ;;  %3179 = vmatpush.bf16.msrb.mxu0 %v3608_v0  ;;  %3624 = vmatpush.bf16.msrb.mxu1 %v3608_v0  ;;  %v3606_v0 = vld [vmem:[%s6438_s2] sm:$0xff]  ;;  %v2570_v55 = vshll.u32 %v5674_v51, 16  ;;  %v6095_v57 = vor.u32 %v2649_v48, %v2645_v13  ;;  %v2568_v48 = vshrl.u32 %v5674_v51, 16  ;;  %v6813_v13 = vld [vmem:[#allocation5_spill] sm:$0xff] }
 0x453   : > { %v6062_v46 = vpop.permute.xlu2 %2763  ;;  %v3277_v36 = vpack.c.b16 %v6814_v54, %v6813_v13 }
 0x454   : > { %3592 = vmatmul.msk.bf16.gmra.mxu3 %vm884_vm5, %v3276_v37  ;;  %v2572_v37 = vrot.slane %v2570_v55, 1 }
 0x455   : > { %3627 = vmatpush.bf16.msra.mxu2 %v3607_v41 }
 0x456   : > { %3180 = vmatpush.bf16.msrb.mxu0 %v3607_v41  ;;  %3626 = vmatpush.bf16.msrb.mxu1 %v3607_v41  ;;  %v2573_v55 = vor.u32 %v2572_v37, %v2568_v48 }
 0x458   : > { %2531 = vrot.lane.b32.xlu1 %v6045_v34, %s3691_s9  ;;  %2627 = vrot.lane.b32.xlu0 %v6073_v28, %s3696_s14  ;;  %s6399_s9 = scalar_lea.vmem %s6440_s4, %s3602_s17 }
 0x459   : > { %2730 = vrot.lane.b32.xlu2 %v5411_v12, %s3699_s22  ;;  %3629 = vmatpush.bf16.msra.mxu2 %v3606_v0  ;;  %v2913_v12 = vsel %vm2903_vm14, %v5844_v29, %v6018_v7  ;;  %v2915_v29 = vsel %vm2903_vm14, %v5957_v42, %v5859_v59 }
 0x45a   : > { %v6086_v16 = vpop.permute.xlu0 %2813  ;;  %v2739_v40 = vpop.permute.xlu1 %2738  ;;  %3181 = vmatpush.bf16.msrb.mxu0 %v3606_v0  ;;  %3628 = vmatpush.bf16.msrb.mxu1 %v3606_v0  ;;  %v2930_v0 = vsel %vm2920_vm15, %v2913_v12, %v5977_v14  ;;  %v2932_v7 = vsel %vm2920_vm15, %v2915_v29, %v6038_v31  ;;  %v2651_v29 = vshrl.u32 %v5973_v30, 16 }
 0x45b   : > { %v6088_v32 = vpop.permute.xlu2 %2787  ;;  %v2947_v51 = vsel %vm2937_vm0, %v2930_v0, %v5871_v27  ;;  %v2949_v59 = vsel %vm2937_vm0, %v2932_v7, %v5998_v6  ;;  %v6816_v7 = vld [vmem:[#allocation12_spill] sm:$0xff] }
 0x45c   : > { %v2964_v14 = vsel %vm2954_vm1, %v2947_v51, %v2720_v35  ;;  %v2589_v35 = vshrl.u32 %v5950_v22, 16 }
 0x45d   : > { %3342 = vmatpush.bf16.msrb.mxu2 %v5895_v2  ;;  %v2981_v27 = vsel %vm2971_vm2, %v2964_v14, %v6016_v56 }
 0x45e   : > { %v2998_v12 = vsel %vm2988_vm3, %v2981_v27, %v5908_v38 }
 0x460   : > { %2553 = vrot.lane.b32.xlu1 %v6065_v45, %s3692_s10  ;;  %2689 = vrot.lane.b32.xlu0 %v6095_v57, %s3693_s11 }
 0x461   : > { %2751 = vrot.lane.b32.xlu2 %v5562_v25, %s3695_s13  ;;  %v2591_v25 = vshll.u32 %v5950_v22, 16 }
 0x462   : > { %v2840_v49 = vpop.permute.xlu0 %2839  ;;  %v2782_v2 = vpop.permute.xlu1 %2781 }
 0x463   : > { %v6107_v41 = vpop.permute.xlu2 %2829  ;;  %v2593_v42 = vrot.slane %v2591_v25, 1  ;;  %v3015_v56 = vsel %vm3005_vm4, %v2998_v12, %v2782_v2 }
 0x464   : > { %3593 = vmatmul.msk.bf16.gmra.mxu3 %vm884_vm5, %v3277_v36  ;;  %v3032_v38 = vsel %vm3022_vm7, %v3015_v56, %v6060_v23 }
 0x465   : > { %v6144_v37 = vor.u32 %v2593_v42, %v2589_v35  ;;  %v3048_v51 = vsel %vm3038_vm8, %v3032_v38, %v5941_v26 }
 0x468   : > { %2623 = vrot.lane.b32.xlu1 %v2573_v55, %s3696_s14  ;;  %2711 = vrot.lane.b32.xlu0 %v5550_v10, %s3694_s12  ;;  %v2966_v10 = vsel %vm2954_vm1, %v2949_v59, %v5892_v47  ;;  %v3671_v47 = vld [vmem:[%s3744_s20 + $0x34] sm:$0xf] }
 0x469   : > { %2757 = vrot.lane.b32.xlu2 %v5616_v1, %s3695_s13  ;;  %v2983_v6 = vsel %vm2971_vm2, %v2966_v10, %v2739_v40  ;;  %v2653_v1 = vshll.u32 %v5973_v30, 16 }
 0x46a   : > { %v2800_v36 = vpop.permute.xlu1 %2799  ;;  %v6131_v54 = vpop.permute.xlu0 %2541  ;;  %v3000_v48 = vsel %vm2988_vm3, %v2983_v6, %v6036_v52 }
 0x46b   : > { %v6135_v31 = vpop.permute.xlu2 %3237  ;;  %v2655_v40 = vrot.slane %v2653_v1, 1  ;;  %v3017_v2 = vsel %vm3005_vm4, %v3000_v48, %v5923_v33  ;;  %v6818_v1 = vld [vmem:[#allocation44_spill] sm:$0xff]  ;;  %v3673_v48 = vld [vmem:[%s3744_s20 + $0x3c] sm:$0xf] }
 0x46c   : > { %v3034_v25 = vsel %vm3022_vm7, %v3017_v2, %v2800_v36 }
 0x46d   : > { %v6168_v14 = vor.u32 %v2655_v40, %v2651_v29  ;;  %v3050_v33 = vsel %vm3038_vm8, %v3034_v25, %v6086_v16 }
 0x46e   : > { %v3066_v59 = vsel %vm3054_vm9, %v3050_v33, %v5959_v15 }
 0x470   : > { %2629 = vrot.lane.b32.xlu1 %v6144_v37, %s3696_s14  ;;  %2717 = vrot.lane.b32.xlu0 %v5612_v43, %s3694_s12  ;;  %v6815_v43 = vld [vmem:[#allocation14_spill] sm:$0xff] }
 0x471   : > { %3247 = vrot.lane.b32.xlu2 %v3671_v47, %s3683_s21  ;;  %v3278_v55 = vpack.c.b16 %v6816_v7, %v6815_v43 }
 0x472   : > { %v2826_v0 = vpop.permute.xlu1 %2825  ;;  %v2636_v13 = vpop.permute.xlu0 %2635 }
 0x473   : > { %v6159_v52 = vpop.permute.xlu2 %3219  ;;  %v3064_v23 = vsel %vm3054_vm9, %v3048_v51, %v2826_v0 }
 0x474   : > { %3594 = vmatmul.msk.bf16.gmra.mxu3 %vm884_vm5, %v3278_v55  ;;  %v3080_v26 = vsel %vm3070_vm10, %v3064_v23, %v2840_v49  ;;  %v6817_v49 = vld [vmem:[#allocation16_spill] sm:$0xff] }
 0x475   : > { %v3114_v10 = vunpack.c.l.b16 %v3080_v26  ;;  %v3279_v12 = vpack.c.b16 %v6818_v1, %v6817_v49 }
 0x478   : > { %2691 = vrot.lane.b32.xlu1 %v6168_v14, %s3693_s11  ;;  %2732 = vrot.lane.b32.xlu0 %v5402_v53, %s3699_s22 }
 0x479   : > { %2775 = vrot.lane.b32.xlu2 %v5679_v39, %s3697_s18 }
 0x47a   : > { %v2842_v42 = vpop.permute.xlu1 %2841  ;;  %v2702_v36 = vpop.permute.xlu0 %2701 }
 0x47b   : > { %v3082_v27 = vsel %vm3070_vm10, %v3066_v59, %v2842_v42  ;;  %v6183_v16 = vpop.permute.xlu2 %3245 }
 0x47c   : > { %v3115_v35 = vunpack.c.l.b16 %v3082_v27  ;;  %v6820_v27 = vld [vmem:[#allocation100_spill] sm:$0xff] }
 0x47e   : > { %v3120_v6 = vpack.c.b16 %v3115_v35, %v3114_v10  ;;  %v3261_v10 = vunpack.c.l.b16 %v6135_v31 }
 0x480   : > { %3192 = vmatmul.bf16.vlgmr.msra.gmra.mxu2 %v3120_v6  ;;  %2713 = vrot.lane.b32.xlu1 %v5588_v60, %s3694_s12  ;;  %v3672_v60 = vld [vmem:[%s3744_s20 + $0x10] sm:$0xf] }
 0x481   : > { %2753 = vrot.lane.b32.xlu0 %v5594_v9, %s3695_s13  ;;  %2789 = vrot.lane.b32.xlu2 %v5963_v4, %s3701_s24  ;;  %v6821_v6 = vld [vmem:[#allocation104_spill] sm:$0xff] }
 0x482   : > { %v2564_v53 = vpop.permute.xlu1 %2563  ;;  %v2741_v39 = vpop.permute.xlu0 %2740 }
 0x483   : > { %v2534_v15 = vpop.permute.xlu2 %2533 }
 0x484   : > { %v6195_v56 = vsel %vm1124_vm12, %v5939_v63, %v2534_v15  ;;  %3595 = vmatmul.msk.bf16.gmra.mxu3 %vm884_vm5, %v3279_v12 }
 0x488   : > { %2728 = vrot.lane.b32.xlu1 %v5417_v44, %s3699_s22  ;;  %v2902_v44 = vsel %vm1124_vm12, %v5982_v11, %v6131_v54 }
 0x489   : > { %3223 = vrot.lane.b32.xlu0 %v3672_v60, %s3683_s21  ;;  %2795 = vrot.lane.b32.xlu2 %v5685_v21, %s3701_s24  ;;  %v2900_v21 = vsel %vm1124_vm12, %v5920_v62, %v5984_v17  ;;  %v2919_v40 = vsel %vm2903_vm14, %v2902_v44, %v6001_v24 }
 0x48a   : > { %v2638_v9 = vpop.permute.xlu1 %2637  ;;  %v2766_v4 = vpop.permute.xlu0 %2765 }
 0x48b   : > { %v2936_v11 = vsel %vm2920_vm15, %v2919_v40, %v2638_v9  ;;  %v6822_v9 = vld [vmem:[#allocation7_spill] sm:$0xff]  ;;  %v6825_v40 = vld [vmem:[#allocation42_spill] sm:$0xff] }
 0x48c   : > { %v2953_v17 = vsel %vm2937_vm0, %v2936_v11, %v2702_v36  ;;  %v2556_v36 = vpop.permute.xlu2 %2555 }
 0x48d   : > { %v2970_v24 = vsel %vm2954_vm1, %v2953_v17, %v6040_v5 }
 0x490   : > { %2734 = vrot.lane.b32.xlu1 %v5444_v3, %s3699_s22  ;;  %v2917_v3 = vsel %vm2903_vm14, %v2900_v21, %v2564_v53 }
 0x491   : > { %3249 = vrot.lane.b32.xlu0 %v3673_v48, %s3683_s21  ;;  %2807 = vrot.lane.b32.xlu2 %v6004_v20, %s3698_s19  ;;  %v2934_v62 = vsel %vm2920_vm15, %v2917_v3, %v2636_v13 }
 0x492   : > { %v2724_v63 = vpop.permute.xlu1 %2723  ;;  %v2802_v47 = vpop.permute.xlu0 %2801 }
 0x494   : > { %v2626_v1 = vpop.permute.xlu2 %2625 }
 0x498   : > { %2755 = vrot.lane.b32.xlu1 %v5606_v18, %s3695_s13  ;;  %v2951_v18 = vsel %vm2937_vm0, %v2934_v62, %v6020_v19 }
 0x499   : > { %2777 = vrot.lane.b32.xlu0 %v5722_v58, %s3697_s18  ;;  %2819 = vrot.lane.b32.xlu2 %v6073_v28, %s3700_s23  ;;  %v2968_v38 = vsel %vm2954_vm1, %v2951_v18, %v2724_v63  ;;  %v3674_v58 = vld [vmem:[%s3744_s20 + $0x18] sm:$0xf]  ;;  %v6826_v18 = vld [vmem:[#allocation2_spill] sm:$0xff] }
 0x49a   : > { %v2743_v20 = vpop.permute.xlu1 %2742  ;;  %v2844_v54 = vpop.permute.xlu0 %2843  ;;  %v2985_v19 = vsel %vm2971_vm2, %v2968_v38, %v2741_v39 }
 0x49b   : > { %v2987_v28 = vsel %vm2971_vm2, %v2970_v24, %v2743_v20  ;;  %v3002_v5 = vsel %vm2988_vm3, %v2985_v19, %v6062_v46  ;;  %v6828_v24 = vld [vmem:[#allocation111_spill] sm:$0xff] }
 0x49c   : > { %v3004_v2 = vsel %vm2988_vm3, %v2987_v28, %v2766_v4  ;;  %v6823_v4 = vld [vmem:[#allocation3_spill] sm:$0xff] }
 0x49d   : > { %v3021_v25 = vsel %vm3005_vm4, %v3004_v2, %v6088_v32  ;;  %v3268_v48 = vpack.c.b16 %v6823_v4, %v6822_v9 }
 0x49e   : > { %v3037_v46 = vsel %vm3022_vm7, %v3021_v25, %v2802_v47 }
 0x4a0   : > { %3225 = vrot.lane.b32.xlu1 %v3674_v58, %s3683_s21  ;;  %v3265_v58 = vunpack.c.l.b16 %v6183_v16 }
 0x4a1   : > { %2791 = vrot.lane.b32.xlu0 %v6045_v34, %s3701_s24  ;;  %2831 = vrot.lane.b32.xlu2 %v6095_v57, %s3702_s25  ;;  %v3252_v34 = vunpack.c.l.b16 %v6159_v52  ;;  %v6819_v57 = vld [vmem:[#allocation123_spill] sm:$0xff] }
 0x4a2   : > { %v2786_v0 = vpop.permute.xlu1 %2785  ;;  %v3240_v13 = vpop.permute.xlu0 %3239 }
 0x4a3   : > { %v3019_v29 = vsel %vm3005_vm4, %v3002_v5, %v2786_v0 }
 0x4a4   : > { %v3036_v7 = vsel %vm3022_vm7, %v3019_v29, %v2802_v47 }
 0x4a8   : > { %2773 = vrot.lane.b32.xlu1 %v5636_v8, %s3697_s18 }
 0x4a9   : > { %2803 = vrot.lane.b32.xlu0 %v6065_v45, %s3698_s19  ;;  %2837 = vrot.lane.b32.xlu2 %v6819_v57, %s3702_s25  ;;  %v6829_v57 = vld [vmem:[#allocation54_spill] sm:$0xff] }
 0x4aa   : > { %v2816_v43 = vpop.permute.xlu1 %2815  ;;  %v3222_v55 = vpop.permute.xlu0 %3221 }
 0x4ab   : > { %v3052_v51 = vsel %vm3038_vm8, %v3036_v7, %v2816_v43  ;;  %v3053_v32 = vsel %vm3038_vm8, %v3037_v46, %v2816_v43  ;;  %v3253_v23 = vunpack.c.l.b16 %v3222_v55 }
 0x4ac   : > { %v3068_v8 = vsel %vm3054_vm9, %v3052_v51, %v6107_v41  ;;  %v3069_v45 = vsel %vm3054_vm9, %v3053_v32, %v6107_v41  ;;  %v6830_v51 = vld [vmem:[#allocation9_spill] sm:$0xff] }
 0x4ad   : > { %v6262_v52 = vpack.c.b16 %v3253_v23, %v3252_v34  ;;  %v3084_v33 = vsel %vm3070_vm10, %v3068_v8, %v2844_v54  ;;  %v3085_v26 = vsel %vm3070_vm10, %v3069_v45, %v2844_v54  ;;  %v6831_v32 = vld [vmem:[#allocation13_spill] sm:$0xff] }
 0x4ae   : > { %v3116_v59 = vunpack.c.l.b16 %v3084_v33  ;;  %v3117_v42 = vunpack.c.l.b16 %v3085_v26  ;;  %v3270_v23 = vpack.c.b16 %v6831_v32, %v6830_v51 }
 0x4b0   : > { %2779 = vrot.lane.b32.xlu1 %v6820_v27, %s3697_s18  ;;  %v3121_v35 = vpack.c.b16 %v3117_v42, %v3116_v59 }
 0x4b1   : > { %2809 = vrot.lane.b32.xlu0 %v6821_v6, %s3698_s19 }
 0x4b2   : > { %v3236_v53 = vpop.permute.xlu1 %3235  ;;  %3197 = vmatmul.bf16.gmra.mxu2 %v3121_v35  ;;  %v2530_v39 = vpop.permute.xlu0 %2529 }
 0x4b3   : > { %v3260_v41 = vunpack.c.l.b16 %v3236_v53  ;;  %v2890_v15 = vsel %vm1124_vm12, %v5791_v61, %v2530_v39  ;;  %v3262_v61 = vunpack.c.l.b16 %v3240_v13  ;;  %v6287_v44 = vpop.f32.mrf.mxu3 }
 0x4b5   : > { %v3280_v49 = vpack.c.b16 %v3261_v10, %v3260_v41 }
 0x4b7   : > { %3596 = vmatmul.msk.bf16.gmra.mxu3 %vm884_vm5, %v3280_v49  ;;  %v6833_v49 = vld [vmem:[#allocation15_spill] sm:$0xff] }
 0x4b8   : > { %2793 = vrot.lane.b32.xlu1 %v5950_v22, %s3701_s24 }
 0x4b9   : > { %2821 = vrot.lane.b32.xlu0 %v6144_v37, %s3700_s23  ;;  %v2688_v37 = vpop.permute.xlu2 %2687 }
 0x4ba   : > { %v3242_v31 = vpop.permute.xlu1 %3241  ;;  %v2552_v12 = vpop.permute.xlu0 %2551 }
 0x4bb   : > { %v2905_v60 = vsel %vm2903_vm14, %v5829_v50, %v2552_v12  ;;  %v3263_v63 = vunpack.c.l.b16 %v3242_v31  ;;  %v6298_v17 = vpop.f32.mrf.mxu3 }
 0x4bd   : > { %v3281_v21 = vpack.c.b16 %v3263_v63, %v3262_v61 }
 0x4c0   : > { %2805 = vrot.lane.b32.xlu1 %v5973_v30, %s3698_s19  ;;  %v6824_v30 = vld [vmem:[#allocation29_spill] sm:$0xff] }
 0x4c1   : > { %2833 = vrot.lane.b32.xlu0 %v6168_v14, %s3702_s25  ;;  %v2694_v54 = vpop.permute.xlu2 %2693 }
 0x4c2   : > { %v3244_v22 = vpop.permute.xlu1 %3243  ;;  %3584 = vmatmul.msk.bf16.vlgmr.msrb.gmra.mxu2 %vm884_vm5, %v3268_v48  ;;  %v2558_v47 = vpop.permute.xlu0 %2557 }
 0x4c3   : > { %v2911_v50 = vsel %vm2903_vm14, %v6195_v56, %v2558_v47  ;;  %v6827_v56 = vld [vmem:[#allocation11_spill] sm:$0xff]  ;;  %v3264_v28 = vunpack.c.l.b16 %v3244_v22  ;;  %v6310_v34 = vpop.f32.mrf.mxu3 }
 0x4c4   : > { %v3269_v38 = vpack.c.b16 %v6827_v56, %v6826_v18 }
 0x4c5   : > { %v3282_v5 = vpack.c.b16 %v3265_v58, %v3264_v28 }
 0x4c7   : > { %3597 = vmatmul.msk.bf16.gmra.mxu3 %vm884_vm5, %v3281_v21 }
 0x4c8   : > { %2817 = vrot.lane.b32.xlu1 %v6824_v30, %s3700_s23 }
 0x4c9   : > { %v2716_v25 = vpop.permute.xlu2 %2715 }
 0x4ca   : > { %v2532_v3 = vpop.permute.xlu1 %2531  ;;  %v2628_v11 = vpop.permute.xlu0 %2627 }
 0x4cb   : > { %v2892_v14 = vsel %vm1124_vm12, %v6825_v40, %v2532_v3  ;;  %v6319_v45 = vpop.f32.mrf.mxu3 }
 0x4cc   : > { %v2909_v20 = vsel %vm2903_vm14, %v2892_v14, %v2556_v36 }
 0x4cd   : > { %v2926_v62 = vsel %vm2920_vm15, %v2909_v20, %v2628_v11 }
 0x4d0   : > { %2823 = vrot.lane.b32.xlu1 %v6828_v24, %s3700_s23 }
 0x4d1   : > { %v2731_v8 = vpop.permute.xlu2 %2730 }
 0x4d2   : > { %v2554_v0 = vpop.permute.xlu1 %2553  ;;  %3585 = vmatmul.msk.bf16.gmra.mxu2 %vm884_vm5, %v3269_v38  ;;  %v2690_v19 = vpop.permute.xlu0 %2689 }
 0x4d3   : > { %v2907_v13 = vsel %vm2903_vm14, %v2890_v15, %v2554_v0  ;;  %v6832_v15 = vld [vmem:[#allocation17_spill] sm:$0xff] }
 0x4d4   : > { %v2924_v2 = vsel %vm2920_vm15, %v2907_v13, %v2626_v1  ;;  %v3271_v1 = vpack.c.b16 %v6833_v49, %v6832_v15 }
 0x4d5   : > { %v2941_v29 = vsel %vm2937_vm0, %v2924_v2, %v2690_v19 }
 0x4d7   : > { %3598 = vmatmul.msk.bf16.gmra.mxu3 %vm884_vm5, %v3282_v5  ;;  %v6325_v35 = vpop.f32.mrf.mxu3 }
 0x4d8   : > { %2835 = vrot.lane.b32.xlu1 %v6829_v57, %s3702_s25 }
 0x4d9   : > { %v2752_v10 = vpop.permute.xlu2 %2751 }
 0x4da   : > { %v2624_v16 = vpop.permute.xlu1 %2623  ;;  %v2712_v7 = vpop.permute.xlu0 %2711 }
 0x4db   : > { %v2922_v43 = vsel %vm2920_vm15, %v2905_v60, %v2624_v16 }
 0x4dc   : > { %v2939_v46 = vsel %vm2937_vm0, %v2922_v43, %v2688_v37 }
 0x4dd   : > { %v2956_v55 = vsel %vm2954_vm1, %v2939_v46, %v2712_v7 }
 0x4df   : > { %v6337_v4 = vpop.f32.mrf.mxu3 }
 0x4e1   : > { %v2758_v48 = vpop.permute.xlu2 %2757 }
 0x4e2   : > { %v2630_v33 = vpop.permute.xlu1 %2629  ;;  %3586 = vmatmul.msk.bf16.gmra.mxu2 %vm884_vm5, %v3270_v23  ;;  %v2718_v59 = vpop.permute.xlu0 %2717 }
 0x4e3   : > { %v2928_v26 = vsel %vm2920_vm15, %v2911_v50, %v2630_v33 }
 0x4e4   : > { %v2945_v42 = vsel %vm2937_vm0, %v2928_v26, %v2694_v54 }
 0x4e5   : > { %v2962_v36 = vsel %vm2954_vm1, %v2945_v42, %v2718_v59 }
 0x4e7   : > { %v6342_v50 = vpop.f32.mrf.mxu3 }
 0x4e9   : > { %v3248_v21 = vpop.permute.xlu2 %3247 }
 0x4ea   : > { %v2692_v27 = vpop.permute.xlu1 %2691  ;;  %v2733_v53 = vpop.permute.xlu0 %2732  ;;  %v3266_v30 = vunpack.c.l.b16 %v3248_v21 }
 0x4eb   : > { %v2943_v6 = vsel %vm2937_vm0, %v2926_v62, %v2692_v27 }
 0x4ec   : > { %v2960_v41 = vsel %vm2954_vm1, %v2943_v6, %v2716_v25 }
 0x4ed   : > { %v6330_v39 = vsel %vm2971_vm2, %v2960_v41, %v2733_v53 }
 0x4ef   : > { %v6349_v62 = vpop.f32.mrf.mxu3 }
 0x4f1   : > { %v2776_v18 = vpop.permute.xlu2 %2775 }
 0x4f2   : > { %v2714_v31 = vpop.permute.xlu1 %2713  ;;  %3587 = vmatmul.msk.bf16.gmra.mxu2 %vm884_vm5, %v3271_v1 }
 0x4f3   : > { %v2958_v12 = vsel %vm2954_vm1, %v2941_v29, %v2714_v31  ;;  %v2754_v60 = vpop.permute.xlu0 %2753 }
 0x4f4   : > { %v2975_v9 = vsel %vm2971_vm2, %v2958_v12, %v2731_v8 }
 0x4f5   : > { %v2992_v61 = vsel %vm2988_vm3, %v2975_v9, %v2754_v60 }
 0x4f6   : > { %v3009_v33 = vsel %vm3005_vm4, %v2992_v61, %v2776_v18 }
 0x4f7   : > { %v6351_v28 = vpop.f32.mrf.mxu3 }
 0x4f9   : > { %v2790_v0 = vpop.permute.xlu2 %2789 }
 0x4fa   : > { %v2729_v63 = vpop.permute.xlu1 %2728 }
 0x4fb   : > { %v2973_v22 = vsel %vm2971_vm2, %v2956_v55, %v2729_v63  ;;  %v3224_v37 = vpop.permute.xlu0 %3223 }
 0x4fc   : > { %v2990_v47 = vsel %vm2988_vm3, %v2973_v22, %v2752_v10  ;;  %v3254_v24 = vunpack.c.l.b16 %v3224_v37 }
 0x4ff   : > { %v6354_v29 = vpop.f32.mrf.mxu3 }
 0x501   : > { %v2796_v25 = vpop.permute.xlu2 %2795 }
 0x502   : > { %v2735_v3 = vpop.permute.xlu1 %2734  ;;  %3588 = vmatmul.msk.bf16.gmra.mxu2 %vm884_vm5, %v6262_v52 }
 0x503   : > { %v2979_v40 = vsel %vm2971_vm2, %v2962_v36, %v2735_v3  ;;  %v3250_v14 = vpop.permute.xlu0 %3249  ;;  %v6356_v16 = vpop.f32.mrf.mxu2 }
 0x504   : > { %v3267_v11 = vunpack.c.l.b16 %v3250_v14  ;;  %v2996_v20 = vsel %vm2988_vm3, %v2979_v40, %v2758_v48 }
 0x506   : > { %v3283_v54 = vpack.c.b16 %v3267_v11, %v3266_v30 }
 0x507   : > { %v6358_v7 = vpop.f32.mrf.mxu3 }
 0x508   : > { %3599 = vmatmul.msk.bf16.gmra.mxu3 %vm884_vm5, %v3283_v54 }
 0x509   : > { %v2808_v46 = vpop.permute.xlu2 %2807 }
 0x50a   : > { %v2756_v56 = vpop.permute.xlu1 %2755 }
 0x50b   : > { %v2778_v38 = vpop.permute.xlu0 %2777  ;;  %v6360_v51 = vpop.f32.mrf.mxu2  ;;  %v2994_v37 = vsel %vm2988_vm3, %v6330_v39, %v2756_v56 }
 0x50c   : > { %v3011_v30 = vsel %vm3005_vm4, %v2994_v37, %v2778_v38 }
 0x50f   : > { %v6362_v23 = vpop.f32.mrf.mxu3 }
 0x511   : > { %v2820_v8 = vpop.permute.xlu2 %2819 }
 0x512   : > { %v3226_v58 = vpop.permute.xlu1 %3225 }
 0x513   : > { %v3255_v52 = vunpack.c.l.b16 %v3226_v58  ;;  %v2792_v13 = vpop.permute.xlu0 %2791 }
 0x514   : > { %v3026_v59 = vsel %vm3022_vm7, %v3009_v33, %v2792_v13 }
 0x515   : > { %v3273_v19 = vpack.c.b16 %v3255_v52, %v3254_v24 }
 0x517   : > { %3589 = vmatmul.msk.bf16.gmra.mxu2 %vm884_vm5, %v3273_v19 }
 0x519   : > { %v2832_v31 = vpop.permute.xlu2 %2831 }
 0x51a   : > { %v2774_v2 = vpop.permute.xlu1 %2773 }
 0x51b   : > { %v2804_v5 = vpop.permute.xlu0 %2803  ;;  %v3007_v42 = vsel %vm3005_vm4, %v2990_v47, %v2774_v2 }
 0x51c   : > { %v3024_v10 = vsel %vm3022_vm7, %v3007_v42, %v2790_v0  ;;  %v3208_v42 = vmul.f32 0.2, %v6360_v51 }
 0x51d   : > { %v3040_v41 = vsel %vm3038_vm8, %v3024_v10, %v2804_v5 }
 0x521   : > { %v2838_v18 = vpop.permute.xlu2 %2837 }
 0x522   : > { %v2780_v57 = vpop.permute.xlu1 %2779 }
 0x523   : > { %v2810_v43 = vpop.permute.xlu0 %2809  ;;  %v3013_v63 = vsel %vm3005_vm4, %v2996_v20, %v2780_v57 }
 0x524   : > { %v3030_v47 = vsel %vm3022_vm7, %v3013_v63, %v2796_v25 }
 0x525   : > { %v3046_v14 = vsel %vm3038_vm8, %v3030_v47, %v2810_v43  ;;  %v3207_v43 = vmul.f32 0.2, %v6356_v16 }
 0x52a   : > { %v2794_v55 = vpop.permute.xlu1 %2793 }
 0x52b   : > { %v2822_v32 = vpop.permute.xlu0 %2821  ;;  %v3028_v40 = vsel %vm3022_vm7, %v3011_v30, %v2794_v55 }
 0x52c   : > { %v3044_v20 = vsel %vm3038_vm8, %v3028_v40, %v2808_v46 }
 0x52d   : > { %v3060_v39 = vsel %vm3054_vm9, %v3044_v20, %v2822_v32 }
 0x532   : > { %v2806_v26 = vpop.permute.xlu1 %2805 }
 0x533   : > { %v3042_v36 = vsel %vm3038_vm8, %v3026_v59, %v2806_v26  ;;  %v2834_v53 = vpop.permute.xlu0 %2833 }
 0x534   : > { %v3058_v6 = vsel %vm3054_vm9, %v3042_v36, %v2820_v8  ;;  %v3215_v8 = vmax.f32 %v6356_v16, %v3207_v43  ;;  %v3216_v36 = vmax.f32 %v6360_v51, %v3208_v42 }
 0x535   : > { %v6368_v27 = vpop.f32.mrf.mxu2  ;;  %v3074_v15 = vsel %vm3070_vm10, %v3058_v6, %v2834_v53 }
 0x536   : > { %v3111_v9 = vunpack.c.l.b16 %v3074_v15 }
 0x53a   : > { %v2818_v49 = vpop.permute.xlu1 %2817  ;;  %v3404_v1 = vpop.f32.mrf.mxu3 }
 0x53b   : > { %v3056_v12 = vsel %vm3054_vm9, %v3040_v41, %v2818_v49  ;;  %v3432_v49 = vmax.f32 %v6325_v35, %v3404_v1 }
 0x53c   : > { %v3072_v60 = vsel %vm3070_vm10, %v3056_v12, %v2832_v31 }
 0x53d   : > { %v3110_v48 = vunpack.c.l.b16 %v3072_v60  ;;  %v6376_v61 = vpop.f32.mrf.mxu2  ;;  %v3209_v60 = vmul.f32 0.2, %v6368_v27 }
 0x53e   : > { %v3210_v35 = vmul.f32 0.2, %v6376_v61 }
 0x53f   : > { %v3118_v22 = vpack.c.b16 %v3111_v9, %v3110_v48  ;;  %v3217_v48 = vmax.f32 %v6368_v27, %v3209_v60 }
 0x541   : > { %3182 = vmatmul.bf16.vlgmr.msrb.gmra.mxu0 %v3118_v22 }
 0x542   : > { %v2824_v21 = vpop.permute.xlu1 %2823  ;;  %v3406_v3 = vpop.f32.mrf.mxu3 }
 0x543   : > { %v3062_v54 = vsel %vm3054_vm9, %v3046_v14, %v2824_v21  ;;  %v3433_v63 = vmax.f32 %v6337_v4, %v3406_v3 }
 0x544   : > { %v3078_v24 = vsel %vm3070_vm10, %v3062_v54, %v2838_v18 }
 0x545   : > { %v3344_v11 = vpop.f32.mrf.mxu2  ;;  %v3113_v0 = vunpack.c.l.b16 %v3078_v24 }
 0x54a   : > { %v2836_v56 = vpop.permute.xlu1 %2835  ;;  %v3409_v52 = vpop.f32.mrf.mxu3 }
 0x54b   : > { %v3076_v58 = vsel %vm3070_vm10, %v3060_v39, %v2836_v56  ;;  %v3434_v3 = vmax.f32 %v6342_v50, %v3409_v52 }
 0x54c   : > { %v3112_v38 = vunpack.c.l.b16 %v3076_v58 }
 0x54d   : > { %v3346_v13 = vpop.f32.mrf.mxu2 }
 0x54e   : > { %v3119_v19 = vpack.c.b16 %v3113_v0, %v3112_v38 }
 0x550   : > { %3187 = vmatmul.bf16.vlgmr.msrb.gmra.mxu1 %v3119_v19 }
 0x552   : > { %v3411_v5 = vpop.f32.mrf.mxu3 }
 0x553   : > { %v3435_v20 = vmax.f32 %v6349_v62, %v3411_v5 }
 0x555   : > { %v3349_v2 = vpop.f32.mrf.mxu2 }
 0x55a   : > { %v3414_v57 = vpop.f32.mrf.mxu3 }
 0x55b   : > { %v3436_v55 = vmax.f32 %v6351_v28, %v3414_v57 }
 0x55d   : > { %v3351_v25 = vpop.f32.mrf.mxu2 }
 0x562   : > { %v3416_v59 = vpop.f32.mrf.mxu3 }
 0x565   : > { %v3354_v46 = vpop.f32.mrf.mxu2 }
 0x566   : > { %v3428_v32 = vmax.f32 %v3354_v46, %v6287_v44  ;;  %v3437_v44 = vmax.f32 %v6354_v29, %v3416_v59 }
 0x568   : > { %v3444_v33 = vmax.f32 %v3428_v32, %v3436_v55 }
 0x56a   : > { %v3452_v26 = vadd.f32 %v3444_v33, %v3215_v8 }
 0x56c   : > { %3460 = vst.msk [vmem:[%s6399_s9 + $0x20] sm:$0xff] %vm930_vm6, %v3452_v26 }
 0x56d   : > { %v3356_v28 = vpop.f32.mrf.mxu2 }
 0x56e   : > { %v3429_v16 = vmax.f32 %v3356_v28, %v6298_v17 }
 0x570   : > { %v3445_v10 = vmax.f32 %v3429_v16, %v3437_v44 }
 0x572   : > { %v3453_v6 = vadd.f32 %v3445_v10, %v3216_v36 }
 0x574   : > { %3461 = vst.msk [vmem:[%s6399_s9 + $0x28] sm:$0xff] %vm930_vm6, %v3453_v6 }
 0x575   : > { %v3359_v53 = vpop.f32.mrf.mxu2 }
 0x576   : > { %v3430_v29 = vmax.f32 %v3359_v53, %v6310_v34 }
 0x57d   : > { %v3361_v41 = vpop.f32.mrf.mxu2 }
 0x57e   : > { %v3431_v30 = vmax.f32 %v3361_v41, %v6319_v45 }
 0x585   : > { %v3364_v15 = vpop.f32.mrf.mxu2 }
 0x586   : > { %v3424_v31 = vmax.f32 %v3344_v11, %v3364_v15 }
 0x588   : > { %v3440_v12 = vmax.f32 %v3424_v31, %v3432_v49 }
 0x58b   : > { %v3419_v9 = vpop.f32.mrf.mxu3 }
 0x58c   : > { %v3438_v17 = vmax.f32 %v6358_v7, %v3419_v9  ;;  %v3218_v7 = vmax.f32 %v6376_v61, %v3210_v35 }
 0x58d   : > { %v3366_v51 = vpop.f32.mrf.mxu2 }
 0x58e   : > { %v3446_v22 = vmax.f32 %v3430_v29, %v3438_v17  ;;  %v3425_v37 = vmax.f32 %v3346_v13, %v3366_v51 }
 0x590   : > { %v3454_v47 = vadd.f32 %v3446_v22, %v3217_v48  ;;  %v3441_v21 = vmax.f32 %v3425_v37, %v3433_v63 }
 0x592   : > { %3462 = vst.msk [vmem:[%s6399_s9 + $0x30] sm:$0xff] %vm930_vm6, %v3454_v47 }
 0x593   : > { %v3421_v1 = vpop.f32.mrf.mxu3 }
 0x594   : > { %v3439_v34 = vmax.f32 %v6362_v23, %v3421_v1 }
 0x596   : > { %v3447_v40 = vmax.f32 %v3431_v30, %v3439_v34 }
 0x598   : > { %v3455_v27 = vadd.f32 %v3447_v40, %v3218_v7 }
 0x59a   : > { %3463 = vst.msk [vmem:[%s6399_s9 + $0x38] sm:$0xff] %vm930_vm6, %v3455_v27  ;;  %v3369_v4 = vpop.f32.mrf.mxu2 }
 0x59b   : > { %v3426_v14 = vmax.f32 %v3349_v2, %v3369_v4 }
 0x59d   : > { %v3442_v11 = vmax.f32 %v3426_v14, %v3434_v3 }
 0x5a2   : > { %v3371_v54 = vpop.f32.mrf.mxu2 }
 0x5a3   : > { %v3427_v18 = vmax.f32 %v3351_v25, %v3371_v54 }
 0x5a5   : > { %v3443_v45 = vmax.f32 %v3427_v18, %v3435_v20 }
 0x5be   : > { %v3183_v23 = vpop.f32.mrf.mxu0 }
 0x5bf   : > { %v3203_v24 = vmul.f32 0.2, %v3183_v23 }
 0x5c1   : > { %v3211_v61 = vmax.f32 %v3183_v23, %v3203_v24 }
 0x5c3   : > { %v3448_v39 = vadd.f32 %v3440_v12, %v3211_v61 }
 0x5c5   : > { %3456 = vst.msk [vmem:[%s6399_s9] sm:$0xff] %vm930_vm6, %v3448_v39 }
 0x5c6   : > { %v3185_v56 = vpop.f32.mrf.mxu0 }
 0x5c7   : > { %v3204_v58 = vmul.f32 0.2, %v3185_v56 }
 0x5c9   : > { %v3212_v0 = vmax.f32 %v3185_v56, %v3204_v58 }
 0x5cb   : > { %v3449_v50 = vadd.f32 %v3441_v21, %v3212_v0 }
 0x5cd   : > { %3457 = vst.msk [vmem:[%s6399_s9 + $0x8] sm:$0xff] %vm930_vm6, %v3449_v50  ;;  %v3188_v38 = vpop.f32.mrf.mxu1 }
 0x5ce   : > { %v3205_v52 = vmul.f32 0.2, %v3188_v38 }
 0x5d0   : > { %v3213_v13 = vmax.f32 %v3188_v38, %v3205_v52 }
 0x5d2   : > { %v3450_v62 = vadd.f32 %v3442_v11, %v3213_v13 }
 0x5d4   : > { %3458 = vst.msk [vmem:[%s6399_s9 + $0x10] sm:$0xff] %vm930_vm6, %v3450_v62 }
 0x5d5   : > { %v3190_v19 = vpop.f32.mrf.mxu1 }
 0x5d6   : > { %v3206_v2 = vmul.f32 0.2, %v3190_v19 }
 0x5d8   : > { %v3214_v5 = vmax.f32 %v3190_v19, %v3206_v2 }
 0x5da   : > { %v3451_v25 = vadd.f32 %v3443_v45, %v3214_v5 }
 0x5dc   : > { %3459 = vst.msk [vmem:[%s6399_s9 + $0x18] sm:$0xff] %vm930_vm6, %v3451_v25 }
 0x5dd PF: > { %s14_s15 = sadd.s32 1, %s3681_s15  }
 0x5de   : > { %p11_p4 = scmp.ge.s32.totalorder %s14_s15, 4  }
 0x5e0   :  { %13 = sbr.rel (!%p11_p4) target bundleno = 1 (0x1), region = 66 }

</bundles_post_ra>
